<compile_context>
chip_gen: v7x
topology: tpu7x:2x2x1
jax: 0.10.0
libtpu: 0.0.40
codegen_flags: <defaults>
</compile_context>

<pallas_src>
import functools

import jax
import jax.numpy as jnp
from jax.experimental import pallas as pl
from jax.experimental.pallas import tpu as pltpu


_SQRT_2_OVER_PI = 0.7978845608028654


def _gelu_tanh(x):
    # TODO(synk): torch nn.GELU defaults to the exact erf formulation; the
    # tanh approximation used here (and in the reference) differs by ~1e-3.
    return 0.5 * x * (1.0 + jnp.tanh(_SQRT_2_OVER_PI * (x + 0.044715 * x * x * x)))


def mv2_se_kernel(x_ref, w1_ref, s1_ref, t1_ref, wd_ref, w3_ref, b3_ref,
                  wf1_ref, bf1_ref, wf2_ref, bf2_ref, o_ref, pad_ref,
                  *, stride, use_res_connect):
    """One batch element per grid step; all intermediates stay in VMEM.

    x_ref  : (1, H, W, Cin)       input image (NHWC)
    w1_ref : (Cin, hidden)        1x1 expansion conv weight
    s1_ref : (1, hidden)          BN1 fused scale  (gamma / sqrt(var+eps))
    t1_ref : (1, hidden)          BN1 fused shift  (beta - mean*scale)
    wd_ref : (9, hidden)          3x3 depthwise weights, row index = kh*3+kw
    w3_ref : (hidden, oup)        1x1 projection weight with BN2+BN3 folded in
    b3_ref : (1, oup)             folded BN2+BN3 bias
    wf1/bf1, wf2/bf2              SE fc weights ((in,out) layout) and biases
    o_ref  : (1, Hout, Wout, oup) output
    pad_ref: (H+2, W+2, hidden)   VMEM scratch, zero-padded depthwise input
    """
    _, H, W, Cin = x_ref.shape
    hidden = w1_ref.shape[1]
    oup = w3_ref.shape[1]
    _, Hout, Wout, _ = o_ref.shape

    x = x_ref[0].astype(jnp.float32)                            # (H, W, Cin)

    # --- 1x1 expansion conv -> GELU -> BN1 (inference affine) ---------------
    g1 = jnp.dot(x.reshape(H * W, Cin), w1_ref[...],
                 preferred_element_type=jnp.float32)            # (H*W, hidden)
    g1 = _gelu_tanh(g1)
    g1 = g1 * s1_ref[...] + t1_ref[...]

    # --- 3x3 depthwise conv (pad=1, stride) via zero-padded VMEM scratch ----
    pad_ref[...] = jnp.zeros(pad_ref.shape, pad_ref.dtype)
    pad_ref[1:H + 1, 1:W + 1, :] = g1.reshape(H, W, hidden)

    acc = jnp.zeros((Hout, Wout, hidden), dtype=jnp.float32)
    for kh in range(3):
        for kw in range(3):
            if stride == 1:
                tap = pad_ref[kh:kh + Hout, kw:kw + Wout, :]
            else:  # stride == 2: strided window read from the padded scratch
                tap = pad_ref[pl.ds(kh, Hout, 2), pl.ds(kw, Wout, 2), :]
            k = kh * 3 + kw
            w_tap = wd_ref[k:k + 1, :].reshape(1, 1, hidden)
            acc = acc + tap * w_tap
    g2 = _gelu_tanh(acc)                                        # (Hout, Wout, hidden)

    # --- 1x1 projection conv (BN2 & BN3 folded into w3/b3) ------------------
    y3 = jnp.dot(g2.reshape(Hout * Wout, hidden), w3_ref[...],
                 preferred_element_type=jnp.float32) + b3_ref[...]   # (HW', oup)

    # --- Squeeze-and-Excitation (fully fused: whole image is resident) ------
    sq = jnp.mean(y3, axis=0, keepdims=True)                    # (1, oup)
    h = jnp.dot(sq, wf1_ref[...], preferred_element_type=jnp.float32) + bf1_ref[...]
    h = jnp.maximum(h, 0.0)
    z = jnp.dot(h, wf2_ref[...], preferred_element_type=jnp.float32) + bf2_ref[...]
    gate = 1.0 / (1.0 + jnp.exp(-z))                            # (1, oup)
    out = y3 * gate

    if use_res_connect:
        out = out + x.reshape(H * W, Cin)

    o_ref[...] = out.reshape(1, Hout, Wout, oup).astype(o_ref.dtype)


def mv2block_se_forward(x, p, *, stride=1, eps=1e-5):
    """x: (B, H, W, Cin) float32 NHWC.  p: parameter dict (see __main__)."""
    assert stride in (1, 2)
    B, H, W, Cin = x.shape
    hidden = p["w1"].shape[1]
    oup = p["w3"].shape[1]
    red = p["wf1"].shape[1]
    Hout = (H - 1) // stride + 1
    Wout = (W - 1) // stride + 1
    use_res_connect = (stride == 1) and (Cin == oup)

    # ---- host-side (tiny, one-time) BN folding -----------------------------
    s1 = p["bn1_g"] / jnp.sqrt(p["bn1_rv"] + eps)
    t1 = p["bn1_b"] - p["bn1_rm"] * s1
    s2 = p["bn2_g"] / jnp.sqrt(p["bn2_rv"] + eps)
    t2 = p["bn2_b"] - p["bn2_rm"] * s2
    s3 = p["bn3_g"] / jnp.sqrt(p["bn3_rv"] + eps)
    t3 = p["bn3_b"] - p["bn3_rm"] * s3

    wd = p["wd"].reshape(9, hidden)                  # (3,3,hidden) -> (9,hidden)
    w3_f = (s2[:, None] * p["w3"]) * s3[None, :]     # BN2 & BN3 folded
    b3_f = ((t2 @ p["w3"]) * s3 + t3).reshape(1, oup)

    s1 = s1.reshape(1, hidden)
    t1 = t1.reshape(1, hidden)
    bf1 = p["bf1"].reshape(1, red)
    bf2 = p["bf2"].reshape(1, oup)

    flops = (2 * B * H * W * Cin * hidden
             + 2 * B * Hout * Wout * 9 * hidden
             + 2 * B * Hout * Wout * hidden * oup
             + 2 * B * (oup * red + red * oup))
    transcendentals = B * (H * W * hidden + Hout * Wout * hidden + oup)
    bytes_accessed = 4 * (x.size + p["w1"].size + wd.size + w3_f.size
                          + p["wf1"].size + p["wf2"].size
                          + B * Hout * Wout * oup)

    kernel = functools.partial(mv2_se_kernel, stride=stride,
                               use_res_connect=use_res_connect)

    # NOTE: one whole image per grid step keeps VMEM use tiny at these shapes
    # ((H+2)*(W+2)*hidden f32 scratch ~ 166 KiB).  For large H*W*hidden the
    # spatial axis would need halo tiling.
    out = pl.pallas_call(
        kernel,
        out_shape=jax.ShapeDtypeStruct((B, Hout, Wout, oup), x.dtype),
        grid_spec=pltpu.PrefetchScalarGridSpec(
            num_scalar_prefetch=0,
            grid=(B,),
            in_specs=[
                pl.BlockSpec((1, H, W, Cin), lambda b: (b, 0, 0, 0)),
                pl.BlockSpec((Cin, hidden), lambda b: (0, 0)),
                pl.BlockSpec((1, hidden), lambda b: (0, 0)),
                pl.BlockSpec((1, hidden), lambda b: (0, 0)),
                pl.BlockSpec((9, hidden), lambda b: (0, 0)),
                pl.BlockSpec((hidden, oup), lambda b: (0, 0)),
                pl.BlockSpec((1, oup), lambda b: (0, 0)),
                pl.BlockSpec((oup, red), lambda b: (0, 0)),
                pl.BlockSpec((1, red), lambda b: (0, 0)),
                pl.BlockSpec((red, oup), lambda b: (0, 0)),
                pl.BlockSpec((1, oup), lambda b: (0, 0)),
            ],
            out_specs=pl.BlockSpec((1, Hout, Wout, oup), lambda b: (b, 0, 0, 0)),
            scratch_shapes=[pltpu.VMEM((H + 2, W + 2, hidden), jnp.float32)],
        ),
        compiler_params=pltpu.CompilerParams(
            dimension_semantics=("parallel",),
        ),
        cost_estimate=pl.CostEstimate(
            flops=flops, transcendentals=transcendentals,
            bytes_accessed=bytes_accessed),
    )(x, p["w1"], s1, t1, wd, w3_f, b3_f, p["wf1"], bf1, p["wf2"], bf2)

    return out


def reference_forward(x, p, *, stride=1, eps=1e-5):
    """Pure-JAX reference mirroring the PyTorch module (inference-mode BN)."""
    def bn(y, g, b, rm, rv):
        return (y - rm) / jnp.sqrt(rv + eps) * g + b

    Cin = x.shape[-1]
    hidden = p["w1"].shape[1]
    oup = p["w3"].shape[1]
    use_res_connect = (stride == 1) and (Cin == oup)

    y = jnp.einsum("bhwc,cd->bhwd", x, p["w1"])
    y = _gelu_tanh(y)
    y = bn(y, p["bn1_g"], p["bn1_b"], p["bn1_rm"], p["bn1_rv"])

    dw = p["wd"].reshape(3, 3, 1, hidden)
    y = jax.lax.conv_general_dilated(
        y, dw, window_strides=(stride, stride), padding=((1, 1), (1, 1)),
        dimension_numbers=("NHWC", "HWIO", "NHWC"),
        feature_group_count=hidden)
    y = _gelu_tanh(y)
    y = bn(y, p["bn2_g"], p["bn2_b"], p["bn2_rm"], p["bn2_rv"])

    y = jnp.einsum("bhwc,cd->bhwd", y, p["w3"])
    y = bn(y, p["bn3_g"], p["bn3_b"], p["bn3_rm"], p["bn3_rv"])

    sq = jnp.mean(y, axis=(1, 2))                               # (B, oup)
    h = jnp.maximum(sq @ p["wf1"] + p["bf1"], 0.0)
    gate = 1.0 / (1.0 + jnp.exp(-(h @ p["wf2"] + p["bf2"])))
    out = y * gate[:, None, None, :]
    if use_res_connect:
        out = out + x
    return out


if __name__ == "__main__":
    # MV2Block_SE(inp=32, oup=32, stride=1, expansion=4) on a small NHWC input.
    B, H, W = 2, 16, 16
    inp = oup = 32
    expansion = 4
    stride = 1
    hidden = inp * expansion        # 128
    red = oup // 2                  # SE reduction_ratio = 2

    # TODO(synk): expansion == 1 conv variant and training-mode BatchNorm
    # (batch statistics) are not implemented; this is the default expansion=4
    # path with inference-mode (running-stat) BatchNorm.

    key = jax.random.PRNGKey(0)
    ks = jax.random.split(key, 20)
    x = jax.random.normal(ks[0], (B, H, W, inp), dtype=jnp.float32)

    # Synthetic parameters, JAX-friendly layouts:
    #   w1 (Cin, hidden)  == torch conv1.weight (hidden, Cin, 1, 1) transposed
    #   wd (3, 3, hidden) == torch depthwise weight (hidden, 1, 3, 3) permuted
    #   w3 (hidden, oup)  == torch conv3.weight (oup, hidden, 1, 1) transposed
    #   wf1/wf2 (in, out) == torch Linear.weight.T
    p = {
        "w1": 0.1 * jax.random.normal(ks[1], (inp, hidden), dtype=jnp.float32),
        "wd": 0.2 * jax.random.normal(ks[2], (3, 3, hidden), dtype=jnp.float32),
        "w3": 0.1 * jax.random.normal(ks[3], (hidden, oup), dtype=jnp.float32),
        "bn1_g": 1.0 + 0.1 * jax.random.normal(ks[4], (hidden,), dtype=jnp.float32),
        "bn1_b": 0.1 * jax.random.normal(ks[5], (hidden,), dtype=jnp.float32),
        "bn1_rm": 0.1 * jax.random.normal(ks[6], (hidden,), dtype=jnp.float32),
        "bn1_rv": jax.random.uniform(ks[7], (hidden,), minval=0.5, maxval=1.5,
                                     dtype=jnp.float32),
        "bn2_g": 1.0 + 0.1 * jax.random.normal(ks[8], (hidden,), dtype=jnp.float32),
        "bn2_b": 0.1 * jax.random.normal(ks[9], (hidden,), dtype=jnp.float32),
        "bn2_rm": 0.1 * jax.random.normal(ks[10], (hidden,), dtype=jnp.float32),
        "bn2_rv": jax.random.uniform(ks[11], (hidden,), minval=0.5, maxval=1.5,
                                     dtype=jnp.float32),
        "bn3_g": 1.0 + 0.1 * jax.random.normal(ks[12], (oup,), dtype=jnp.float32),
        "bn3_b": 0.1 * jax.random.normal(ks[13], (oup,), dtype=jnp.float32),
        "bn3_rm": 0.1 * jax.random.normal(ks[14], (oup,), dtype=jnp.float32),
        "bn3_rv": jax.random.uniform(ks[15], (oup,), minval=0.5, maxval=1.5,
                                     dtype=jnp.float32),
        "wf1": 0.2 * jax.random.normal(ks[16], (oup, red), dtype=jnp.float32),
        "bf1": 0.1 * jax.random.normal(ks[17], (red,), dtype=jnp.float32),
        "wf2": 0.2 * jax.random.normal(ks[18], (red, oup), dtype=jnp.float32),
        "bf2": 0.1 * jax.random.normal(ks[19], (oup,), dtype=jnp.float32),
    }

    out = mv2block_se_forward(x, p, stride=stride)
    out = jax.block_until_ready(out)

    ref = reference_forward(x, p, stride=stride)
    assert out.shape == (B, H // stride, W // stride, oup), out.shape
    err = float(jnp.max(jnp.abs(out - ref)))
    assert err < 2e-4, err
    print("KERNEL_OK")
</pallas_src>

<mosaic_0001>
module attributes {stable_mosaic.version = 11 : i64} {
  func.func @mv2_se_kernel(%arg0: i32, %arg1: memref<1x16x16x32xf32, #tpu.memory_space<vmem>>, %arg2: memref<32x128xf32, #tpu.memory_space<vmem>>, %arg3: memref<1x128xf32, #tpu.memory_space<vmem>>, %arg4: memref<1x128xf32, #tpu.memory_space<vmem>>, %arg5: memref<9x128xf32, #tpu.memory_space<vmem>>, %arg6: memref<128x32xf32, #tpu.memory_space<vmem>>, %arg7: memref<1x32xf32, #tpu.memory_space<vmem>>, %arg8: memref<32x16xf32, #tpu.memory_space<vmem>>, %arg9: memref<1x16xf32, #tpu.memory_space<vmem>>, %arg10: memref<16x32xf32, #tpu.memory_space<vmem>>, %arg11: memref<1x32xf32, #tpu.memory_space<vmem>>, %arg12: memref<1x16x16x32xf32, #tpu.memory_space<vmem>>, %arg13: memref<18x18x128xf32, #tpu.memory_space<vmem>>) attributes {dimension_semantics = [#tpu.dimension_semantics<parallel>], iteration_bounds = array<i64: 2>, scalar_prefetch = 0 : i64, scratch_operands = 1 : i64, tpu.core_type = #tpu.core_type<tc>, window_params = [{transform_indices = @transform_0, window_bounds = array<i64: 1, 16, 16, 32>}, {pipeline_mode = #tpu.pipeline_mode<synchronous>, transform_indices = @transform_1, window_bounds = array<i64: 32, 128>}, {pipeline_mode = #tpu.pipeline_mode<synchronous>, transform_indices = @transform_2, window_bounds = array<i64: 1, 128>}, {pipeline_mode = #tpu.pipeline_mode<synchronous>, transform_indices = @transform_3, window_bounds = array<i64: 1, 128>}, {pipeline_mode = #tpu.pipeline_mode<synchronous>, transform_indices = @transform_4, window_bounds = array<i64: 9, 128>}, {pipeline_mode = #tpu.pipeline_mode<synchronous>, transform_indices = @transform_5, window_bounds = array<i64: 128, 32>}, {pipeline_mode = #tpu.pipeline_mode<synchronous>, transform_indices = @transform_6, window_bounds = array<i64: 1, 32>}, {pipeline_mode = #tpu.pipeline_mode<synchronous>, transform_indices = @transform_7, window_bounds = array<i64: 32, 16>}, {pipeline_mode = #tpu.pipeline_mode<synchronous>, transform_indices = @transform_8, window_bounds = array<i64: 1, 16>}, {pipeline_mode = #tpu.pipeline_mode<synchronous>, transform_indices = @transform_9, window_bounds = array<i64: 16, 32>}, {pipeline_mode = #tpu.pipeline_mode<synchronous>, transform_indices = @transform_10, window_bounds = array<i64: 1, 32>}, {transform_indices = @transform_11, window_bounds = array<i64: 1, 16, 16, 32>}]} {
    %c0 = arith.constant 0 : index
    %c0_0 = arith.constant 0 : index
    %c0_1 = arith.constant 0 : index
    %c0_2 = arith.constant 0 : index
    %0 = vector.load %arg1[%c0, %c0_0, %c0_1, %c0_2] : memref<1x16x16x32xf32, #tpu.memory_space<vmem>>, vector<1x16x16x32xf32>
    %1 = vector.shape_cast %0 : vector<1x16x16x32xf32> to vector<16x16x32xf32>
    %2 = vector.shape_cast %1 : vector<16x16x32xf32> to vector<256x32xf32>
    %c0_3 = arith.constant 0 : index
    %c0_4 = arith.constant 0 : index
    %3 = vector.load %arg2[%c0_3, %c0_4] : memref<32x128xf32, #tpu.memory_space<vmem>>, vector<32x128xf32>
    %cst = arith.constant dense<0.000000e+00> : vector<256x128xf32>
    %4 = tpu.matmul %2, %3, %cst {dimension_numbers = #tpu.dot_dimension_numbers<[1], [0], [0], [1], [0, 0, 1, 1], [], []>} : vector<256x32xf32>, vector<32x128xf32>, vector<256x128xf32> -> vector<256x128xf32>
    %cst_5 = arith.constant 5.000000e-01 : f32
    %5 = vector.broadcast %cst_5 : f32 to vector<256x128xf32>
    %6 = arith.mulf %5, %4 : vector<256x128xf32>
    %cst_6 = arith.constant 4.471500e-02 : f32
    %7 = vector.broadcast %cst_6 : f32 to vector<256x128xf32>
    %8 = arith.mulf %7, %4 : vector<256x128xf32>
    %9 = arith.mulf %8, %4 : vector<256x128xf32>
    %10 = arith.mulf %9, %4 : vector<256x128xf32>
    %11 = arith.addf %4, %10 : vector<256x128xf32>
    %cst_7 = arith.constant 0.797884583 : f32
    %12 = vector.broadcast %cst_7 : f32 to vector<256x128xf32>
    %13 = arith.mulf %12, %11 : vector<256x128xf32>
    %14 = math.tanh %13 : vector<256x128xf32>
    %cst_8 = arith.constant 1.000000e+00 : f32
    %15 = vector.broadcast %cst_8 : f32 to vector<256x128xf32>
    %16 = arith.addf %15, %14 : vector<256x128xf32>
    %17 = arith.mulf %6, %16 : vector<256x128xf32>
    %c0_9 = arith.constant 0 : index
    %c0_10 = arith.constant 0 : index
    %18 = vector.load %arg3[%c0_9, %c0_10] : memref<1x128xf32, #tpu.memory_space<vmem>>, vector<1x128xf32>
    %19 = vector.broadcast %18 : vector<1x128xf32> to vector<256x128xf32>
    %20 = arith.mulf %17, %19 : vector<256x128xf32>
    %c0_11 = arith.constant 0 : index
    %c0_12 = arith.constant 0 : index
    %21 = vector.load %arg4[%c0_11, %c0_12] : memref<1x128xf32, #tpu.memory_space<vmem>>, vector<1x128xf32>
    %22 = vector.broadcast %21 : vector<1x128xf32> to vector<256x128xf32>
    %23 = arith.addf %20, %22 : vector<256x128xf32>
    %cst_13 = arith.constant 0.000000e+00 : f32
    %24 = vector.broadcast %cst_13 : f32 to vector<18x18x128xf32>
    %c0_14 = arith.constant 0 : index
    %c0_15 = arith.constant 0 : index
    %c0_16 = arith.constant 0 : index
    %25 = vector.load %arg13[%c0_14, %c0_15, %c0_16] : memref<18x18x128xf32, #tpu.memory_space<vmem>>, vector<18x18x128xf32>
    tpu.vector_store %arg13[%c0_14, %c0_15, %c0_16], %24 {strides = array<i32>} : memref<18x18x128xf32, #tpu.memory_space<vmem>>, vector<18x18x128xf32>,
    %26 = vector.shape_cast %23 : vector<256x128xf32> to vector<16x16x128xf32>
    %c1 = arith.constant 1 : index
    %c1_17 = arith.constant 1 : index
    %c0_18 = arith.constant 0 : index
    %27 = vector.load %arg13[%c1, %c1_17, %c0_18] : memref<18x18x128xf32, #tpu.memory_space<vmem>>, vector<16x16x128xf32>
    tpu.vector_store %arg13[%c1, %c1_17, %c0_18], %26 {strides = array<i32>} : memref<18x18x128xf32, #tpu.memory_space<vmem>>, vector<16x16x128xf32>,
    %cst_19 = arith.constant 0.000000e+00 : f32
    %28 = vector.broadcast %cst_19 : f32 to vector<16x16x128xf32>
    %c0_20 = arith.constant 0 : index
    %c0_21 = arith.constant 0 : index
    %c0_22 = arith.constant 0 : index
    %29 = vector.load %arg13[%c0_20, %c0_21, %c0_22] : memref<18x18x128xf32, #tpu.memory_space<vmem>>, vector<16x16x128xf32>
    %c0_23 = arith.constant 0 : index
    %c0_24 = arith.constant 0 : index
    %30 = vector.load %arg5[%c0_23, %c0_24] : memref<9x128xf32, #tpu.memory_space<vmem>>, vector<1x128xf32>
    %31 = vector.shape_cast %30 : vector<1x128xf32> to vector<1x1x128xf32>
    %32 = vector.broadcast %31 : vector<1x1x128xf32> to vector<16x16x128xf32>
    %33 = arith.mulf %29, %32 : vector<16x16x128xf32>
    %34 = arith.addf %28, %33 : vector<16x16x128xf32>
    %c0_25 = arith.constant 0 : index
    %c1_26 = arith.constant 1 : index
    %c0_27 = arith.constant 0 : index
    %35 = vector.load %arg13[%c0_25, %c1_26, %c0_27] : memref<18x18x128xf32, #tpu.memory_space<vmem>>, vector<16x16x128xf32>
    %c1_28 = arith.constant 1 : index
    %c0_29 = arith.constant 0 : index
    %36 = vector.load %arg5[%c1_28, %c0_29] : memref<9x128xf32, #tpu.memory_space<vmem>>, vector<1x128xf32>
    %37 = vector.shape_cast %36 : vector<1x128xf32> to vector<1x1x128xf32>
    %38 = vector.broadcast %37 : vector<1x1x128xf32> to vector<16x16x128xf32>
    %39 = arith.mulf %35, %38 : vector<16x16x128xf32>
    %40 = arith.addf %34, %39 : vector<16x16x128xf32>
    %c0_30 = arith.constant 0 : index
    %c2 = arith.constant 2 : index
    %c0_31 = arith.constant 0 : index
    %41 = vector.load %arg13[%c0_30, %c2, %c0_31] : memref<18x18x128xf32, #tpu.memory_space<vmem>>, vector<16x16x128xf32>
    %c2_32 = arith.constant 2 : index
    %c0_33 = arith.constant 0 : index
    %42 = vector.load %arg5[%c2_32, %c0_33] : memref<9x128xf32, #tpu.memory_space<vmem>>, vector<1x128xf32>
    %43 = vector.shape_cast %42 : vector<1x128xf32> to vector<1x1x128xf32>
    %44 = vector.broadcast %43 : vector<1x1x128xf32> to vector<16x16x128xf32>
    %45 = arith.mulf %41, %44 : vector<16x16x128xf32>
    %46 = arith.addf %40, %45 : vector<16x16x128xf32>
    %c1_34 = arith.constant 1 : index
    %c0_35 = arith.constant 0 : index
    %c0_36 = arith.constant 0 : index
    %47 = vector.load %arg13[%c1_34, %c0_35, %c0_36] : memref<18x18x128xf32, #tpu.memory_space<vmem>>, vector<16x16x128xf32>
    %c3 = arith.constant 3 : index
    %c0_37 = arith.constant 0 : index
    %48 = vector.load %arg5[%c3, %c0_37] : memref<9x128xf32, #tpu.memory_space<vmem>>, vector<1x128xf32>
    %49 = vector.shape_cast %48 : vector<1x128xf32> to vector<1x1x128xf32>
    %50 = vector.broadcast %49 : vector<1x1x128xf32> to vector<16x16x128xf32>
    %51 = arith.mulf %47, %50 : vector<16x16x128xf32>
    %52 = arith.addf %46, %51 : vector<16x16x128xf32>
    %c1_38 = arith.constant 1 : index
    %c1_39 = arith.constant 1 : index
    %c0_40 = arith.constant 0 : index
    %53 = vector.load %arg13[%c1_38, %c1_39, %c0_40] : memref<18x18x128xf32, #tpu.memory_space<vmem>>, vector<16x16x128xf32>
    %c4 = arith.constant 4 : index
    %c0_41 = arith.constant 0 : index
    %54 = vector.load %arg5[%c4, %c0_41] : memref<9x128xf32, #tpu.memory_space<vmem>>, vector<1x128xf32>
    %55 = vector.shape_cast %54 : vector<1x128xf32> to vector<1x1x128xf32>
    %56 = vector.broadcast %55 : vector<1x1x128xf32> to vector<16x16x128xf32>
    %57 = arith.mulf %53, %56 : vector<16x16x128xf32>
    %58 = arith.addf %52, %57 : vector<16x16x128xf32>
    %c1_42 = arith.constant 1 : index
    %c2_43 = arith.constant 2 : index
    %c0_44 = arith.constant 0 : index
    %59 = vector.load %arg13[%c1_42, %c2_43, %c0_44] : memref<18x18x128xf32, #tpu.memory_space<vmem>>, vector<16x16x128xf32>
    %c5 = arith.constant 5 : index
    %c0_45 = arith.constant 0 : index
    %60 = vector.load %arg5[%c5, %c0_45] : memref<9x128xf32, #tpu.memory_space<vmem>>, vector<1x128xf32>
    %61 = vector.shape_cast %60 : vector<1x128xf32> to vector<1x1x128xf32>
    %62 = vector.broadcast %61 : vector<1x1x128xf32> to vector<16x16x128xf32>
    %63 = arith.mulf %59, %62 : vector<16x16x128xf32>
    %64 = arith.addf %58, %63 : vector<16x16x128xf32>
    %c2_46 = arith.constant 2 : index
    %c0_47 = arith.constant 0 : index
    %c0_48 = arith.constant 0 : index
    %65 = vector.load %arg13[%c2_46, %c0_47, %c0_48] : memref<18x18x128xf32, #tpu.memory_space<vmem>>, vector<16x16x128xf32>
    %c6 = arith.constant 6 : index
    %c0_49 = arith.constant 0 : index
    %66 = vector.load %arg5[%c6, %c0_49] : memref<9x128xf32, #tpu.memory_space<vmem>>, vector<1x128xf32>
    %67 = vector.shape_cast %66 : vector<1x128xf32> to vector<1x1x128xf32>
    %68 = vector.broadcast %67 : vector<1x1x128xf32> to vector<16x16x128xf32>
    %69 = arith.mulf %65, %68 : vector<16x16x128xf32>
    %70 = arith.addf %64, %69 : vector<16x16x128xf32>
    %c2_50 = arith.constant 2 : index
    %c1_51 = arith.constant 1 : index
    %c0_52 = arith.constant 0 : index
    %71 = vector.load %arg13[%c2_50, %c1_51, %c0_52] : memref<18x18x128xf32, #tpu.memory_space<vmem>>, vector<16x16x128xf32>
    %c7 = arith.constant 7 : index
    %c0_53 = arith.constant 0 : index
    %72 = vector.load %arg5[%c7, %c0_53] : memref<9x128xf32, #tpu.memory_space<vmem>>, vector<1x128xf32>
    %73 = vector.shape_cast %72 : vector<1x128xf32> to vector<1x1x128xf32>
    %74 = vector.broadcast %73 : vector<1x1x128xf32> to vector<16x16x128xf32>
    %75 = arith.mulf %71, %74 : vector<16x16x128xf32>
    %76 = arith.addf %70, %75 : vector<16x16x128xf32>
    %c2_54 = arith.constant 2 : index
    %c2_55 = arith.constant 2 : index
    %c0_56 = arith.constant 0 : index
    %77 = vector.load %arg13[%c2_54, %c2_55, %c0_56] : memref<18x18x128xf32, #tpu.memory_space<vmem>>, vector<16x16x128xf32>
    %c8 = arith.constant 8 : index
    %c0_57 = arith.constant 0 : index
    %78 = vector.load %arg5[%c8, %c0_57] : memref<9x128xf32, #tpu.memory_space<vmem>>, vector<1x128xf32>
    %79 = vector.shape_cast %78 : vector<1x128xf32> to vector<1x1x128xf32>
    %80 = vector.broadcast %79 : vector<1x1x128xf32> to vector<16x16x128xf32>
    %81 = arith.mulf %77, %80 : vector<16x16x128xf32>
    %82 = arith.addf %76, %81 : vector<16x16x128xf32>
    %cst_58 = arith.constant 5.000000e-01 : f32
    %83 = vector.broadcast %cst_58 : f32 to vector<16x16x128xf32>
    %84 = arith.mulf %83, %82 : vector<16x16x128xf32>
    %cst_59 = arith.constant 4.471500e-02 : f32
    %85 = vector.broadcast %cst_59 : f32 to vector<16x16x128xf32>
    %86 = arith.mulf %85, %82 : vector<16x16x128xf32>
    %87 = arith.mulf %86, %82 : vector<16x16x128xf32>
    %88 = arith.mulf %87, %82 : vector<16x16x128xf32>
    %89 = arith.addf %82, %88 : vector<16x16x128xf32>
    %cst_60 = arith.constant 0.797884583 : f32
    %90 = vector.broadcast %cst_60 : f32 to vector<16x16x128xf32>
    %91 = arith.mulf %90, %89 : vector<16x16x128xf32>
    %92 = math.tanh %91 : vector<16x16x128xf32>
    %cst_61 = arith.constant 1.000000e+00 : f32
    %93 = vector.broadcast %cst_61 : f32 to vector<16x16x128xf32>
    %94 = arith.addf %93, %92 : vector<16x16x128xf32>
    %95 = arith.mulf %84, %94 : vector<16x16x128xf32>
    %96 = vector.shape_cast %95 : vector<16x16x128xf32> to vector<256x128xf32>
    %c0_62 = arith.constant 0 : index
    %c0_63 = arith.constant 0 : index
    %97 = vector.load %arg6[%c0_62, %c0_63] : memref<128x32xf32, #tpu.memory_space<vmem>>, vector<128x32xf32>
    %cst_64 = arith.constant dense<0.000000e+00> : vector<256x32xf32>
    %98 = tpu.matmul %96, %97, %cst_64 {dimension_numbers = #tpu.dot_dimension_numbers<[1], [0], [0], [1], [0, 0, 1, 1], [], []>} : vector<256x128xf32>, vector<128x32xf32>, vector<256x32xf32> -> vector<256x32xf32>
    %c0_65 = arith.constant 0 : index
    %c0_66 = arith.constant 0 : index
    %99 = vector.load %arg7[%c0_65, %c0_66] : memref<1x32xf32, #tpu.memory_space<vmem>>, vector<1x32xf32>
    %100 = vector.broadcast %99 : vector<1x32xf32> to vector<256x32xf32>
    %101 = arith.addf %98, %100 : vector<256x32xf32>
    %cst_67 = arith.constant dense<0.000000e+00> : vector<32xf32>
    %102 = vector.multi_reduction <add>, %101, %cst_67 [0] : vector<256x32xf32> to vector<32xf32>
    %103 = vector.shape_cast %102 : vector<32xf32> to vector<1x32xf32>
    %cst_68 = arith.constant 2.560000e+02 : f32
    %104 = vector.broadcast %cst_68 : f32 to vector<1x32xf32>
    %105 = arith.divf %103, %104 : vector<1x32xf32>
    %c0_69 = arith.constant 0 : index
    %c0_70 = arith.constant 0 : index
    %106 = vector.load %arg8[%c0_69, %c0_70] : memref<32x16xf32, #tpu.memory_space<vmem>>, vector<32x16xf32>
    %cst_71 = arith.constant dense<0.000000e+00> : vector<1x16xf32>
    %107 = tpu.matmul %105, %106, %cst_71 {dimension_numbers = #tpu.dot_dimension_numbers<[1], [0], [0], [1], [0, 0, 1, 1], [], []>} : vector<1x32xf32>, vector<32x16xf32>, vector<1x16xf32> -> vector<1x16xf32>
    %c0_72 = arith.constant 0 : index
    %c0_73 = arith.constant 0 : index
    %108 = vector.load %arg9[%c0_72, %c0_73] : memref<1x16xf32, #tpu.memory_space<vmem>>, vector<1x16xf32>
    %109 = arith.addf %107, %108 : vector<1x16xf32>
    %cst_74 = arith.constant 0.000000e+00 : f32
    %110 = vector.broadcast %cst_74 : f32 to vector<1x16xf32>
    %111 = arith.maximumf %109, %110 : vector<1x16xf32>
    %c0_75 = arith.constant 0 : index
    %c0_76 = arith.constant 0 : index
    %112 = vector.load %arg10[%c0_75, %c0_76] : memref<16x32xf32, #tpu.memory_space<vmem>>, vector<16x32xf32>
    %cst_77 = arith.constant dense<0.000000e+00> : vector<1x32xf32>
    %113 = tpu.matmul %111, %112, %cst_77 {dimension_numbers = #tpu.dot_dimension_numbers<[1], [0], [0], [1], [0, 0, 1, 1], [], []>} : vector<1x16xf32>, vector<16x32xf32>, vector<1x32xf32> -> vector<1x32xf32>
    %c0_78 = arith.constant 0 : index
    %c0_79 = arith.constant 0 : index
    %114 = vector.load %arg11[%c0_78, %c0_79] : memref<1x32xf32, #tpu.memory_space<vmem>>, vector<1x32xf32>
    %115 = arith.addf %113, %114 : vector<1x32xf32>
    %cst_80 = arith.constant 0.000000e+00 : f32
    %116 = vector.broadcast %cst_80 : f32 to vector<1x32xf32>
    %117 = arith.subf %116, %115 : vector<1x32xf32>
    %118 = math.exp %117 : vector<1x32xf32>
    %cst_81 = arith.constant 1.000000e+00 : f32
    %119 = vector.broadcast %cst_81 : f32 to vector<1x32xf32>
    %120 = arith.addf %119, %118 : vector<1x32xf32>
    %cst_82 = arith.constant 1.000000e+00 : f32
    %121 = vector.broadcast %cst_82 : f32 to vector<1x32xf32>
    %122 = arith.divf %121, %120 : vector<1x32xf32>
    %123 = vector.broadcast %122 : vector<1x32xf32> to vector<256x32xf32>
    %124 = arith.mulf %101, %123 : vector<256x32xf32>
    %125 = vector.shape_cast %1 : vector<16x16x32xf32> to vector<256x32xf32>
    %126 = arith.addf %124, %125 : vector<256x32xf32>
    %127 = vector.shape_cast %126 : vector<256x32xf32> to vector<1x16x16x32xf32>
    %c0_83 = arith.constant 0 : index
    %c0_84 = arith.constant 0 : index
    %c0_85 = arith.constant 0 : index
    %c0_86 = arith.constant 0 : index
    %128 = vector.load %arg12[%c0_83, %c0_84, %c0_85, %c0_86] : memref<1x16x16x32xf32, #tpu.memory_space<vmem>>, vector<1x16x16x32xf32>
    tpu.vector_store %arg12[%c0_83, %c0_84, %c0_85, %c0_86], %127 {strides = array<i32>} : memref<1x16x16x32xf32, #tpu.memory_space<vmem>>, vector<1x16x16x32xf32>,
    return
  }
  func.func @transform_0(%arg0: i32) -> (i32, i32, i32, i32) {
    %c0_i32 = arith.constant 0 : i32
    %c0_i32_0 = arith.constant 0 : i32
    %c0_i32_1 = arith.constant 0 : i32
    %c0_i32_2 = arith.constant 0 : i32
    return %arg0, %c0_i32, %c0_i32_0, %c0_i32_1 : i32, i32, i32, i32
  }
  func.func @transform_1(%arg0: i32) -> (i32, i32) {
    %c0_i32 = arith.constant 0 : i32
    %c0_i32_0 = arith.constant 0 : i32
    %c0_i32_1 = arith.constant 0 : i32
    return %c0_i32, %c0_i32_0 : i32, i32
  }
  func.func @transform_2(%arg0: i32) -> (i32, i32) {
    %c0_i32 = arith.constant 0 : i32
    %c0_i32_0 = arith.constant 0 : i32
    %c0_i32_1 = arith.constant 0 : i32
    return %c0_i32, %c0_i32_0 : i32, i32
  }
  func.func @transform_3(%arg0: i32) -> (i32, i32) {
    %c0_i32 = arith.constant 0 : i32
    %c0_i32_0 = arith.constant 0 : i32
    %c0_i32_1 = arith.constant 0 : i32
    return %c0_i32, %c0_i32_0 : i32, i32
  }
  func.func @transform_4(%arg0: i32) -> (i32, i32) {
    %c0_i32 = arith.constant 0 : i32
    %c0_i32_0 = arith.constant 0 : i32
    %c0_i32_1 = arith.constant 0 : i32
    return %c0_i32, %c0_i32_0 : i32, i32
  }
  func.func @transform_5(%arg0: i32) -> (i32, i32) {
    %c0_i32 = arith.constant 0 : i32
    %c0_i32_0 = arith.constant 0 : i32
    %c0_i32_1 = arith.constant 0 : i32
    return %c0_i32, %c0_i32_0 : i32, i32
  }
  func.func @transform_6(%arg0: i32) -> (i32, i32) {
    %c0_i32 = arith.constant 0 : i32
    %c0_i32_0 = arith.constant 0 : i32
    %c0_i32_1 = arith.constant 0 : i32
    return %c0_i32, %c0_i32_0 : i32, i32
  }
  func.func @transform_7(%arg0: i32) -> (i32, i32) {
    %c0_i32 = arith.constant 0 : i32
    %c0_i32_0 = arith.constant 0 : i32
    %c0_i32_1 = arith.constant 0 : i32
    return %c0_i32, %c0_i32_0 : i32, i32
  }
  func.func @transform_8(%arg0: i32) -> (i32, i32) {
    %c0_i32 = arith.constant 0 : i32
    %c0_i32_0 = arith.constant 0 : i32
    %c0_i32_1 = arith.constant 0 : i32
    return %c0_i32, %c0_i32_0 : i32, i32
  }
  func.func @transform_9(%arg0: i32) -> (i32, i32) {
    %c0_i32 = arith.constant 0 : i32
    %c0_i32_0 = arith.constant 0 : i32
    %c0_i32_1 = arith.constant 0 : i32
    return %c0_i32, %c0_i32_0 : i32, i32
  }
  func.func @transform_10(%arg0: i32) -> (i32, i32) {
    %c0_i32 = arith.constant 0 : i32
    %c0_i32_0 = arith.constant 0 : i32
    %c0_i32_1 = arith.constant 0 : i32
    return %c0_i32, %c0_i32_0 : i32, i32
  }
  func.func @transform_11(%arg0: i32) -> (i32, i32, i32, i32) {
    %c0_i32 = arith.constant 0 : i32
    %c0_i32_0 = arith.constant 0 : i32
    %c0_i32_1 = arith.constant 0 : i32
    %c0_i32_2 = arith.constant 0 : i32
    return %arg0, %c0_i32, %c0_i32_0, %c0_i32_1 : i32, i32, i32, i32
  }
}

</mosaic_0001>

<bundles_post_ra>
// kernel: tpu_custom_call.1
= control target key start
LH: loop header
LB: loop body
LE: loop exit
PB: predicated region body
PF: predicated region fallthrough
CT: control target
= control target key end

     0   :  { %16 = vsyncpa [#allocation4], 0  ;;  %s5763_s0 = inlined_call_operand.hbm [shape: f32[2,16,16,32], index: 0, kind: input, shape index: {}]   ;;  %s5764_s1 = inlined_call_operand.vmem [shape: f32[32,128], index: 1, kind: input, shape index: {}]   ;;  %s5765_s2 = inlined_call_operand.vmem [shape: f32[1,128], index: 2, kind: input, shape index: {}]   ;;  %s5766_s3 = inlined_call_operand.vmem [shape: f32[1,128], index: 3, kind: input, shape index: {}]   ;;  %s5767_s4 = inlined_call_operand.vmem [shape: f32[9,128], index: 4, kind: input, shape index: {}]   ;;  %s5768_s5 = inlined_call_operand.vmem [shape: f32[128,32], index: 5, kind: input, shape index: {}]   ;;  %s5769_s6 = inlined_call_operand.vmem [shape: f32[1,32], index: 6, kind: input, shape index: {}]   ;;  %s5770_s7 = inlined_call_operand.vmem [shape: f32[32,16], index: 7, kind: input, shape index: {}]   ;;  %s5771_s8 = inlined_call_operand.vmem [shape: f32[1,16], index: 8, kind: input, shape index: {}]   ;;  %s5772_s9 = inlined_call_operand.vmem [shape: f32[16,32], index: 9, kind: input, shape index: {}]   ;;  %s5773_s10 = inlined_call_operand.vmem [shape: f32[1,32], index: 10, kind: input, shape index: {}]   ;;  %s5774_s11 = inlined_call_operand.hbm [shape: f32[2,16,16,32], index: 11, kind: output, shape index: {}]  }
   0x1   :  { %18 = vsyncpa [#allocation4 + $0x1], 0 }
   0x2   :  { %19 = vsyncpa [#allocation5], 0 }
   0x3   :  { %21 = vsyncpa [#allocation5 + $0x1], 0  ;;  %s3852_s17 = smov 0   ;;  %s3854_s18 = smov 0  }
   0x4   :  { %s3856_s19 = smov 0   ;;  %s3858_s20 = smov 0  }
   0x5 LB: > { %5777 = sst [smem:[#allocation9_spill]] %s3777_s19  ;;  %s3873_s21 = sadd.s32 4294967295, %s3781_s20   ;;  %s3781_s20 = sphi %s3858_s20, %s5791_s20   ;;  %s3777_s19 = sphi %s3856_s19, %s5788_s19   ;;  %s3773_s18 = sphi %s3854_s18, %s5790_s18   ;;  %s3769_s17 = sphi %s3852_s17, %s5789_s17  }
   0x6   : > { %s3082_s22 = sadd.s32 4294967294, %s3781_s20   ;;  %s3877_s23 = sadd.s32 1, %s3781_s20  }
   0x7   : > { %s34_s24 = sadd.s32 1, %s3777_s19  ;;  %s31_s25 = ssub.s32 %s3781_s20, %s3877_s23 }
   0x8   : > { %p41_p0 = scmp.ne.s32.totalorder %s3777_s19, %s3773_s18  ;;  %p32_p1 = scmp.eq.s32.totalorder %s31_s25, 0 }
   0x9   : > { %p42_p2 = scmp.eq.s32.totalorder %s3781_s20, 0  ;;  %p47_p3 = scmp.ne.s32.totalorder %s3773_s18, %s3769_s17 }
   0xa   : > { %p48_p4 = scmp.eq.s32.totalorder %s3873_s21, 0  ;;  %p281_p7 = scmp.eq.s32.totalorder %s3873_s21, 1 }
   0xb   : > { %s3889_s26 = scalar_select %p32_p1, %s3777_s19, %s34_s24  }
   0xc   : > { %p3891_p5 = por %p42_p2, %p41_p0  ;;  %p3895_p6 = por %p48_p4, %p47_p3 }
   0xd   : > { %5778 = sst [smem:[#allocation10_spill]] %s3889_s26  ;;  %p287_p8 = scmp.eq.s32.totalorder %s3082_s22, 1 }
   0xe   : > { %p3467_p10 = scmp.lt.s32.totalorder %s3781_s20, 2  ;;  %p3902_p11 = por %p281_p7, %p41_p0 }
   0xf   : > { %p3906_p12 = por %p287_p8, %p47_p3  ;;  %s337_s12 = sand.u32 1, %s3777_s19  }
  0x10   : > { %s5781_s29 = scalar_select %p3902_p11, 1, 0 }
  0x11   : > { %s5782_s30 = scalar_select %p3906_p12, 1, 0 }
  0x12   : > { %s3142_s13 = sshll.u32 %s3781_s20, 12  ;;  %s3085_s14 = sshll.u32 %s337_s12, 8 }
  0x13   : > { %s3915_s24 = scalar_lea.hbm %s5763_s0, %s3142_s13  ;;  %s341_s22 = scalar_lea.vmem [#allocation3], %s3085_s14 }
  0x14   : > { %s348_s25 = sshll.u32 %s341_s22, 4  ;;  %p3919_p13 = pnand %p3467_p10, %p3891_p5  ;;  %s3923_s25 = int_to_ptr.vmem [resolvable:$true] %s348_s25 }
  0x15   : > { %s3925_s19 = scalar_lea.sflag [#allocation4], %s337_s12  ;;  %s3685_s15 = scalar_lea.hbm %s3915_s24, 4096 }
  0x16   : > { %p3686_p0 = scmp.ne.s32.totalorder %s3915_s24, %s3685_s15  ;;  %p3687_p1 = pneg %p3919_p13 }
  0x17   : > { %s3690_s14 = scalar_lea.hbm %s5763_s0, 8192  ;;  %p3691_p4 = scmp.lt.u32.totalorder %s3915_s24, %s5763_s0 }
  0x18   : > { %p3688_p2 = pnand %p3687_p1, %p3686_p0  ;;  %p3692_p5 = scmp.lt.u32.totalorder %s3690_s14, %s3685_s15 }
  0x19   : > { %p3694_p8 = scmp.lt.u32.totalorder %s3685_s15, %s3915_s24 }
  0x1a   : > { %p3689_p3 = pneg %p3688_p2  ;;  %p3693_p7 = por %p3692_p5, %p3691_p4 }
  0x1c   : > { %p3695_p10 = por %p3694_p8, %p3693_p7 }
  0x1e   : > { %p3696_p9 = pnand %p3695_p10, %p3689_p3 }
  0x20   : > { %3699 = shalt.err (!%p3696_p9)
}
  0x21   : > { %s3700_s12 = scalar_lea.vmem %s3923_s25, 4096  ;;  %s3783_s13 = smov [#allocation3]  }
  0x22   : > { %p3701_p0 = scmp.ne.s32.totalorder %s3923_s25, %s3700_s12  ;;  %s3705_s27 = sshll.u32 %s3783_s13, 4  ;;  %s3706_s27 = int_to_ptr.vmem [resolvable:$false] %s3705_s27 }
  0x23   : > { %s3707_s16 = scalar_lea.vmem %s3706_s27, 8192  ;;  %p3708_p11 = scmp.lt.s32.totalorder %s3923_s25, %s3706_s27 }
  0x24   : > { %p3703_p2 = pnand %p3701_p0, %p3687_p1  ;;  %p3709_p4 = scmp.lt.s32.totalorder %s3707_s16, %s3700_s12 }
  0x26   : > { %p3704_p12 = pneg %p3703_p2  ;;  %p3710_p5 = por %p3709_p4, %p3708_p11 }
  0x28   : > { %p3711_p7 = pnand %p3710_p5, %p3704_p12 }
  0x2a   : > { %3714 = shalt.err (!%p3711_p7)
}
  0x2b   : > { %s3784_s15 = smov 128   ;;  %s3785_s14 = smov 8  }
  0x2c   : > { %3462 = dma.hbm_to_vmem [thread:$0]  (!%p3919_p13), %s3915_s24, 4096, %s3923_s25, %s3925_s19, %s3784_s15, %s3784_s15, %s3785_s14  }
  0x2d   : > { %p3088_p9 = scmp.ge.s32.totalorder %s3781_s20, 1  ;;  %p356_p1 = scmp.lt.s32.totalorder %s3781_s20, 3 }
  0x2f   : > { %p357_p3 = pnand %p3088_p9, %p356_p1 }
  0x30   : > { %s3956_s22 = sand.u32 (!%p357_p3), 1, %s3773_s18  }
  0x31   : > { %360 = sbr.rel (%p357_p3) target bundleno = 1340 (0x53c), region = 64  ;;  %s3089_s12 = sshll.u32 (!%p357_p3), %s3956_s22, 8 }
  0x32   : > { %s363_s13 = scalar_lea.sflag (!%p357_p3), [#allocation4], %s3956_s22  ;;  %s3962_s27 = scalar_lea.vmem (!%p357_p3), [#allocation3], %s3089_s12 }
  0x38   : > { %3760 = dma.done.wait (%p3895_p6), %s363_s13, 4096  }
  0x39   : > { %3762 = vsyncadd (%p3895_p6), %s363_s13, 4294963200  ;;  %vm441_vm0 = vcmask 261120   ;;  %v437_v0 = vld [vmem:[%s5764_s1] sm:$0xff]  ;;  %v438_v1 = vld [vmem:[%s5764_s1 + $0x8] sm:$0xff]  ;;  %v3786_v38 = vmov 0.0   ;;  %vm3788_vm1 = vmmov 0  }
  0x3a   : > { %v439_v2 = vld [vmem:[%s5764_s1 + $0x10] sm:$0xff]  ;;  %v3390_v3 = vpack.c.bf16 %v438_v1, %v437_v0  ;;  %v440_v4 = vld [vmem:[%s5764_s1 + $0x18] sm:$0xff]  ;;  %v407_v8 = vld [vmem:[%s3962_s27 + $0x10] sm:$0xff]  ;;  %1133 = vst [vmem:[#allocation2 + $0x20] sm:$0xff] %v3786_v38  ;;  %vm2815_vm2 = vcmask 130048   ;;  %s5609_s15 = scalar_lea.vmem [#allocation6], %s3089_s12 }
  0x3b   : > { %v405_v5 = vld [vmem:[%s3962_s27] sm:$0xff]  ;;  %v3394_v6 = vpack.c.bf16 %v440_v4, %v439_v2  ;;  %v406_v7 = vld [vmem:[%s3962_s27 + $0x8] sm:$0xff]  ;;  %v408_v9 = vld [vmem:[%s3962_s27 + $0x18] sm:$0xff]  ;;  %1134 = vst [vmem:[#allocation2 + $0x28] sm:$0x3] %v3786_v38  ;;  %s3143_s12 = sshll.u32 %s3873_s21, 12 }
  0x3c   : > { %3244 = vmatprep.mubr.msk.f32.mxu0 %vm441_vm0, %v405_v5  ;;  %3391 = vmatprep.subr.bf16.mxu0 %v3390_v3  ;;  %v409_v10 = vld [vmem:[%s3962_s27 + $0x20] sm:$0xff]  ;;  %v410_v11 = vld [vmem:[%s3962_s27 + $0x28] sm:$0xff]  ;;  %v411_v12 = vld [vmem:[%s3962_s27 + $0x30] sm:$0xff]  ;;  %1129 = vst [vmem:[#allocation2] sm:$0xff] %v3786_v38  ;;  %s3009_s28 = sshll.u32 %s5609_s15, 4  ;;  %s5683_s19 = scalar_lea.hbm %s5774_s11, %s3143_s12  ;;  %s5687_s28 = int_to_ptr.vmem [resolvable:$true] %s3009_s28 }
  0x3d   : > { %3393 = vmatpush3.bf16.msra.mxu0 %v3390_v3  ;;  %v412_v13 = vld [vmem:[%s3962_s27 + $0x38] sm:$0xff]  ;;  %v413_v14 = vld [vmem:[%s3962_s27 + $0x40] sm:$0xff]  ;;  %v414_v15 = vld [vmem:[%s3962_s27 + $0x48] sm:$0xff]  ;;  %1130 = vst [vmem:[#allocation2 + $0x8] sm:$0xff] %v3786_v38  ;;  %s2996_s21 = scalar_lea.sflag [#allocation5], %s3956_s22  ;;  %p5784_p11 = scmp.ne.s32.totalorder %s5781_s29, 0 }
  0x3e   : > { %3395 = vmatprep.subr.bf16.mxu0 %v3394_v6  ;;  %v415_v16 = vld [vmem:[%s3962_s27 + $0x50] sm:$0xff]  ;;  %v416_v17 = vld [vmem:[%s3962_s27 + $0x58] sm:$0xff]  ;;  %v417_v18 = vld [vmem:[%s3962_s27 + $0x60] sm:$0xff]  ;;  %1131 = vst [vmem:[#allocation2 + $0x10] sm:$0x3] %v3786_v38  ;;  %s3789_s26 = smov [#allocation6]  }
  0x3f   : > { %v418_v19 = vld [vmem:[%s3962_s27 + $0x68] sm:$0xff]  ;;  %v419_v20 = vld [vmem:[%s3962_s27 + $0x70] sm:$0xff]  ;;  %v420_v21 = vld [vmem:[%s3962_s27 + $0x78] sm:$0xff]  ;;  %1132 = vst [vmem:[#allocation2 + $0x18] sm:$0xff] %v3786_v38  ;;  %s3719_s24 = sshll.u32 %s3789_s26, 4  ;;  %s3720_s24 = int_to_ptr.vmem [resolvable:$false] %s3719_s24 }
  0x40   : > { %v421_v22 = vld [vmem:[%s3962_s27 + $0x80] sm:$0xff]  ;;  %v422_v23 = vld [vmem:[%s3962_s27 + $0x88] sm:$0xff]  ;;  %v423_v24 = vld [vmem:[%s3962_s27 + $0x90] sm:$0xff]  ;;  %1135 = vst [vmem:[#allocation2 + $0x30] sm:$0xff] %v3786_v38  ;;  %s3721_s25 = scalar_lea.vmem %s3720_s24, 8192  ;;  %p3722_p8 = scmp.lt.s32.totalorder %s5687_s28, %s3720_s24 }
  0x41   : > { %3397 = vmatpush3.bf16.msra.mxu0 %v3394_v6  ;;  %v424_v25 = vld [vmem:[%s3962_s27 + $0x98] sm:$0xff]  ;;  %v425_v26 = vld [vmem:[%s3962_s27 + $0xa0] sm:$0xff]  ;;  %v426_v27 = vld [vmem:[%s3962_s27 + $0xa8] sm:$0xff]  ;;  %1136 = vst [vmem:[#allocation2 + $0x38] sm:$0xff] %v3786_v38 }
  0x42   : > { %v427_v28 = vld [vmem:[%s3962_s27 + $0xb0] sm:$0xff]  ;;  %v428_v29 = vld [vmem:[%s3962_s27 + $0xb8] sm:$0xff]  ;;  %v429_v30 = vld [vmem:[%s3962_s27 + $0xc0] sm:$0xff]  ;;  %1137 = vst [vmem:[#allocation2 + $0x40] sm:$0x3] %v3786_v38 }
  0x43   : > { %v430_v31 = vld [vmem:[%s3962_s27 + $0xc8] sm:$0xff]  ;;  %v431_v32 = vld [vmem:[%s3962_s27 + $0xd0] sm:$0xff]  ;;  %v432_v33 = vld [vmem:[%s3962_s27 + $0xd8] sm:$0xff]  ;;  %1138 = vst [vmem:[#allocation2 + $0x48] sm:$0xff] %v3786_v38 }
  0x44   : > { %3245 = vmatmul.mubr.msk.f32.vlgmr.msra.gmra.mrb[0].mxu0 %vm441_vm0, %v406_v7  ;;  %v433_v34 = vld [vmem:[%s3962_s27 + $0xe0] sm:$0xff]  ;;  %v434_v35 = vld [vmem:[%s3962_s27 + $0xe8] sm:$0xff]  ;;  %v435_v36 = vld [vmem:[%s3962_s27 + $0xf0] sm:$0xff]  ;;  %1139 = vst [vmem:[#allocation2 + $0x50] sm:$0xff] %v3786_v38 }
  0x45   : > { %3247 = vmatprep.mubr.msk.f32.mxu0 %vm441_vm0, %v407_v8  ;;  %v436_v37 = vld [vmem:[%s3962_s27 + $0xf8] sm:$0xff]  ;;  %1140 = vst [vmem:[#allocation2 + $0x58] sm:$0x3] %v3786_v38  ;;  %1141 = vst [vmem:[#allocation2 + $0x60] sm:$0xff] %v3786_v38  ;;  %v2414_v39 = vld [vmem:[%s5768_s5] sm:$0xff] }
  0x46   : > { %1142 = vst [vmem:[#allocation2 + $0x68] sm:$0xff] %v3786_v38  ;;  %1143 = vst [vmem:[#allocation2 + $0x70] sm:$0x3] %v3786_v38  ;;  %v2415_v40 = vld [vmem:[%s5768_s5 + $0x8] sm:$0xff]  ;;  %v2416_v42 = vld [vmem:[%s5768_s5 + $0x10] sm:$0xff] }
  0x47   : > { %1144 = vst [vmem:[#allocation2 + $0x78] sm:$0xff] %v3786_v38  ;;  %1145 = vst [vmem:[#allocation2 + $0x80] sm:$0xff] %v3786_v38  ;;  %v3398_v41 = vpack.c.bf16 %v2415_v40, %v2414_v39  ;;  %v2417_v43 = vld [vmem:[%s5768_s5 + $0x18] sm:$0xff]  ;;  %v2418_v45 = vld [vmem:[%s5768_s5 + $0x20] sm:$0xff] }
  0x48   : > { %3248 = vmatmul.mubr.msk.f32.gmra.mrb[2].mxu0 %vm441_vm0, %v408_v9  ;;  %1146 = vst [vmem:[#allocation2 + $0x88] sm:$0x3] %v3786_v38  ;;  %1147 = vst [vmem:[#allocation2 + $0x90] sm:$0xff] %v3786_v38  ;;  %v3402_v44 = vpack.c.bf16 %v2417_v43, %v2416_v42  ;;  %v2419_v46 = vld [vmem:[%s5768_s5 + $0x28] sm:$0xff]  ;;  %v2420_v48 = vld [vmem:[%s5768_s5 + $0x30] sm:$0xff] }
  0x49   : > { %3250 = vmatprep.mubr.msk.f32.mxu0 %vm441_vm0, %v409_v10  ;;  %1148 = vst [vmem:[#allocation2 + $0x98] sm:$0xff] %v3786_v38  ;;  %1149 = vst [vmem:[#allocation2 + $0xa0] sm:$0x3] %v3786_v38  ;;  %3399 = vmatprep.subr.bf16.mxu0 %v3398_v41  ;;  %v3406_v47 = vpack.c.bf16 %v2419_v46, %v2418_v45  ;;  %v2421_v49 = vld [vmem:[%s5768_s5 + $0x38] sm:$0xff]  ;;  %v2422_v51 = vld [vmem:[%s5768_s5 + $0x40] sm:$0xff] }
  0x4a   : > { %1150 = vst [vmem:[#allocation2 + $0xa8] sm:$0xff] %v3786_v38  ;;  %1151 = vst [vmem:[#allocation2 + $0xb0] sm:$0xff] %v3786_v38  ;;  %3439 = vmatprep.subr.bf16.mxu1 %v3398_v41  ;;  %3401 = vmatpush3.bf16.msra.mxu0 %v3398_v41  ;;  %v3410_v50 = vpack.c.bf16 %v2421_v49, %v2420_v48  ;;  %v2423_v52 = vld [vmem:[%s5768_s5 + $0x48] sm:$0xff]  ;;  %v2424_v54 = vld [vmem:[%s5768_s5 + $0x50] sm:$0xff] }
  0x4b   : > { %1152 = vst [vmem:[#allocation2 + $0xb8] sm:$0x3] %v3786_v38  ;;  %1153 = vst [vmem:[#allocation2 + $0xc0] sm:$0xff] %v3786_v38  ;;  %3447 = vmatpush3.bf16.msra.mxu1 %v3398_v41  ;;  %3403 = vmatprep.subr.bf16.mxu0 %v3402_v44  ;;  %v3414_v53 = vpack.c.bf16 %v2423_v52, %v2422_v51  ;;  %v2425_v55 = vld [vmem:[%s5768_s5 + $0x58] sm:$0xff]  ;;  %v2426_v57 = vld [vmem:[%s5768_s5 + $0x60] sm:$0xff] }
  0x4c   : > { %3251 = vmatmul.mubr.msk.f32.gmra.mrb[4].mxu0 %vm441_vm0, %v410_v11  ;;  %1154 = vst [vmem:[#allocation2 + $0xc8] sm:$0xff] %v3786_v38  ;;  %1155 = vst [vmem:[#allocation2 + $0xd0] sm:$0x3] %v3786_v38  ;;  %3440 = vmatprep.subr.bf16.mxu1 %v3402_v44  ;;  %v3418_v56 = vpack.c.bf16 %v2425_v55, %v2424_v54  ;;  %v2427_v58 = vld [vmem:[%s5768_s5 + $0x68] sm:$0xff]  ;;  %v2428_v60 = vld [vmem:[%s5768_s5 + $0x70] sm:$0xff] }
  0x4d   : > { %3253 = vmatprep.mubr.msk.f32.mxu0 %vm441_vm0, %v411_v12  ;;  %1156 = vst [vmem:[#allocation2 + $0xd8] sm:$0xff] %v3786_v38  ;;  %1157 = vst [vmem:[#allocation2 + $0xe0] sm:$0xff] %v3786_v38  ;;  %v3422_v59 = vpack.c.bf16 %v2427_v58, %v2426_v57  ;;  %v2429_v61 = vld [vmem:[%s5768_s5 + $0x78] sm:$0xff]  ;;  %v4095_v0 = vld [vmem:[%s5767_s4] ss:$0 sm:$0xff] }
  0x4e   : > { %1158 = vst [vmem:[#allocation2 + $0xe8] sm:$0x3] %v3786_v38  ;;  %1159 = vst [vmem:[#allocation2 + $0xf0] sm:$0xff] %v3786_v38  ;;  %3405 = vmatpush3.bf16.msra.mxu0 %v3402_v44  ;;  %v3426_v62 = vpack.c.bf16 %v2429_v61, %v2428_v60  ;;  %v1317_v3 = vld [vmem:[#allocation2 + $0x1] sm:$0xff]  ;;  %v1318_v6 = vld [vmem:[#allocation2 + $0x9] sm:$0xff]  ;;  %v1253_v10 = vmul.f32 0.0, %v4095_v0 }
  0x4f   : > { %1160 = vst [vmem:[#allocation2 + $0xf8] sm:$0xff] %v3786_v38  ;;  %1161 = vst [vmem:[#allocation2 + $0x100] sm:$0x3] %v3786_v38  ;;  %3448 = vmatpush3.bf16.msra.mxu1 %v3402_v44  ;;  %3407 = vmatprep.subr.bf16.mxu0 %v3406_v47  ;;  %v4100_v4 = vld [vmem:[%s5767_s4 + $0x1] ss:$0 sm:$0xff] }
  0x50   : > { %3254 = vmatmul.mubr.msk.f32.gmra.mrb[6].mxu0 %vm441_vm0, %v412_v13  ;;  %1162 = vst [vmem:[#allocation2 + $0x108] sm:$0xff] %v3786_v38  ;;  %1163 = vst [vmem:[#allocation2 + $0x110] sm:$0xff] %v3786_v38  ;;  %3441 = vmatprep.subr.bf16.mxu1 %v3406_v47  ;;  %v1354_v11 = vmul.f32 %v4100_v4, %v1317_v3 }
  0x51   : > { %3256 = vmatprep.mubr.msk.f32.mxu0 %vm441_vm0, %v413_v14  ;;  %1164 = vst [vmem:[#allocation2 + $0x118] sm:$0x3] %v3786_v38  ;;  %1165 = vst [vmem:[#allocation2 + $0x120] sm:$0xff] %v3786_v38 }
  0x52   : > { %1166 = vst [vmem:[#allocation2 + $0x128] sm:$0xff] %v3786_v38  ;;  %1167 = vst [vmem:[#allocation2 + $0x130] sm:$0x3] %v3786_v38  ;;  %3409 = vmatpush3.bf16.msra.mxu0 %v3406_v47 }
  0x53   : > { %1168 = vst [vmem:[#allocation2 + $0x138] sm:$0xff] %v3786_v38  ;;  %1169 = vst [vmem:[#allocation2 + $0x140] sm:$0xff] %v3786_v38  ;;  %3449 = vmatpush3.bf16.msra.mxu1 %v3406_v47  ;;  %3411 = vmatprep.subr.bf16.mxu0 %v3410_v50 }
  0x54   : > { %3257 = vmatmul.mubr.msk.f32.gmra.mrb[8].mxu0 %vm441_vm0, %v414_v15  ;;  %1170 = vst [vmem:[#allocation2 + $0x148] sm:$0x3] %v3786_v38  ;;  %1171 = vst [vmem:[#allocation2 + $0x150] sm:$0xff] %v3786_v38  ;;  %3442 = vmatprep.subr.bf16.mxu1 %v3410_v50  ;;  %v1418_v15 = vld [vmem:[#allocation2 + $0x2] sm:$0xff] }
  0x55   : > { %3259 = vmatprep.mubr.msk.f32.mxu0 %vm441_vm0, %v415_v16  ;;  %1172 = vst [vmem:[#allocation2 + $0x158] sm:$0xff] %v3786_v38  ;;  %1173 = vst [vmem:[#allocation2 + $0x160] sm:$0x3] %v3786_v38  ;;  %v4107_v16 = vld [vmem:[%s5767_s4 + $0x2] ss:$0 sm:$0xff] }
  0x56   : > { %1174 = vst [vmem:[#allocation2 + $0x168] sm:$0xff] %v3786_v38  ;;  %1175 = vst [vmem:[#allocation2 + $0x170] sm:$0xff] %v3786_v38  ;;  %3413 = vmatpush3.bf16.msra.mxu0 %v3410_v50 }
  0x57   : > { %1176 = vst [vmem:[#allocation2 + $0x178] sm:$0x3] %v3786_v38  ;;  %1177 = vst [vmem:[#allocation2 + $0x180] sm:$0xff] %v3786_v38  ;;  %3450 = vmatpush3.bf16.msra.mxu1 %v3410_v50  ;;  %3415 = vmatprep.subr.bf16.mxu0 %v3414_v53 }
  0x58   : > { %3260 = vmatmul.mubr.msk.f32.gmra.mrb[10].mxu0 %vm441_vm0, %v416_v17  ;;  %1178 = vst [vmem:[#allocation2 + $0x188] sm:$0xff] %v3786_v38  ;;  %1179 = vst [vmem:[#allocation2 + $0x190] sm:$0x3] %v3786_v38  ;;  %3443 = vmatprep.subr.bf16.mxu1 %v3414_v53  ;;  %v1355_v17 = vmul.f32 %v4100_v4, %v1318_v6 }
  0x59   : > { %3262 = vmatprep.mubr.msk.f32.mxu0 %vm441_vm0, %v417_v18  ;;  %1180 = vst [vmem:[#allocation2 + $0x198] sm:$0xff] %v3786_v38  ;;  %1181 = vst [vmem:[#allocation2 + $0x1a0] sm:$0xff] %v3786_v38 }
  0x5a   : > { %1182 = vst [vmem:[#allocation2 + $0x1a8] sm:$0x3] %v3786_v38  ;;  %3417 = vmatpush3.bf16.msra.mxu0 %v3414_v53 }
  0x5b   : > { %3451 = vmatpush3.bf16.msra.mxu1 %v3414_v53  ;;  %3419 = vmatprep.subr.bf16.mxu0 %v3418_v56 }
  0x5c   : > { %3263 = vmatmul.mubr.msk.f32.gmra.mrb[12].mxu0 %vm441_vm0, %v418_v19  ;;  %3444 = vmatprep.subr.bf16.mxu1 %v3418_v56 }
  0x5d   : > { %3265 = vmatprep.mubr.msk.f32.mxu0 %vm441_vm0, %v419_v20 }
  0x5e   : > { %3421 = vmatpush3.bf16.msra.mxu0 %v3418_v56 }
  0x5f   : > { %3452 = vmatpush3.bf16.msra.mxu1 %v3418_v56  ;;  %3423 = vmatprep.subr.bf16.mxu0 %v3422_v59 }
  0x60   : > { %3266 = vmatmul.mubr.msk.f32.gmra.mrb[14].mxu0 %vm441_vm0, %v420_v21  ;;  %3445 = vmatprep.subr.bf16.mxu1 %v3422_v59 }
  0x61   : > { %3268 = vmatprep.mubr.msk.f32.mxu0 %vm441_vm0, %v421_v22  ;;  %v1419_v22 = vld [vmem:[#allocation2 + $0xa] sm:$0xff] }
  0x62   : > { %3425 = vmatpush3.bf16.msra.mxu0 %v3422_v59 }
  0x63   : > { %3453 = vmatpush3.bf16.msra.mxu1 %v3422_v59  ;;  %3427 = vmatprep.subr.bf16.mxu0 %v3426_v62 }
  0x64   : > { %3269 = vmatmul.mubr.msk.f32.gmra.mrb[16].mxu0 %vm441_vm0, %v422_v23  ;;  %3446 = vmatprep.subr.bf16.mxu1 %v3426_v62 }
  0x65   : > { %3271 = vmatprep.mubr.msk.f32.mxu0 %vm441_vm0, %v423_v24 }
  0x66   : > { %3429 = vmatpush3.bf16.msra.mxu0 %v3426_v62 }
  0x67   : > { %3454 = vmatpush3.bf16.msra.mxu1 %v3426_v62 }
  0x68   : > { %3272 = vmatmul.mubr.msk.f32.gmra.mrb[18].mxu0 %vm441_vm0, %v424_v25 }
  0x69   : > { %3274 = vmatprep.mubr.msk.f32.mxu0 %vm441_vm0, %v425_v26  ;;  %v1386_v26 = vadd.f32 %v1354_v11, %v1253_v10 }
  0x6c   : > { %3275 = vmatmul.mubr.msk.f32.gmra.mrb[20].mxu0 %vm441_vm0, %v426_v27  ;;  %v1455_v27 = vmul.f32 %v4107_v16, %v1418_v15 }
  0x6d   : > { %3277 = vmatprep.mubr.msk.f32.mxu0 %vm441_vm0, %v427_v28 }
  0x6e   : > { %v4112_v46 = vadd.f32 %v1455_v27, %v1386_v26 }
  0x70   : > { %3278 = vmatmul.mubr.msk.f32.gmra.mrb[22].mxu0 %vm441_vm0, %v428_v29 }
  0x71   : > { %3280 = vmatprep.mubr.msk.f32.mxu0 %vm441_vm0, %v429_v30 }
  0x74   : > { %3281 = vmatmul.mubr.msk.f32.gmra.mrb[24].mxu0 %vm441_vm0, %v430_v31 }
  0x75   : > { %3283 = vmatprep.mubr.msk.f32.mxu0 %vm441_vm0, %v431_v32  ;;  %v1387_v32 = vadd.f32 %v1355_v17, %v1253_v10 }
  0x78   : > { %3284 = vmatmul.mubr.msk.f32.gmra.mrb[26].mxu0 %vm441_vm0, %v432_v33 }
  0x79   : > { %3286 = vmatprep.mubr.msk.f32.mxu0 %vm441_vm0, %v433_v34 }
  0x7c   : > { %3287 = vmatmul.mubr.msk.f32.gmra.mrb[28].mxu0 %vm441_vm0, %v434_v35 }
  0x7d   : > { %3289 = vmatprep.mubr.msk.f32.mxu0 %vm441_vm0, %v435_v36  ;;  %v1456_v36 = vmul.f32 %v4107_v16, %v1419_v22 }
  0x7f   : > { %v4114_v50 = vadd.f32 %v1456_v36, %v1387_v32 }
  0x80   : > { %3290 = vmatmul.mubr.msk.f32.gmra.mrb[30].mxu0 %vm441_vm0, %v436_v37 }
 0x117   : > { %v3246_v63 = vpop.f32.mrb[0].mxu0 }
 0x118   : > { %v796_v1 = vmul.f32 0.044715, %v3246_v63  ;;  %v604_v2 = vpop.f32.mrb[1].mxu0  ;;  %v764_v51 = vmul.f32 0.5, %v3246_v63 }
 0x119   : > { %v795_v5 = vmul.f32 0.044715, %v604_v2  ;;  %v763_v54 = vmul.f32 0.5, %v604_v2 }
 0x11a   : > { %v828_v7 = vmul.f32 %v3246_v63, %v796_v1 }
 0x11b   : > { %v827_v8 = vmul.f32 %v795_v5, %v604_v2  ;;  %v3249_v9 = vpop.f32.mrb[2].mxu0 }
 0x11c   : > { %v860_v12 = vmul.f32 %v3246_v63, %v828_v7  ;;  %v798_v13 = vmul.f32 0.044715, %v3249_v9  ;;  %v614_v14 = vpop.f32.mrb[3].mxu0  ;;  %v766_v58 = vmul.f32 0.5, %v3249_v9 }
 0x11d   : > { %v859_v18 = vmul.f32 %v827_v8, %v604_v2  ;;  %v797_v19 = vmul.f32 0.044715, %v614_v14  ;;  %v765_v1 = vmul.f32 0.5, %v614_v14 }
 0x11e   : > { %v892_v20 = vadd.f32 %v3246_v63, %v860_v12  ;;  %v830_v21 = vmul.f32 %v3249_v9, %v798_v13 }
 0x11f   : > { %v891_v23 = vadd.f32 %v859_v18, %v604_v2  ;;  %v829_v24 = vmul.f32 %v797_v19, %v614_v14  ;;  %v3252_v25 = vpop.f32.mrb[4].mxu0 }
 0x120   : > { %v924_v28 = vmul.f32 0.7978846, %v892_v20  ;;  %v862_v29 = vmul.f32 %v3249_v9, %v830_v21  ;;  %v800_v30 = vmul.f32 0.044715, %v3252_v25  ;;  %v624_v31 = vpop.f32.mrb[5].mxu0  ;;  %v4119_v63 = vmul.f32 0.5, %v3252_v25 }
 0x121   : > { %v923_v33 = vmul.f32 0.7978846, %v891_v23  ;;  %v861_v34 = vmul.f32 %v829_v24, %v614_v14  ;;  %v799_v35 = vmul.f32 0.044715, %v624_v31  ;;  %v4121_v8 = vmul.f32 0.5, %v624_v31 }
 0x122   : > { %3508 = vtanh.f32 %v924_v28  ;;  %v894_v37 = vadd.f32 %v3249_v9, %v862_v29  ;;  %v832_v38 = vmul.f32 %v3252_v25, %v800_v30  ;;  %v4137_v24 = vld [vmem:[%s5765_s2] ss:$0 sm:$0xff] }
 0x123   : > { %3510 = vtanh.f32 %v923_v33  ;;  %v893_v39 = vadd.f32 %v861_v34, %v614_v14  ;;  %v831_v40 = vmul.f32 %v799_v35, %v624_v31  ;;  %v3255_v41 = vpop.f32.mrb[6].mxu0  ;;  %v4147_v33 = vld [vmem:[%s5766_s3] ss:$0 sm:$0xff] }
 0x124   : > { %v926_v42 = vmul.f32 0.7978846, %v894_v37  ;;  %v864_v43 = vmul.f32 %v3252_v25, %v832_v38  ;;  %v802_v44 = vmul.f32 0.044715, %v3255_v41  ;;  %v634_v45 = vpop.f32.mrb[7].mxu0  ;;  %v4126_v13 = vmul.f32 0.5, %v3255_v41 }
 0x125   : > { %v925_v47 = vmul.f32 0.7978846, %v893_v39  ;;  %v863_v48 = vmul.f32 %v831_v40, %v624_v31  ;;  %v801_v49 = vmul.f32 0.044715, %v634_v45  ;;  %v4131_v21 = vmul.f32 0.5, %v634_v45 }
 0x126   : > { %3512 = vtanh.f32 %v926_v42  ;;  %v896_v52 = vadd.f32 %v3252_v25, %v864_v43  ;;  %v834_v53 = vmul.f32 %v3255_v41, %v802_v44 }
 0x127   : > { %3514 = vtanh.f32 %v925_v47  ;;  %v895_v55 = vadd.f32 %v863_v48, %v624_v31  ;;  %v833_v56 = vmul.f32 %v801_v49, %v634_v45  ;;  %v3258_v57 = vpop.f32.mrb[8].mxu0 }
 0x128   : > { %v928_v59 = vmul.f32 0.7978846, %v896_v52  ;;  %v866_v60 = vmul.f32 %v3255_v41, %v834_v53  ;;  %v804_v61 = vmul.f32 0.044715, %v3258_v57  ;;  %v4116_v62 = vpop.f32.mrb[9].mxu0  ;;  %v4149_v35 = vmul.f32 0.5, %v3258_v57 }
 0x129   : > { %v927_v3 = vmul.f32 0.7978846, %v895_v55  ;;  %v865_v5 = vmul.f32 %v833_v56, %v634_v45  ;;  %v803_v6 = vmul.f32 0.044715, %v4116_v62 }
 0x12a   : > { %3516 = vtanh.f32 %v928_v59  ;;  %v898_v7 = vadd.f32 %v3255_v41, %v866_v60  ;;  %v836_v2 = vmul.f32 %v3258_v57, %v804_v61 }
 0x12b   : > { %3518 = vtanh.f32 %v927_v3  ;;  %v897_v10 = vadd.f32 %v865_v5, %v634_v45  ;;  %v835_v9 = vmul.f32 %v803_v6, %v4116_v62  ;;  %v4124_v11 = vpop.f32.mrb[10].mxu0  ;;  %v771_v3 = vmul.f32 0.5, %v4116_v62 }
 0x12c   : > { %v3509_v12 = vpop.eup %3508  ;;  %v930_v14 = vmul.f32 0.7978846, %v898_v7  ;;  %v868_v15 = vmul.f32 %v3258_v57, %v836_v2  ;;  %v806_v17 = vmul.f32 0.044715, %v4124_v11  ;;  %v4129_v18 = vpop.f32.mrb[11].mxu0 }
 0x12d   : > { %v3511_v19 = vpop.eup %3510  ;;  %v988_v20 = vadd.f32 1.0, %v3509_v12  ;;  %v929_v22 = vmul.f32 0.7978846, %v897_v10  ;;  %v867_v23 = vmul.f32 %v835_v9, %v4116_v62  ;;  %v805_v30 = vmul.f32 0.044715, %v4129_v18 }
 0x12e   : > { %v987_v25 = vadd.f32 1.0, %v3511_v19  ;;  %3520 = vtanh.f32 %v930_v14  ;;  %v900_v26 = vadd.f32 %v3258_v57, %v868_v15  ;;  %v838_v27 = vmul.f32 %v4124_v11, %v806_v17 }
 0x12f   : > { %v1020_v28 = vmul.f32 %v988_v20, %v764_v51  ;;  %3522 = vtanh.f32 %v929_v22  ;;  %v899_v29 = vadd.f32 %v867_v23, %v4116_v62  ;;  %v4142_v31 = vpop.f32.mrb[12].mxu0  ;;  %v837_v43 = vmul.f32 %v805_v30, %v4129_v18 }
 0x130   : > { %v3513_v32 = vpop.eup %3512  ;;  %v1019_v34 = vmul.f32 %v987_v25, %v763_v54  ;;  %v932_v36 = vmul.f32 0.7978846, %v900_v26  ;;  %v870_v37 = vmul.f32 %v4124_v11, %v838_v27  ;;  %v4152_v38 = vpop.f32.mrb[13].mxu0  ;;  %v808_v57 = vmul.f32 0.044715, %v4142_v31 }
 0x131   : > { %v3515_v39 = vpop.eup %3514  ;;  %v1059_v40 = vmul.f32 %v4137_v24, %v1020_v28  ;;  %v990_v41 = vadd.f32 1.0, %v3513_v32  ;;  %v931_v42 = vmul.f32 0.7978846, %v899_v29  ;;  %v869_v51 = vmul.f32 %v837_v43, %v4129_v18 }
 0x132   : > { %v1058_v44 = vmul.f32 %v4137_v24, %v1019_v34  ;;  %v989_v45 = vadd.f32 1.0, %v3515_v39  ;;  %3524 = vtanh.f32 %v932_v36  ;;  %v902_v47 = vadd.f32 %v4124_v11, %v870_v37 }
 0x133   : > { %v1098_v48 = vadd.f32 %v4147_v33, %v1059_v40  ;;  %v1022_v49 = vmul.f32 %v990_v41, %v766_v58  ;;  %3526 = vtanh.f32 %v931_v42  ;;  %v4160_v52 = vpop.f32.mrb[14].mxu0  ;;  %v901_v5 = vadd.f32 %v869_v51, %v4129_v18 }
 0x134   : > { %v3517_v53 = vpop.eup %3516  ;;  %v4163_v54 = vadd.f32 %v4147_v33, %v1058_v44  ;;  %v1021_v55 = vmul.f32 %v989_v45, %v765_v1  ;;  %v934_v56 = vmul.f32 0.7978846, %v902_v47  ;;  %v4166_v59 = vpop.f32.mrb[15].mxu0  ;;  %v840_v1 = vmul.f32 %v4142_v31, %v808_v57 }
 0x135   : > { %v3519_v60 = vpop.eup %3518  ;;  %1185 = vst [vmem:[#allocation2 + $0x21] sm:$0xff] %v1098_v48  ;;  %v1061_v61 = vmul.f32 %v4137_v24, %v1022_v49  ;;  %v992_v58 = vadd.f32 1.0, %v3517_v53  ;;  %v933_v9 = vmul.f32 0.7978846, %v901_v5  ;;  %v807_v12 = vmul.f32 0.044715, %v4152_v38 }
 0x136   : > { %1184 = vst [vmem:[#allocation2 + $0x19] sm:$0xff] %v4163_v54  ;;  %v1060_v6 = vmul.f32 %v4137_v24, %v1021_v55  ;;  %v991_v7 = vadd.f32 1.0, %v3519_v60  ;;  %3528 = vtanh.f32 %v934_v56  ;;  %v774_v19 = vmul.f32 0.5, %v4124_v11 }
 0x137   : > { %v4175_v2 = vadd.f32 %v4147_v33, %v1061_v61  ;;  %v1024_v10 = vmul.f32 %v992_v58, %v4119_v63  ;;  %v4179_v14 = vpop.f32.mrb[16].mxu0  ;;  %v872_v20 = vmul.f32 %v4142_v31, %v840_v1  ;;  %3530 = vtanh.f32 %v933_v9 }
 0x138   : > { %v3521_v62 = vpop.eup %3520  ;;  %v4182_v15 = vadd.f32 %v4147_v33, %v1060_v6  ;;  %v1023_v17 = vmul.f32 %v991_v7, %v4121_v8  ;;  %v4187_v22 = vpop.f32.mrb[17].mxu0  ;;  %v839_v26 = vmul.f32 %v807_v12, %v4152_v38  ;;  %v810_v28 = vmul.f32 0.044715, %v4160_v52 }
 0x139   : > { %v3523_v23 = vpop.eup %3522  ;;  %1187 = vst [vmem:[#allocation2 + $0x39] sm:$0xff] %v4175_v2  ;;  %v1063_v63 = vmul.f32 %v4137_v24, %v1024_v10  ;;  %v994_v25 = vadd.f32 1.0, %v3521_v62  ;;  %v904_v11 = vadd.f32 %v4142_v31, %v872_v20  ;;  %v773_v32 = vmul.f32 0.5, %v4129_v18 }
 0x13a   : > { %1186 = vst [vmem:[#allocation2 + $0x31] sm:$0xff] %v4182_v15  ;;  %v1062_v27 = vmul.f32 %v4137_v24, %v1023_v17  ;;  %v993_v8 = vadd.f32 1.0, %v3523_v23  ;;  %v871_v34 = vmul.f32 %v839_v26, %v4152_v38  ;;  %v842_v42 = vmul.f32 %v4160_v52, %v810_v28 }
 0x13b   : > { %v1102_v29 = vadd.f32 %v4147_v33, %v1063_v63  ;;  %v1026_v30 = vmul.f32 %v994_v25, %v4126_v13  ;;  %v4200_v36 = vpop.f32.mrb[18].mxu0  ;;  %v936_v41 = vmul.f32 0.7978846, %v904_v11  ;;  %v809_v47 = vmul.f32 0.044715, %v4166_v59 }
 0x13c   : > { %v3525_v37 = vpop.eup %3524  ;;  %v4203_v39 = vadd.f32 %v4147_v33, %v1062_v27  ;;  %v1025_v40 = vmul.f32 %v993_v8, %v4131_v21  ;;  %v4207_v43 = vpop.f32.mrb[19].mxu0  ;;  %v903_v45 = vadd.f32 %v871_v34, %v4152_v38  ;;  %v874_v21 = vmul.f32 %v4160_v52, %v842_v42 }
 0x13d   : > { %v3527_v44 = vpop.eup %3526  ;;  %1189 = vst [vmem:[#allocation2 + $0x51] sm:$0xff] %v1102_v29  ;;  %v1065_v13 = vmul.f32 %v4137_v24, %v1026_v30  ;;  %v996_v18 = vadd.f32 1.0, %v3525_v37  ;;  %3532 = vtanh.f32 %v936_v41  ;;  %v841_v56 = vmul.f32 %v809_v47, %v4166_v59 }
 0x13e   : > { %1188 = vst [vmem:[#allocation2 + $0x49] sm:$0xff] %v4203_v39  ;;  %v1064_v48 = vmul.f32 %v4137_v24, %v1025_v40  ;;  %v995_v49 = vadd.f32 1.0, %v3527_v44  ;;  %v935_v55 = vmul.f32 0.7978846, %v903_v45  ;;  %v776_v5 = vmul.f32 0.5, %v4142_v31 }
 0x13f   : > { %v1104_v51 = vadd.f32 %v4147_v33, %v1065_v13  ;;  %v1028_v53 = vmul.f32 %v996_v18, %v4149_v35  ;;  %v4218_v57 = vpop.f32.mrb[20].mxu0  ;;  %v906_v6 = vadd.f32 %v4160_v52, %v874_v21  ;;  %v873_v35 = vmul.f32 %v841_v56, %v4166_v59 }
 0x140   : > { %v3529_v60 = vpop.eup %3528  ;;  %v1103_v61 = vadd.f32 %v4147_v33, %v1064_v48  ;;  %v1027_v58 = vmul.f32 %v995_v49, %v771_v3  ;;  %v4223_v7 = vpop.f32.mrb[21].mxu0  ;;  %3534 = vtanh.f32 %v935_v55  ;;  %v775_v12 = vmul.f32 0.5, %v4152_v38 }
 0x141   : > { %1191 = vst [vmem:[#allocation2 + $0x69] sm:$0xff] %v1104_v51  ;;  %v1067_v1 = vmul.f32 %v4137_v24, %v1028_v53  ;;  %v998_v10 = vadd.f32 1.0, %v3529_v60  ;;  %v938_v62 = vmul.f32 0.7978846, %v906_v6  ;;  %v812_v3 = vmul.f32 0.044715, %v4179_v14  ;;  %v3531_v31 = vpop.eup %3530 }
 0x142   : > { %1190 = vst [vmem:[#allocation2 + $0x61] sm:$0xff] %v1103_v61  ;;  %v1066_v9 = vmul.f32 %v4137_v24, %v1027_v58  ;;  %v905_v23 = vadd.f32 %v873_v35, %v4166_v59  ;;  %v811_v63 = vmul.f32 0.044715, %v4187_v22  ;;  %v997_v27 = vadd.f32 1.0, %v3531_v31 }
 0x143   : > { %v1106_v17 = vadd.f32 %v4147_v33, %v1067_v1  ;;  %v1030_v20 = vmul.f32 %v998_v10, %v774_v19  ;;  %v4233_v25 = vpop.f32.mrb[22].mxu0  ;;  %3536 = vtanh.f32 %v938_v62  ;;  %v844_v8 = vmul.f32 %v4179_v14, %v812_v3 }
 0x144   : > { %v1105_v26 = vadd.f32 %v4147_v33, %v1066_v9  ;;  %v4237_v38 = vpop.f32.mrb[23].mxu0  ;;  %v778_v28 = vmul.f32 0.5, %v4160_v52  ;;  %v937_v19 = vmul.f32 0.7978846, %v905_v23  ;;  %v843_v29 = vmul.f32 %v811_v63, %v4187_v22 }
 0x145   : > { %1193 = vst [vmem:[#allocation2 + $0x81] sm:$0xff] %v1106_v17  ;;  %v1069_v11 = vmul.f32 %v4137_v24, %v1030_v20  ;;  %v1029_v30 = vmul.f32 %v997_v27, %v773_v32  ;;  %v4243_v34 = vmul.f32 0.5, %v4166_v59  ;;  %v876_v37 = vmul.f32 %v4179_v14, %v844_v8 }
 0x146   : > { %1192 = vst [vmem:[#allocation2 + $0x79] sm:$0xff] %v1105_v26  ;;  %v814_v40 = vmul.f32 0.044715, %v4200_v36  ;;  %3538 = vtanh.f32 %v937_v19  ;;  %v875_v42 = vmul.f32 %v843_v29, %v4187_v22  ;;  %v813_v44 = vmul.f32 0.044715, %v4207_v43 }
 0x147   : > { %v1108_v41 = vadd.f32 %v4147_v33, %v1069_v11  ;;  %v4250_v52 = vpop.f32.mrb[24].mxu0  ;;  %v3533_v13 = vpop.eup %3532  ;;  %v1068_v18 = vmul.f32 %v4137_v24, %v1029_v30  ;;  %v4254_v32 = vmul.f32 0.5, %v4179_v14  ;;  %v908_v59 = vadd.f32 %v4179_v14, %v876_v37 }
 0x148   : > { %v846_v45 = vmul.f32 %v4200_v36, %v814_v40  ;;  %v4258_v47 = vpop.f32.mrb[25].mxu0  ;;  %v1000_v48 = vadd.f32 1.0, %v3533_v13  ;;  %v907_v49 = vadd.f32 %v875_v42, %v4187_v22  ;;  %v845_v21 = vmul.f32 %v813_v44, %v4207_v43 }
 0x149   : > { %1195 = vst [vmem:[#allocation2 + $0x99] sm:$0xff] %v1108_v41  ;;  %v816_v51 = vmul.f32 0.044715, %v4218_v57  ;;  %v1107_v53 = vadd.f32 %v4147_v33, %v1068_v18  ;;  %v940_v55 = vmul.f32 0.7978846, %v908_v59  ;;  %v4265_v56 = vmul.f32 0.5, %v4187_v22 }
 0x14a   : > { %v878_v14 = vmul.f32 %v4200_v36, %v846_v45  ;;  %v3535_v60 = vpop.eup %3534  ;;  %v1032_v61 = vmul.f32 %v1000_v48, %v776_v5  ;;  %v939_v58 = vmul.f32 0.7978846, %v907_v49  ;;  %v877_v6 = vmul.f32 %v845_v21, %v4207_v43 }
 0x14b   : > { %v848_v1 = vmul.f32 %v4218_v57, %v816_v51  ;;  %v4270_v10 = vpop.f32.mrb[26].mxu0  ;;  %1194 = vst [vmem:[#allocation2 + $0x91] sm:$0xff] %v1107_v53  ;;  %v999_v35 = vadd.f32 1.0, %v3535_v60  ;;  %3540 = vtanh.f32 %v940_v55  ;;  %v815_v62 = vmul.f32 0.044715, %v4223_v7 }
 0x14c   : > { %v910_v9 = vadd.f32 %v4200_v36, %v878_v14  ;;  %v4274_v22 = vpop.f32.mrb[27].mxu0  ;;  %v1071_v3 = vmul.f32 %v4137_v24, %v1032_v61  ;;  %3542 = vtanh.f32 %v939_v58  ;;  %v909_v5 = vadd.f32 %v877_v6, %v4207_v43 }
 0x14d   : > { %v880_v31 = vmul.f32 %v4218_v57, %v848_v1  ;;  %v3537_v17 = vpop.eup %3536  ;;  %v1031_v20 = vmul.f32 %v999_v35, %v775_v12  ;;  %v4280_v23 = vmul.f32 0.5, %v4200_v36  ;;  %v847_v26 = vmul.f32 %v815_v62, %v4223_v7 }
 0x14e   : > { %v942_v63 = vmul.f32 0.7978846, %v910_v9  ;;  %v1110_v27 = vadd.f32 %v4147_v33, %v1071_v3  ;;  %v1002_v8 = vadd.f32 1.0, %v3537_v17  ;;  %v941_v11 = vmul.f32 0.7978846, %v909_v5 }
 0x14f   : > { %v912_v19 = vadd.f32 %v4218_v57, %v880_v31  ;;  %v4285_v29 = vpop.f32.mrb[28].mxu0  ;;  %v1070_v30 = vmul.f32 %v4137_v24, %v1031_v20  ;;  %v879_v37 = vmul.f32 %v847_v26, %v4223_v7  ;;  %v818_v12 = vmul.f32 0.044715, %v4233_v25 }
 0x150   : > { %3544 = vtanh.f32 %v942_v63  ;;  %v4290_v36 = vpop.f32.mrb[29].mxu0  ;;  %v3539_v40 = vpop.eup %3538  ;;  %1197 = vst [vmem:[#allocation2 + $0xb1] sm:$0xff] %v1110_v27  ;;  %v1034_v41 = vmul.f32 %v1002_v8, %v778_v28  ;;  %v781_v42 = vmul.f32 0.5, %v4207_v43  ;;  %v4298_v49 = vmul.f32 0.5, %v4218_v57 }
 0x151   : > { %3546 = vtanh.f32 %v941_v11  ;;  %v944_v44 = vmul.f32 0.7978846, %v912_v19  ;;  %v1109_v13 = vadd.f32 %v4147_v33, %v1070_v30  ;;  %v1001_v18 = vadd.f32 1.0, %v3539_v40 }
 0x152   : > { %v911_v59 = vadd.f32 %v879_v37, %v4223_v7  ;;  %v850_v45 = vmul.f32 %v4233_v25, %v818_v12  ;;  %v1073_v48 = vmul.f32 %v4137_v24, %v1034_v41  ;;  %v817_v21 = vmul.f32 0.044715, %v4237_v38 }
 0x153   : > { %3548 = vtanh.f32 %v944_v44  ;;  %v4301_v28 = vpop.f32.mrb[30].mxu0  ;;  %1196 = vst [vmem:[#allocation2 + $0xa9] sm:$0xff] %v1109_v13  ;;  %v1033_v43 = vmul.f32 %v1001_v18, %v4243_v34  ;;  %v820_v55 = vmul.f32 0.044715, %v4250_v52  ;;  %v4310_v57 = vmul.f32 0.5, %v4223_v7 }
 0x154   : > { %v943_v51 = vmul.f32 0.7978846, %v911_v59  ;;  %v882_v53 = vmul.f32 %v4233_v25, %v850_v45  ;;  %v4306_v14 = vpop.f32.mrb[31].mxu0  ;;  %v1112_v60 = vadd.f32 %v4147_v33, %v1073_v48  ;;  %v849_v61 = vmul.f32 %v817_v21, %v4237_v38 }
 0x155   : > { %v819_v58 = vmul.f32 0.044715, %v4258_v47  ;;  %v3541_v6 = vpop.eup %3540  ;;  %v1072_v1 = vmul.f32 %v4137_v24, %v1033_v43  ;;  %v852_v35 = vmul.f32 %v4250_v52, %v820_v55  ;;  %v4318_v3 = vmul.f32 0.5, %v4233_v25 }
 0x156   : > { %3550 = vtanh.f32 %v943_v51  ;;  %v914_v34 = vadd.f32 %v4233_v25, %v882_v53  ;;  %v3543_v9 = vpop.eup %3542  ;;  %1199 = vst [vmem:[#allocation2 + $0xc9] sm:$0xff] %v1112_v60  ;;  %v1004_v62 = vadd.f32 1.0, %v3541_v6  ;;  %v881_v7 = vmul.f32 %v849_v61, %v4237_v38 }
 0x157   : > { %v851_v5 = vmul.f32 %v819_v58, %v4258_v47  ;;  %v1111_v31 = vadd.f32 %v4147_v33, %v1072_v1  ;;  %v1003_v17 = vadd.f32 1.0, %v3543_v9  ;;  %v884_v63 = vmul.f32 %v4250_v52, %v852_v35 }
 0x158   : > { %v946_v20 = vmul.f32 0.7978846, %v914_v34  ;;  %v1036_v26 = vmul.f32 %v1004_v62, %v4254_v32  ;;  %v913_v27 = vadd.f32 %v881_v7, %v4237_v38  ;;  %v822_v11 = vmul.f32 0.044715, %v4270_v10 }
 0x159   : > { %v883_v8 = vmul.f32 %v851_v5, %v4258_v47  ;;  %1198 = vst [vmem:[#allocation2 + $0xc1] sm:$0xff] %v1111_v31  ;;  %v1035_v19 = vmul.f32 %v1003_v17, %v4265_v56  ;;  %v4330_v30 = vmul.f32 0.5, %v4237_v38  ;;  %v916_v37 = vadd.f32 %v4250_v52, %v884_v63 }
 0x15a   : > { %v3545_v25 = vpop.eup %3544  ;;  %3552 = vtanh.f32 %v946_v20  ;;  %v1075_v40 = vmul.f32 %v4137_v24, %v1036_v26  ;;  %v945_v41 = vmul.f32 0.7978846, %v913_v27  ;;  %v854_v45 = vmul.f32 %v4270_v10, %v822_v11 }
 0x15b   : > { %v3547_v12 = vpop.eup %3546  ;;  %v1006_v32 = vadd.f32 1.0, %v3545_v25  ;;  %v915_v44 = vadd.f32 %v883_v8, %v4258_v47  ;;  %v1074_v13 = vmul.f32 %v4137_v24, %v1035_v19  ;;  %v948_v59 = vmul.f32 0.7978846, %v916_v37 }
 0x15c   : > { %v1005_v18 = vadd.f32 1.0, %v3547_v12  ;;  %v1114_v48 = vadd.f32 %v4147_v33, %v1075_v40  ;;  %3554 = vtanh.f32 %v945_v41  ;;  %v886_v60 = vmul.f32 %v4270_v10, %v854_v45 }
 0x15d   : > { %v3549_v56 = vpop.eup %3548  ;;  %v1038_v38 = vmul.f32 %v1006_v32, %v4280_v23  ;;  %v947_v21 = vmul.f32 0.7978846, %v915_v44  ;;  %v1113_v43 = vadd.f32 %v4147_v33, %v1074_v13  ;;  %3556 = vtanh.f32 %v948_v59 }
 0x15e   : > { %v1037_v51 = vmul.f32 %v1005_v18, %v781_v42  ;;  %v1008_v53 = vadd.f32 1.0, %v3549_v56  ;;  %1201 = vst [vmem:[#allocation2 + $0xe1] sm:$0xff] %v1114_v48  ;;  %v821_v61 = vmul.f32 0.044715, %v4274_v22  ;;  %v788_v1 = vmul.f32 0.5, %v4250_v52 }
 0x15f   : > { %v1077_v55 = vmul.f32 %v4137_v24, %v1038_v38  ;;  %3558 = vtanh.f32 %v947_v21  ;;  %1200 = vst [vmem:[#allocation2 + $0xd9] sm:$0xff] %v1113_v43  ;;  %v824_v42 = vmul.f32 0.044715, %v4285_v29  ;;  %v918_v9 = vadd.f32 %v4270_v10, %v886_v60 }
 0x160   : > { %v3551_v58 = vpop.eup %3550  ;;  %v1076_v6 = vmul.f32 %v4137_v24, %v1037_v51  ;;  %v1040_v23 = vmul.f32 %v1008_v53, %v4298_v49  ;;  %v853_v62 = vmul.f32 %v821_v61, %v4274_v22  ;;  %v787_v31 = vmul.f32 0.5, %v4258_v47  ;;  %v4378_v53 = vld [vmem:[#allocation2 + $0x18] sm:$0xff] }
 0x161   : > { %v1116_v34 = vadd.f32 %v4147_v33, %v1077_v55  ;;  %v1007_v35 = vadd.f32 1.0, %v3551_v58  ;;  %v856_v17 = vmul.f32 %v4285_v29, %v824_v42  ;;  %v950_v49 = vmul.f32 0.7978846, %v918_v9  ;;  %v4390_v58 = vld [vmem:[%s5767_s4 + $0x4] ss:$0 sm:$0xff] }
 0x162   : > { %v1115_v7 = vadd.f32 %v4147_v33, %v1076_v6  ;;  %v1079_v5 = vmul.f32 %v4137_v24, %v1040_v23  ;;  %v885_v20 = vmul.f32 %v853_v62, %v4274_v22  ;;  %v823_v63 = vmul.f32 0.044715, %v4290_v36 }
 0x163   : > { %1203 = vst [vmem:[#allocation2 + $0xf9] sm:$0xff] %v1116_v34  ;;  %v1039_v52 = vmul.f32 %v1007_v35, %v4310_v57  ;;  %v4359_v8 = vmul.f32 0.5, %v4270_v10  ;;  %v888_v11 = vmul.f32 %v4285_v29, %v856_v17  ;;  %v826_v47 = vmul.f32 0.044715, %v4301_v28 }
 0x164   : > { %v3553_v26 = vpop.eup %3552  ;;  %1202 = vst [vmem:[#allocation2 + $0xf1] sm:$0xff] %v1115_v7  ;;  %v1118_v27 = vadd.f32 %v4147_v33, %v1079_v5  ;;  %3560 = vtanh.f32 %v950_v49  ;;  %v917_v57 = vadd.f32 %v885_v20, %v4274_v22  ;;  %v4366_v37 = vmul.f32 0.5, %v4274_v22  ;;  %v4405_v49 = vld [vmem:[%s5767_s4 + $0x5] ss:$0 sm:$0xff] }
 0x165   : > { %v1078_v25 = vmul.f32 %v4137_v24, %v1039_v52  ;;  %v1010_v19 = vadd.f32 1.0, %v3553_v26  ;;  %v920_v12 = vadd.f32 %v4285_v29, %v888_v11  ;;  %v855_v40 = vmul.f32 %v823_v63, %v4290_v36  ;;  %v1721_v52 = vld [vmem:[#allocation2 + $0x1a] sm:$0xff]  ;;  %v4413_v26 = vld [vmem:[%s5767_s4 + $0x7] ss:$0 sm:$0xff] }
 0x166   : > { %1205 = vst [vmem:[#allocation2 + $0x111] sm:$0xff] %v1118_v27  ;;  %v858_v10 = vmul.f32 %v4301_v28, %v826_v47  ;;  %v3555_v32 = vpop.eup %3554  ;;  %v949_v13 = vmul.f32 0.7978846, %v917_v57  ;;  %v825_v18 = vmul.f32 0.044715, %v4306_v14  ;;  %v4420_v27 = vld [vmem:[#allocation2 + $0x20] sm:$0xff] }
 0x167   : > { %v1117_v41 = vadd.f32 %v4147_v33, %v1078_v25  ;;  %v1042_v44 = vmul.f32 %v1010_v19, %v4318_v3  ;;  %v3557_v59 = vpop.eup %3556  ;;  %v1009_v45 = vadd.f32 1.0, %v3555_v32  ;;  %v952_v56 = vmul.f32 0.7978846, %v920_v12  ;;  %v4383_v3 = vld [vmem:[%s5767_s4 + $0x3] ss:$0 sm:$0xff] }
 0x168   : > { %v887_v22 = vmul.f32 %v855_v40, %v4290_v36  ;;  %v890_v48 = vmul.f32 %v4301_v28, %v858_v10  ;;  %v1012_v43 = vadd.f32 1.0, %v3557_v59  ;;  %3562 = vtanh.f32 %v949_v13  ;;  %v4429_v57 = vld [vmem:[%s5767_s4 + $0x6] ss:$0 sm:$0xff] }
 0x169   : > { %v3559_v38 = vpop.eup %3558  ;;  %1204 = vst [vmem:[#allocation2 + $0x109] sm:$0xff] %v1117_v41  ;;  %v1081_v21 = vmul.f32 %v4137_v24, %v1042_v44  ;;  %v857_v51 = vmul.f32 %v825_v18, %v4306_v14  ;;  %v1041_v55 = vmul.f32 %v1009_v45, %v4330_v30  ;;  %3564 = vtanh.f32 %v952_v56  ;;  %v4433_v41 = vld [vmem:[#allocation2 + $0x32] sm:$0xff]  ;;  %v4435_v44 = vld [vmem:[#allocation2 + $0x21] sm:$0xff] }
 0x16a   : > { %v1011_v60 = vadd.f32 1.0, %v3559_v38  ;;  %v919_v61 = vadd.f32 %v887_v22, %v4290_v36  ;;  %v1044_v23 = vmul.f32 %v1012_v43, %v788_v1  ;;  %v922_v42 = vadd.f32 %v4301_v28, %v890_v48  ;;  %v4448_v38 = vld [vmem:[#allocation2 + $0x38] sm:$0xff] }
 0x16b   : > { %v1120_v6 = vadd.f32 %v4147_v33, %v1081_v21  ;;  %v889_v34 = vmul.f32 %v857_v51, %v4306_v14  ;;  %v1080_v35 = vmul.f32 %v4137_v24, %v1041_v55  ;;  %v1556_v62 = vmul.f32 %v4383_v3, %v4378_v53  ;;  %v1319_v21 = vld [vmem:[#allocation2 + $0x19] sm:$0xff] }
 0x16c   : > { %v1043_v9 = vmul.f32 %v1011_v60, %v787_v31  ;;  %v951_v30 = vmul.f32 0.7978846, %v919_v61  ;;  %v1083_v7 = vmul.f32 %v4137_v24, %v1044_v23  ;;  %v954_v5 = vmul.f32 0.7978846, %v922_v42 }
 0x16d   : > { %1207 = vst [vmem:[#allocation2 + $0x129] sm:$0xff] %v1120_v6  ;;  %v921_v17 = vadd.f32 %v889_v34, %v4306_v14  ;;  %v1657_v1 = vmul.f32 %v4390_v58, %v4163_v54  ;;  %v1119_v31 = vadd.f32 %v4147_v33, %v1080_v35  ;;  %v1588_v63 = vadd.f32 %v1556_v62, %v4112_v46  ;;  %v4418_v54 = vld [vmem:[%s5767_s4 + $0x8] ss:$0 sm:$0xff]  ;;  %v4424_v46 = vld [vmem:[#allocation2 + $0x30] sm:$0xff] }
 0x16e   : > { %v1082_v20 = vmul.f32 %v4137_v24, %v1043_v9  ;;  %3566 = vtanh.f32 %v951_v30  ;;  %v3561_v11 = vpop.eup %3560  ;;  %v1122_v47 = vadd.f32 %v4147_v33, %v1083_v7  ;;  %v792_v25 = vmul.f32 0.5, %v4285_v29  ;;  %v4437_v29 = vld [vmem:[#allocation2 + $0x22] sm:$0xff] }
 0x16f   : > { %3568 = vtanh.f32 %v954_v5  ;;  %v953_v19 = vmul.f32 0.7978846, %v921_v17  ;;  %1206 = vst [vmem:[#allocation2 + $0x121] sm:$0xff] %v1119_v31  ;;  %v1014_v40 = vadd.f32 1.0, %v3561_v11  ;;  %v1689_v10 = vadd.f32 %v1657_v1, %v1588_v63 }
 0x170   : > { %v1121_v12 = vadd.f32 %v4147_v33, %v1082_v20  ;;  %v1758_v32 = vmul.f32 %v4405_v49, %v1721_v52  ;;  %1209 = vst [vmem:[#allocation2 + $0x141] sm:$0xff] %v1122_v47  ;;  %v791_v13 = vmul.f32 0.5, %v4290_v36  ;;  %v794_v18 = vmul.f32 0.5, %v4301_v28 }
 0x171   : > { %3570 = vtanh.f32 %v953_v19  ;;  %v1557_v59 = vmul.f32 %v4383_v3, %v4420_v27  ;;  %v1046_v45 = vmul.f32 %v1014_v40, %v4359_v8  ;;  %v1860_v22 = vmul.f32 %v4429_v57, %v4424_v46 }
 0x172   : > { %1208 = vst [vmem:[#allocation2 + $0x139] sm:$0xff] %v1121_v12  ;;  %v1790_v56 = vadd.f32 %v1758_v32, %v1689_v10  ;;  %v1961_v48 = vmul.f32 %v4413_v26, %v4182_v15  ;;  %v3563_v36 = vpop.eup %3562  ;;  %v2062_v28 = vmul.f32 %v4418_v54, %v4433_v41  ;;  %v1658_v51 = vmul.f32 %v4390_v58, %v4435_v44 }
 0x173   : > { %v1589_v43 = vadd.f32 %v1557_v59, %v4114_v50  ;;  %v1759_v8 = vmul.f32 %v4405_v49, %v4437_v29  ;;  %v3565_v55 = vpop.eup %3564  ;;  %v1085_v60 = vmul.f32 %v4137_v24, %v1046_v45  ;;  %v1013_v61 = vadd.f32 1.0, %v3563_v36  ;;  %v4462_v50 = vld [vmem:[#allocation2 + $0x3a] sm:$0xff] }
 0x174   : > { %v1892_v6 = vadd.f32 %v1860_v22, %v1790_v56  ;;  %v1255_v23 = vmul.f32 %v4095_v0, %v4378_v53  ;;  %v1016_v42 = vadd.f32 1.0, %v3565_v55  ;;  %v1861_v35 = vmul.f32 %v4429_v57, %v4448_v38 }
 0x175   : > { %v1690_v34 = vadd.f32 %v1658_v51, %v1589_v43  ;;  %v1356_v9 = vmul.f32 %v4100_v4, %v1319_v21  ;;  %v1124_v30 = vadd.f32 %v4147_v33, %v1085_v60  ;;  %v1045_v62 = vmul.f32 %v1013_v61, %v4366_v37  ;;  %v4481_v43 = vld [vmem:[#allocation2 + $0x48] sm:$0xff] }
 0x176   : > { %v1993_v7 = vadd.f32 %v1961_v48, %v1892_v6  ;;  %v1457_v5 = vmul.f32 %v4107_v16, %v1721_v52  ;;  %v1048_v17 = vmul.f32 %v1016_v42, %v792_v25  ;;  %v1558_v0 = vmul.f32 %v4383_v3, %v4424_v46 }
 0x177   : > { %v1791_v1 = vadd.f32 %v1759_v8, %v1690_v34  ;;  %v1388_v31 = vadd.f32 %v1356_v9, %v1255_v23  ;;  %1211 = vst [vmem:[#allocation2 + $0x159] sm:$0xff] %v1124_v30  ;;  %v1084_v20 = vmul.f32 %v4137_v24, %v1045_v62  ;;  %v1962_v4 = vmul.f32 %v4413_v26, %v4175_v2  ;;  %v4499_v62 = vld [vmem:[#allocation2 + $0x4a] sm:$0xff] }
 0x178   : > { %v3567_v53 = vpop.eup %3566  ;;  %v2094_v63 = vadd.f32 %v2062_v28, %v1993_v7  ;;  %v2063_v37 = vmul.f32 %v4418_v54, %v4462_v50  ;;  %v1087_v52 = vmul.f32 %v4137_v24, %v1048_v17  ;;  %v1659_v32 = vmul.f32 %v4390_v58, %v4182_v15  ;;  %v4504_v7 = vld [vmem:[%s5767_s4 + $0x1] ss:$0 sm:$0xff] }
 0x179   : > { %v3569_v11 = vpop.eup %3568  ;;  %v1015_v47 = vadd.f32 1.0, %v3567_v53  ;;  %v1893_v25 = vadd.f32 %v1861_v35, %v1791_v1  ;;  %v1489_v19 = vadd.f32 %v1457_v5, %v1388_v31  ;;  %v1123_v12 = vadd.f32 %v4147_v33, %v1084_v20 }
 0x17a   : > { %v1018_v40 = vadd.f32 1.0, %v3569_v11  ;;  %v2158_v10 = vmul.f32 0.044715, %v2094_v63  ;;  %v1126_v45 = vadd.f32 %v4147_v33, %v1087_v52  ;;  %v793_v21 = vmul.f32 0.5, %v4306_v14  ;;  %v4490_v14 = vld [vmem:[%s5767_s4] ss:$0 sm:$0xff] }
 0x17b   : > { %v3571_v59 = vpop.eup %3570  ;;  %v1047_v2 = vmul.f32 %v1015_v47, %v791_v13  ;;  %v1994_v56 = vadd.f32 %v1962_v4, %v1893_v25  ;;  %v1590_v22 = vadd.f32 %v1558_v0, %v1489_v19  ;;  %1210 = vst [vmem:[#allocation2 + $0x151] sm:$0xff] %v1123_v12  ;;  %v1760_v15 = vmul.f32 %v4405_v49, %v4433_v41  ;;  %v1321_v4 = vld [vmem:[#allocation2 + $0x31] sm:$0xff]  ;;  %v1623_v52 = vld [vmem:[#allocation2 + $0x39] sm:$0xff] }
 0x17c   : > { %v1050_v48 = vmul.f32 %v1018_v40, %v794_v18  ;;  %v1017_v36 = vadd.f32 1.0, %v3571_v59  ;;  %v2190_v28 = vmul.f32 %v2158_v10, %v2094_v63  ;;  %1213 = vst [vmem:[#allocation2 + $0x171] sm:$0xff] %v1126_v45  ;;  %v1256_v18 = vmul.f32 %v4490_v14, %v4420_v27  ;;  %v4523_v25 = vld [vmem:[#allocation2 + $0x50] sm:$0xff]  ;;  %v4538_v45 = vld [vmem:[%s5767_s4 + $0x2] ss:$0 sm:$0xff] }
 0x17d   : > { %v1086_v51 = vmul.f32 %v4137_v24, %v1047_v2  ;;  %v2095_v8 = vadd.f32 %v2063_v37, %v1994_v56  ;;  %v1691_v55 = vadd.f32 %v1659_v32, %v1590_v22  ;;  %v1862_v34 = vmul.f32 %v4429_v57, %v4481_v43  ;;  %v4525_v19 = vld [vmem:[#allocation2 + $0x51] sm:$0xff]  ;;  %v1624_v56 = vld [vmem:[#allocation2 + $0x49] sm:$0xff] }
 0x17e   : > { %v1089_v13 = vmul.f32 %v4137_v24, %v1050_v48  ;;  %v1049_v60 = vmul.f32 %v1017_v36, %v793_v21  ;;  %v2222_v61 = vmul.f32 %v2190_v28, %v2094_v63  ;;  %v1357_v27 = vmul.f32 %v4504_v7, %v4435_v44  ;;  %v4527_v12 = vld [vmem:[#allocation2 + $0x52] sm:$0xff] }
 0x17f   : > { %v1125_v6 = vadd.f32 %v4147_v33, %v1086_v51  ;;  %v2159_v23 = vmul.f32 0.044715, %v2095_v8  ;;  %v1792_v42 = vadd.f32 %v1760_v15, %v1691_v55  ;;  %v1963_v1 = vmul.f32 %v4413_v26, %v4203_v39  ;;  %v4551_v55 = vld [vmem:[#allocation2 + $0x60] sm:$0xff] }
 0x180   : > { %v1128_v35 = vadd.f32 %v4147_v33, %v1089_v13  ;;  %v1088_v9 = vmul.f32 %v4137_v24, %v1049_v60  ;;  %v2254_v30 = vadd.f32 %v2222_v61, %v2094_v63  ;;  %v1458_v24 = vmul.f32 %v4107_v16, %v4437_v29 }
 0x181   : > { %1212 = vst [vmem:[#allocation2 + $0x169] sm:$0xff] %v1125_v6  ;;  %v2191_v5 = vmul.f32 %v2159_v23, %v2095_v8  ;;  %v1894_v17 = vadd.f32 %v1862_v34, %v1792_v42  ;;  %v1389_v53 = vadd.f32 %v1357_v27, %v1256_v18  ;;  %v1559_v20 = vmul.f32 %v4383_v3, %v4448_v38  ;;  %v4559_v6 = vld [vmem:[#allocation2 + $0x62] sm:$0xff] }
 0x182   : > { %1215 = vst [vmem:[#allocation2 + $0x189] sm:$0xff] %v1128_v35  ;;  %v1127_v31 = vadd.f32 %v4147_v33, %v1088_v9  ;;  %v2286_v0 = vmul.f32 0.7978846, %v2254_v30  ;;  %v2064_v11 = vmul.f32 %v4418_v54, %v4499_v62  ;;  %v4517_v39 = vmul.f32 0.5, %v2094_v63 }
 0x183   : > { %v2223_v37 = vmul.f32 %v2191_v5, %v2095_v8  ;;  %v1995_v44 = vadd.f32 %v1963_v1, %v1894_v17  ;;  %v4519_v16 = vmul.f32 0.5, %v2095_v8  ;;  %v1490_v29 = vadd.f32 %v1458_v24, %v1389_v53 }
 0x184   : > { %1214 = vst [vmem:[#allocation2 + $0x181] sm:$0xff] %v1127_v31  ;;  %3572 = vtanh.f32 %v2286_v0  ;;  %v1257_v40 = vmul.f32 %v4490_v14, %v4424_v46  ;;  %v1358_v10 = vmul.f32 %v4504_v7, %v1321_v4  ;;  %v1660_v32 = vmul.f32 %v4390_v58, %v1623_v52 }
 0x185   : > { %v2255_v33 = vadd.f32 %v2223_v37, %v2095_v8  ;;  %v4521_v47 = vadd.f32 %v2064_v11, %v1995_v44  ;;  %v1591_v63 = vadd.f32 %v1559_v20, %v1490_v29  ;;  %v1761_v59 = vmul.f32 %v4405_v49, %v4462_v50  ;;  %v4581_v29 = vld [vmem:[#allocation2 + $0x68] sm:$0xff] }
 0x186   : > { %v1459_v2 = vmul.f32 %v4538_v45, %v4433_v41  ;;  %v1390_v48 = vadd.f32 %v1358_v10, %v1257_v40  ;;  %v1560_v21 = vmul.f32 %v4383_v3, %v4481_v43  ;;  %v1863_v28 = vmul.f32 %v4429_v57, %v4523_v25  ;;  %v4553_v41 = vld [vmem:[#allocation2 + $0x61] sm:$0xff] }
 0x187   : > { %v2287_v22 = vmul.f32 0.7978846, %v2255_v33  ;;  %v2160_v46 = vmul.f32 0.044715, %v4521_v47  ;;  %v1692_v36 = vadd.f32 %v1660_v32, %v1591_v63  ;;  %v1964_v51 = vmul.f32 %v4413_v26, %v4525_v19  ;;  %v4585_v63 = vld [vmem:[#allocation2 + $0x69] sm:$0xff] }
 0x188   : > { %v2065_v8 = vmul.f32 %v4418_v54, %v4527_v12  ;;  %v1491_v13 = vadd.f32 %v1459_v2, %v1390_v48  ;;  %v1661_v60 = vmul.f32 %v4390_v58, %v1624_v56  ;;  %v1762_v18 = vmul.f32 %v4405_v49, %v4499_v62  ;;  %v4587_v32 = vld [vmem:[#allocation2 + $0x6a] sm:$0xff] }
 0x189   : > { %3574 = vtanh.f32 %v2287_v22  ;;  %v2192_v15 = vmul.f32 %v2160_v46, %v4521_v47  ;;  %v1793_v61 = vadd.f32 %v1761_v59, %v1692_v36  ;;  %v1258_v23 = vmul.f32 %v4490_v14, %v4448_v38 }
 0x18a   : > { %v1359_v42 = vmul.f32 %v4504_v7, %v1623_v52  ;;  %v1592_v35 = vadd.f32 %v1560_v21, %v1491_v13  ;;  %v1864_v9 = vmul.f32 %v4429_v57, %v4551_v55  ;;  %v1965_v30 = vmul.f32 %v4413_v26, %v4553_v41 }
 0x18b   : > { %v2224_v34 = vmul.f32 %v2192_v15, %v4521_v47  ;;  %v1895_v27 = vadd.f32 %v1863_v28, %v1793_v61  ;;  %v1460_v17 = vmul.f32 %v4538_v45, %v4462_v50  ;;  %v1561_v1 = vmul.f32 %v4383_v3, %v4523_v25 }
 0x18c   : > { %v1391_v5 = vadd.f32 %v1359_v42, %v1258_v23  ;;  %v1693_v24 = vadd.f32 %v1661_v60, %v1592_v35  ;;  %v2066_v31 = vmul.f32 %v4418_v54, %v4559_v6  ;;  %v1662_v0 = vmul.f32 %v4390_v58, %v4525_v19 }
 0x18d   : > { %v2256_v38 = vadd.f32 %v2224_v34, %v4521_v47  ;;  %v1996_v20 = vadd.f32 %v1964_v51, %v1895_v27  ;;  %v1259_v37 = vmul.f32 %v4490_v14, %v4481_v43  ;;  %v1360_v50 = vmul.f32 %v4504_v7, %v1624_v56 }
 0x18e   : > { %v3573_v53 = vpop.eup %3572  ;;  %v1492_v4 = vadd.f32 %v1460_v17, %v1391_v5  ;;  %v1794_v52 = vadd.f32 %v1762_v18, %v1693_v24  ;;  %v1461_v33 = vmul.f32 %v4538_v45, %v4499_v62  ;;  %v1562_v43 = vmul.f32 %v4383_v3, %v4551_v55  ;;  %v4602_v18 = vld [vmem:[#allocation2 + $0x78] sm:$0xff] }
 0x18f   : > { %v2350_v44 = vadd.f32 1.0, %v3573_v53  ;;  %v2288_v11 = vmul.f32 0.7978846, %v2256_v38  ;;  %v2097_v40 = vadd.f32 %v2065_v8, %v1996_v20  ;;  %v1392_v59 = vadd.f32 %v1360_v50, %v1259_v37  ;;  %v4613_v38 = vld [vmem:[#allocation2 + $0x79] sm:$0xff] }
 0x190   : > { %v1593_v10 = vadd.f32 %v1561_v1, %v1492_v4  ;;  %v1896_v56 = vadd.f32 %v1864_v9, %v1794_v52  ;;  %v1763_v22 = vmul.f32 %v4405_v49, %v4527_v12  ;;  %v1865_v62 = vmul.f32 %v4429_v57, %v4581_v29 }
 0x191   : > { %v2382_v2 = vmul.f32 %v2350_v44, %v4517_v39  ;;  %3576 = vtanh.f32 %v2288_v11  ;;  %v2161_v46 = vmul.f32 0.044715, %v2097_v40  ;;  %v1493_v21 = vadd.f32 %v1461_v33, %v1392_v59 }
 0x192   : > { %v1694_v48 = vadd.f32 %v1662_v0, %v1593_v10  ;;  %v1997_v28 = vadd.f32 %v1965_v30, %v1896_v56  ;;  %v1966_v51 = vmul.f32 %v4413_v26, %v4585_v63  ;;  %v2067_v39 = vmul.f32 %v4418_v54, %v4587_v32 }
 0x193   : > { %v3575_v36 = vpop.eup %3574  ;;  %3324 = vmatprep.mubr.f32.mxu0 %v2382_v2  ;;  %v1663_v8 = vmul.f32 %v4390_v58, %v4553_v41  ;;  %v2193_v13 = vmul.f32 %v2161_v46, %v2097_v40  ;;  %v1594_v61 = vadd.f32 %v1562_v43, %v1493_v21  ;;  %v1764_v42 = vmul.f32 %v4405_v49, %v4559_v6 }
 0x194   : > { %v2351_v15 = vadd.f32 1.0, %v3575_v36  ;;  %v1795_v60 = vadd.f32 %v1763_v22, %v1694_v48  ;;  %v2098_v23 = vadd.f32 %v2066_v31, %v1997_v28  ;;  %v1260_v34 = vmul.f32 %v4490_v14, %v4523_v25  ;;  %v4632_v22 = vld [vmem:[#allocation2 + $0x80] sm:$0xff] }
 0x195   : > { %v1361_v35 = vmul.f32 %v4504_v7, %v4525_v19  ;;  %v2225_v30 = vmul.f32 %v2193_v13, %v2097_v40  ;;  %v1695_v5 = vadd.f32 %v1663_v8, %v1594_v61  ;;  %v1866_v1 = vmul.f32 %v4429_v57, %v4602_v18  ;;  %v4617_v19 = vld [vmem:[#allocation2 + $0x7a] sm:$0xff] }
 0x196   : > { %v2383_v9 = vmul.f32 %v2351_v15, %v4519_v16  ;;  %v1897_v27 = vadd.f32 %v1865_v62, %v1795_v60  ;;  %v2162_v17 = vmul.f32 0.044715, %v2098_v23  ;;  %v1462_v31 = vmul.f32 %v4538_v45, %v4527_v12 }
 0x197   : > { %v1393_v24 = vadd.f32 %v1361_v35, %v1260_v34  ;;  %v2257_v25 = vadd.f32 %v2225_v30, %v2097_v40  ;;  %v1796_v53 = vadd.f32 %v1764_v42, %v1695_v5  ;;  %v1563_v16 = vmul.f32 %v4383_v3, %v4581_v29  ;;  %v4646_v42 = vld [vmem:[#allocation2 + $0x82] sm:$0xff] }
 0x198   : > { %3325 = vmatmul.mubr.f32.vlgmr.msra.gmra.mrb[32].mxu0 %v2383_v9  ;;  %v1998_v0 = vadd.f32 %v1966_v51, %v1897_v27  ;;  %v2128_v20 = vmul.f32 0.5, %v4521_v47  ;;  %v4622_v4 = vmul.f32 0.5, %v2097_v40  ;;  %v2194_v37 = vmul.f32 %v2162_v17, %v2098_v23 }
 0x199   : > { %v1494_v50 = vadd.f32 %v1462_v31, %v1393_v24  ;;  %v2289_v44 = vmul.f32 0.7978846, %v2257_v25  ;;  %v1898_v52 = vadd.f32 %v1866_v1, %v1796_v53  ;;  %v1967_v12 = vmul.f32 %v4413_v26, %v4613_v38  ;;  %v4659_v24 = vld [vmem:[#allocation2 + $0x90] sm:$0xff] }
 0x19a   : > { %v2099_v11 = vadd.f32 %v2067_v39, %v1998_v0  ;;  %v2226_v10 = vmul.f32 %v2194_v37, %v2098_v23  ;;  %v2068_v59 = vmul.f32 %v4418_v54, %v4617_v19  ;;  %v1664_v2 = vmul.f32 %v4390_v58, %v4585_v63  ;;  %v4638_v39 = vld [vmem:[#allocation2 + $0x81] sm:$0xff]  ;;  %v4668_v37 = vld [vmem:[#allocation2 + $0x91] sm:$0xff] }
 0x19b   : > { %v3577_v33 = vpop.eup %3576  ;;  %v1595_v43 = vadd.f32 %v1563_v16, %v1494_v50  ;;  %3578 = vtanh.f32 %v2289_v44  ;;  %v1765_v56 = vmul.f32 %v4405_v49, %v4587_v32  ;;  %v1999_v48 = vadd.f32 %v1967_v12, %v1898_v52  ;;  %v4675_v12 = vld [vmem:[#allocation2 + $0x92] sm:$0xff] }
 0x19c   : > { %v2352_v47 = vadd.f32 1.0, %v3577_v33  ;;  %v2163_v40 = vmul.f32 0.044715, %v2099_v11  ;;  %v2258_v46 = vadd.f32 %v2226_v10, %v2098_v23  ;;  %v1261_v21 = vmul.f32 %v4490_v14, %v4551_v55 }
 0x19d   : > { %v1696_v62 = vadd.f32 %v1664_v2, %v1595_v43  ;;  %v4636_v28 = vmul.f32 0.5, %v2098_v23  ;;  %v1362_v8 = vmul.f32 %v4504_v7, %v4553_v41  ;;  %v4642_v13 = vadd.f32 %v2068_v59, %v1999_v48 }
 0x19e   : > { %v2384_v36 = vmul.f32 %v2352_v47, %v2128_v20  ;;  %v2195_v51 = vmul.f32 %v2163_v40, %v2099_v11  ;;  %v2290_v15 = vmul.f32 0.7978846, %v2258_v46  ;;  %v1867_v61 = vmul.f32 %v4429_v57, %v4632_v22 }
 0x19f   : > { %v1797_v60 = vadd.f32 %v1765_v56, %v1696_v62  ;;  %v1394_v34 = vadd.f32 %v1362_v8, %v1261_v21  ;;  %v1463_v23 = vmul.f32 %v4538_v45, %v4559_v6  ;;  %v1564_v35 = vmul.f32 %v4383_v3, %v4602_v18 }
 0x1a0   : > { %3327 = vmatprep.mubr.f32.mxu0 %v2384_v36  ;;  %v2227_v55 = vmul.f32 %v2195_v51, %v2099_v11  ;;  %3580 = vtanh.f32 %v2290_v15  ;;  %v2164_v41 = vmul.f32 0.044715, %v4642_v13  ;;  %v1968_v30 = vmul.f32 %v4413_v26, %v4638_v39 }
 0x1a1   : > { %v1899_v9 = vadd.f32 %v1867_v61, %v1797_v60  ;;  %v4655_v27 = vmul.f32 0.5, %v2099_v11  ;;  %v2069_v17 = vmul.f32 %v4418_v54, %v4646_v42  ;;  %v1495_v1 = vadd.f32 %v1463_v23, %v1394_v34  ;;  %v4691_v60 = vld [vmem:[#allocation2 + $0x98] sm:$0xff] }
 0x1a2   : > { %v2259_v5 = vadd.f32 %v2227_v55, %v2099_v11  ;;  %v2196_v6 = vmul.f32 %v2164_v41, %v4642_v13  ;;  %v1665_v25 = vmul.f32 %v4390_v58, %v4613_v38  ;;  %v1262_v0 = vmul.f32 %v4490_v14, %v4581_v29 }
 0x1a3   : > { %v2000_v31 = vadd.f32 %v1968_v30, %v1899_v9  ;;  %v1596_v16 = vadd.f32 %v1564_v35, %v1495_v1  ;;  %v1766_v20 = vmul.f32 %v4405_v49, %v4617_v19  ;;  %v1363_v50 = vmul.f32 %v4504_v7, %v4585_v63 }
 0x1a4   : > { %v2291_v53 = vmul.f32 0.7978846, %v2259_v5  ;;  %v2228_v44 = vmul.f32 %v2196_v6, %v4642_v13  ;;  %v1868_v52 = vmul.f32 %v4429_v57, %v4659_v24  ;;  %v1464_v29 = vmul.f32 %v4538_v45, %v4587_v32  ;;  %v4701_v5 = vld [vmem:[#allocation2 + $0x99] sm:$0xff] }
 0x1a5   : > { %v2101_v11 = vadd.f32 %v2069_v17, %v2000_v31  ;;  %v3579_v33 = vpop.eup %3578  ;;  %v1697_v10 = vadd.f32 %v1665_v25, %v1596_v16  ;;  %v1395_v59 = vadd.f32 %v1363_v50, %v1262_v0  ;;  %v1565_v43 = vmul.f32 %v4383_v3, %v4632_v22  ;;  %v4703_v17 = vld [vmem:[#allocation2 + $0x9a] sm:$0xff] }
 0x1a6   : > { %3582 = vtanh.f32 %v2291_v53  ;;  %v2353_v2 = vadd.f32 1.0, %v3579_v33  ;;  %v2260_v63 = vadd.f32 %v2228_v44, %v4642_v13  ;;  %v1969_v40 = vmul.f32 %v4413_v26, %v4668_v37  ;;  %v4715_v44 = vld [vmem:[#allocation2 + $0xa8] sm:$0xff] }
 0x1a7   : > { %v2165_v47 = vmul.f32 0.044715, %v2101_v11  ;;  %v1798_v56 = vadd.f32 %v1766_v20, %v1697_v10  ;;  %v2070_v46 = vmul.f32 %v4418_v54, %v4675_v12  ;;  %v1496_v48 = vadd.f32 %v1464_v29, %v1395_v59 }
 0x1a8   : > { %v1666_v32 = vmul.f32 %v4390_v58, %v4638_v39  ;;  %v2385_v62 = vmul.f32 %v2353_v2, %v4622_v4  ;;  %v2292_v21 = vmul.f32 0.7978846, %v2260_v63  ;;  %v1767_v51 = vmul.f32 %v4405_v49, %v4646_v42 }
 0x1a9   : > { %v2197_v36 = vmul.f32 %v2165_v47, %v2101_v11  ;;  %v1900_v8 = vadd.f32 %v1868_v52, %v1798_v56  ;;  %v1597_v15 = vadd.f32 %v1565_v43, %v1496_v48  ;;  %v1263_v61 = vmul.f32 %v4490_v14, %v4602_v18  ;;  %v4723_v43 = vld [vmem:[#allocation2 + $0xa9] sm:$0xff] }
 0x1aa   : > { %v1364_v55 = vmul.f32 %v4504_v7, %v4613_v38  ;;  %v3581_v34 = vpop.eup %3580  ;;  %3328 = vmatmul.mubr.f32.gmra.mrb[34].mxu0 %v2385_v62  ;;  %3584 = vtanh.f32 %v2292_v21  ;;  %v1465_v4 = vmul.f32 %v4538_v45, %v4617_v19  ;;  %v1566_v35 = vmul.f32 %v4383_v3, %v4659_v24  ;;  %v4729_v56 = vld [vmem:[#allocation2 + $0xaa] sm:$0xff] }
 0x1ab   : > { %v2229_v23 = vmul.f32 %v2197_v36, %v2101_v11  ;;  %v2354_v41 = vadd.f32 1.0, %v3581_v34  ;;  %v2001_v9 = vadd.f32 %v1969_v40, %v1900_v8  ;;  %v1698_v30 = vadd.f32 %v1666_v32, %v1597_v15 }
 0x1ac   : > { %v1396_v18 = vadd.f32 %v1364_v55, %v1263_v61  ;;  %v2132_v38 = vmul.f32 0.5, %v4642_v13  ;;  %v4706_v1 = vmul.f32 0.5, %v2101_v11  ;;  %v1869_v31 = vmul.f32 %v4429_v57, %v4691_v60 }
 0x1ad   : > { %v2261_v6 = vadd.f32 %v2229_v23, %v2101_v11  ;;  %v2386_v19 = vmul.f32 %v2354_v41, %v4636_v28  ;;  %v2102_v25 = vadd.f32 %v2070_v46, %v2001_v9  ;;  %v1799_v0 = vadd.f32 %v1767_v51, %v1698_v30  ;;  %v4748_v30 = vld [vmem:[#allocation2 + $0xb0] sm:$0xff] }
 0x1ae   : > { %v1497_v53 = vadd.f32 %v1465_v4, %v1396_v18  ;;  %v1970_v20 = vmul.f32 %v4413_v26, %v4701_v5  ;;  %v2071_v50 = vmul.f32 %v4418_v54, %v4703_v17  ;;  %v1264_v13 = vmul.f32 %v4490_v14, %v4632_v22  ;;  %v4750_v18 = vld [vmem:[#allocation2 + $0xb1] sm:$0xff] }
 0x1af   : > { %v2293_v16 = vmul.f32 0.7978846, %v2261_v6  ;;  %3330 = vmatprep.mubr.f32.mxu1 %v2386_v19  ;;  %v2166_v52 = vmul.f32 0.044715, %v2102_v25  ;;  %v1901_v29 = vadd.f32 %v1869_v31, %v1799_v0  ;;  %v1667_v33 = vmul.f32 %v4390_v58, %v4668_v37 }
 0x1b0   : > { %v3583_v11 = vpop.eup %3582  ;;  %v1598_v28 = vadd.f32 %v1566_v35, %v1497_v53  ;;  %v1768_v59 = vmul.f32 %v4405_v49, %v4675_v12  ;;  %v1365_v2 = vmul.f32 %v4504_v7, %v4638_v39  ;;  %v1870_v40 = vmul.f32 %v4429_v57, %v4715_v44 }
 0x1b1   : > { %v2355_v10 = vadd.f32 1.0, %v3583_v11  ;;  %3586 = vtanh.f32 %v2293_v16  ;;  %v2198_v63 = vmul.f32 %v2166_v52, %v2102_v25  ;;  %v2002_v22 = vadd.f32 %v1970_v20, %v1901_v29 }
 0x1b2   : > { %v1699_v47 = vadd.f32 %v1667_v33, %v1598_v28  ;;  %v1397_v48 = vadd.f32 %v1365_v2, %v1264_v13  ;;  %v1466_v32 = vmul.f32 %v4538_v45, %v4646_v42  ;;  %v1567_v62 = vmul.f32 %v4383_v3, %v4691_v60  ;;  %v4768_v2 = vld [vmem:[#allocation2 + $0xc0] sm:$0xff] }
 0x1b3   : > { %v2387_v46 = vmul.f32 %v2355_v10, %v4655_v27  ;;  %v2230_v21 = vmul.f32 %v2198_v63, %v2102_v25  ;;  %v2103_v36 = vadd.f32 %v2071_v50, %v2002_v22  ;;  %v1971_v51 = vmul.f32 %v4413_v26, %v4723_v43 }
 0x1b4   : > { %v1800_v39 = vadd.f32 %v1768_v59, %v1699_v47  ;;  %v3585_v8 = vpop.eup %3584  ;;  %v4738_v15 = vmul.f32 0.5, %v2102_v25  ;;  %v2072_v27 = vmul.f32 %v4418_v54, %v4729_v56  ;;  %v1498_v61 = vadd.f32 %v1466_v32, %v1397_v48 }
 0x1b5   : > { %3331 = vmatmul.mubr.f32.vlgmr.msra.gmra.mrb[0].mxu1 %v2387_v46  ;;  %v1265_v42 = vmul.f32 %v4490_v14, %v4659_v24  ;;  %v2356_v55 = vadd.f32 1.0, %v3585_v8  ;;  %v2262_v34 = vadd.f32 %v2230_v21, %v2102_v25  ;;  %v2167_v23 = vmul.f32 0.044715, %v2103_v36  ;;  %v4754_v25 = vld [vmem:[#allocation2 + $0xb2] sm:$0xff]  ;;  %v4777_v21 = vld [vmem:[#allocation2 + $0xc1] sm:$0xff] }
 0x1b6   : > { %v1668_v4 = vmul.f32 %v4390_v58, %v4701_v5  ;;  %v1902_v35 = vadd.f32 %v1870_v40, %v1800_v39  ;;  %v1599_v41 = vadd.f32 %v1567_v62, %v1498_v61  ;;  %v1769_v9 = vmul.f32 %v4405_v49, %v4703_v17 }
 0x1b7   : > { %v1366_v6 = vmul.f32 %v4504_v7, %v4668_v37  ;;  %v2388_v31 = vmul.f32 %v2356_v55, %v2132_v38  ;;  %v2294_v24 = vmul.f32 0.7978846, %v2262_v34  ;;  %v2199_v19 = vmul.f32 %v2167_v23, %v2103_v36 }
 0x1b8   : > { %v1467_v0 = vmul.f32 %v4538_v45, %v4675_v12  ;;  %v2003_v53 = vadd.f32 %v1971_v51, %v1902_v35  ;;  %v1700_v16 = vadd.f32 %v1668_v4, %v1599_v41  ;;  %v1568_v50 = vmul.f32 %v4383_v3, %v4715_v44  ;;  %v4791_v4 = vld [vmem:[#allocation2 + $0xc8] sm:$0xff] }
 0x1b9   : > { %v1398_v20 = vadd.f32 %v1366_v6, %v1265_v42  ;;  %3333 = vmatprep.mubr.f32.mxu1 %v2388_v31  ;;  %3588 = vtanh.f32 %v2294_v24  ;;  %v2231_v13 = vmul.f32 %v2199_v19, %v2103_v36  ;;  %v1871_v37 = vmul.f32 %v4429_v57, %v4748_v30 }
 0x1ba   : > { %v1972_v38 = vmul.f32 %v4413_v26, %v4750_v18  ;;  %v2104_v52 = vadd.f32 %v2072_v27, %v2003_v53  ;;  %v1801_v29 = vadd.f32 %v1769_v9, %v1700_v16  ;;  %v2073_v12 = vmul.f32 %v4418_v54, %v4754_v25  ;;  %v4783_v27 = vld [vmem:[#allocation2 + $0xc2] sm:$0xff] }
 0x1bb   : > { %v3587_v11 = vpop.eup %3586  ;;  %v1499_v28 = vadd.f32 %v1467_v0, %v1398_v20  ;;  %v4766_v10 = vmul.f32 0.5, %v2103_v36  ;;  %v2263_v59 = vadd.f32 %v2231_v13, %v2103_v36  ;;  %v1266_v63 = vmul.f32 %v4490_v14, %v4691_v60 }
 0x1bc   : > { %v2357_v33 = vadd.f32 1.0, %v3587_v11  ;;  %v2168_v22 = vmul.f32 0.044715, %v2104_v52  ;;  %v1903_v47 = vadd.f32 %v1871_v37, %v1801_v29  ;;  %v1669_v46 = vmul.f32 %v4390_v58, %v4723_v43  ;;  %v4807_v11 = vld [vmem:[#allocation2 + $0xc9] sm:$0xff] }
 0x1bd   : > { %v1600_v40 = vadd.f32 %v1568_v50, %v1499_v28  ;;  %v2295_v32 = vmul.f32 0.7978846, %v2263_v59  ;;  %v1770_v62 = vmul.f32 %v4405_v49, %v4729_v56  ;;  %v1367_v36 = vmul.f32 %v4504_v7, %v4701_v5 }
 0x1be   : > { %v2389_v48 = vmul.f32 %v2357_v33, %v4706_v1  ;;  %v2200_v39 = vmul.f32 %v2168_v22, %v2104_v52  ;;  %v2004_v51 = vadd.f32 %v1972_v38, %v1903_v47  ;;  %v1872_v8 = vmul.f32 %v4429_v57, %v4768_v2 }
 0x1bf   : > { %v1701_v60 = vadd.f32 %v1669_v46, %v1600_v40  ;;  %3590 = vtanh.f32 %v2295_v32  ;;  %v1399_v1 = vadd.f32 %v1367_v36, %v1266_v63  ;;  %v1468_v61 = vmul.f32 %v4538_v45, %v4703_v17 }
 0x1c0   : > { %3334 = vmatmul.mubr.f32.gmra.mrb[2].mxu1 %v2389_v48  ;;  %v1569_v42 = vmul.f32 %v4383_v3, %v4748_v30  ;;  %v2232_v55 = vmul.f32 %v2200_v39, %v2104_v52  ;;  %v2105_v34 = vadd.f32 %v2073_v12, %v2004_v51  ;;  %v1973_v23 = vmul.f32 %v4413_v26, %v4777_v21 }
 0x1c1   : > { %v1802_v5 = vadd.f32 %v1770_v62, %v1701_v60  ;;  %v4793_v35 = vmul.f32 0.5, %v2104_v52  ;;  %v2074_v41 = vmul.f32 %v4418_v54, %v4783_v27  ;;  %v1500_v9 = vadd.f32 %v1468_v61, %v1399_v1 }
 0x1c2   : > { %v1267_v17 = vmul.f32 %v4490_v14, %v4715_v44  ;;  %v2264_v6 = vadd.f32 %v2232_v55, %v2104_v52  ;;  %v2169_v31 = vmul.f32 0.044715, %v2105_v34  ;;  %v1670_v19 = vmul.f32 %v4390_v58, %v4750_v18  ;;  %v4809_v52 = vld [vmem:[#allocation2 + $0xca] sm:$0xff] }
 0x1c3   : > { %v1904_v24 = vadd.f32 %v1872_v8, %v1802_v5  ;;  %v3589_v0 = vpop.eup %3588  ;;  %v1601_v53 = vadd.f32 %v1569_v42, %v1500_v9  ;;  %v1771_v16 = vmul.f32 %v4405_v49, %v4754_v25  ;;  %v1873_v20 = vmul.f32 %v4429_v57, %v4791_v4  ;;  %v4832_v42 = vld [vmem:[#allocation2 + $0xd8] sm:$0xff] }
 0x1c4   : > { %v1368_v50 = vmul.f32 %v4504_v7, %v4723_v43  ;;  %v2358_v13 = vadd.f32 1.0, %v3589_v0  ;;  %v2296_v37 = vmul.f32 0.7978846, %v2264_v6  ;;  %v2201_v44 = vmul.f32 %v2169_v31, %v2105_v34  ;;  %v4838_v9 = vld [vmem:[#allocation2 + $0xda] sm:$0xff] }
 0x1c5   : > { %v2005_v38 = vadd.f32 %v1973_v23, %v1904_v24  ;;  %v1702_v29 = vadd.f32 %v1670_v19, %v1601_v53  ;;  %v1469_v28 = vmul.f32 %v4538_v45, %v4729_v56  ;;  %v1570_v33 = vmul.f32 %v4383_v3, %v4768_v2  ;;  %v4850_v53 = vld [vmem:[#allocation2 + $0xe0] sm:$0xff] }
 0x1c6   : > { %v1400_v12 = vadd.f32 %v1368_v50, %v1267_v17  ;;  %v2390_v59 = vmul.f32 %v2358_v13, %v4738_v15  ;;  %3592 = vtanh.f32 %v2296_v37  ;;  %v2233_v43 = vmul.f32 %v2201_v44, %v2105_v34 }
 0x1c7   : > { %v4816_v63 = vadd.f32 %v2074_v41, %v2005_v38  ;;  %v1803_v22 = vadd.f32 %v1771_v16, %v1702_v29  ;;  %v1974_v47 = vmul.f32 %v4413_v26, %v4807_v11  ;;  %v2075_v40 = vmul.f32 %v4418_v54, %v4809_v52  ;;  %v4836_v41 = vld [vmem:[#allocation2 + $0xd9] sm:$0xff] }
 0x1c8   : > { %v1501_v46 = vadd.f32 %v1469_v28, %v1400_v12  ;;  %3336 = vmatprep.mubr.f32.mxu1 %v2390_v59  ;;  %v2265_v48 = vadd.f32 %v2233_v43, %v2105_v34  ;;  %v1671_v32 = vmul.f32 %v4390_v58, %v4777_v21  ;;  %v1772_v15 = vmul.f32 %v4405_v49, %v4783_v27 }
 0x1c9   : > { %v2170_v56 = vmul.f32 0.044715, %v4816_v63  ;;  %v3591_v62 = vpop.eup %3590  ;;  %v1905_v36 = vadd.f32 %v1873_v20, %v1803_v22  ;;  %v1268_v51 = vmul.f32 %v4490_v14, %v4748_v30  ;;  %v1369_v60 = vmul.f32 %v4504_v7, %v4750_v18  ;;  %v4869_v22 = vld [vmem:[#allocation2 + $0xe1] sm:$0xff] }
 0x1ca   : > { %v1602_v39 = vadd.f32 %v1570_v33, %v1501_v46  ;;  %v2359_v8 = vadd.f32 1.0, %v3591_v62  ;;  %v2297_v1 = vmul.f32 0.7978846, %v2265_v48  ;;  %v1470_v55 = vmul.f32 %v4538_v45, %v4754_v25 }
 0x1cb   : > { %v2202_v61 = vmul.f32 %v2170_v56, %v4816_v63  ;;  %v2006_v5 = vadd.f32 %v1974_v47, %v1905_v36  ;;  %v1401_v17 = vadd.f32 %v1369_v60, %v1268_v51  ;;  %v1571_v30 = vmul.f32 %v4383_v3, %v4791_v4  ;;  %v4871_v47 = vld [vmem:[#allocation2 + $0xe2] sm:$0xff] }
 0x1cc   : > { %v1703_v23 = vadd.f32 %v1671_v32, %v1602_v39  ;;  %v2391_v18 = vmul.f32 %v2359_v8, %v4766_v10  ;;  %v4843_v6 = vmul.f32 0.5, %v2105_v34  ;;  %3594 = vtanh.f32 %v2297_v1  ;;  %v4896_v51 = vld [vmem:[%s5767_s4 + $0x4] ss:$0 sm:$0xff] }
 0x1cd   : > { %v2234_v31 = vmul.f32 %v2202_v61, %v4816_v63  ;;  %v4846_v24 = vadd.f32 %v2075_v40, %v2006_v5  ;;  %v1874_v19 = vmul.f32 %v4429_v57, %v4832_v42  ;;  %v1502_v0 = vadd.f32 %v1470_v55, %v1401_v17 }
 0x1ce   : > { %v1804_v25 = vadd.f32 %v1772_v15, %v1703_v23  ;;  %3337 = vmatmul.mubr.f32.gmra.mrb[4].mxu1 %v2391_v18  ;;  %v1975_v3 = vmul.f32 %v4413_v26, %v4836_v41  ;;  %v2076_v10 = vmul.f32 %v4418_v54, %v4838_v9  ;;  %v1672_v34 = vmul.f32 %v4390_v58, %v4807_v11 }
 0x1cf   : > { %v2266_v16 = vadd.f32 %v2234_v31, %v4816_v63  ;;  %v2171_v20 = vmul.f32 0.044715, %v4846_v24  ;;  %v1603_v13 = vadd.f32 %v1571_v30, %v1502_v0  ;;  %v1773_v37 = vmul.f32 %v4405_v49, %v4809_v52  ;;  %v4912_v30 = vld [vmem:[#allocation2 + $0xf0] sm:$0xff] }
 0x1d0   : > { %v1906_v50 = vadd.f32 %v1874_v19, %v1804_v25  ;;  %v3593_v44 = vpop.eup %3592  ;;  %v1875_v29 = vmul.f32 %v4429_v57, %v4850_v53  ;;  %v1269_v12 = vmul.f32 %v4490_v14, %v4768_v2  ;;  %v1370_v28 = vmul.f32 %v4504_v7, %v4777_v21  ;;  %v4878_v2 = vld [vmem:[%s5767_s4 + $0x3] ss:$0 sm:$0xff]  ;;  %v4914_v31 = vld [vmem:[#allocation2 + $0xf1] sm:$0xff] }
 0x1d1   : > { %v2298_v38 = vmul.f32 0.7978846, %v2266_v16  ;;  %v2360_v33 = vadd.f32 1.0, %v3593_v44  ;;  %v2203_v58 = vmul.f32 %v2171_v20, %v4846_v24  ;;  %v1704_v43 = vadd.f32 %v1672_v34, %v1603_v13  ;;  %v4916_v25 = vld [vmem:[#allocation2 + $0xf2] sm:$0xff]  ;;  %v4930_v20 = vld [vmem:[%s5767_s4 + $0x6] ss:$0 sm:$0xff] }
 0x1d2   : > { %v2007_v59 = vadd.f32 %v1975_v3, %v1906_v50  ;;  %v1402_v49 = vadd.f32 %v1370_v28, %v1269_v12  ;;  %v1471_v57 = vmul.f32 %v4538_v45, %v4783_v27  ;;  %v1572_v21 = vmul.f32 %v4878_v2, %v4832_v42  ;;  %v4946_v44 = vld [vmem:[%s5767_s4 + $0x8] ss:$0 sm:$0xff] }
 0x1d3   : > { %3596 = vtanh.f32 %v2298_v38  ;;  %v2392_v40 = vmul.f32 %v2360_v33, %v4793_v35  ;;  %v2235_v46 = vmul.f32 %v2203_v58, %v4846_v24  ;;  %v1805_v56 = vadd.f32 %v1773_v37, %v1704_v43  ;;  %v4939_v37 = vld [vmem:[%s5767_s4 + $0x7] ss:$0 sm:$0xff] }
 0x1d4   : > { %v4884_v48 = vadd.f32 %v2076_v10, %v2007_v59  ;;  %v2138_v32 = vmul.f32 0.5, %v4816_v63  ;;  %v1976_v27 = vmul.f32 %v4413_v26, %v4869_v22  ;;  %v2077_v15 = vmul.f32 %v4418_v54, %v4871_v47  ;;  %v4903_v54 = vld [vmem:[%s5767_s4 + $0x5] ss:$0 sm:$0xff] }
 0x1d5   : > { %v1503_v62 = vadd.f32 %v1471_v57, %v1402_v49  ;;  %3339 = vmatprep.mubr.f32.mxu1 %v2392_v40  ;;  %v2267_v36 = vadd.f32 %v2235_v46, %v4846_v24  ;;  %v1907_v35 = vadd.f32 %v1875_v29, %v1805_v56  ;;  %v1673_v63 = vmul.f32 %v4896_v51, %v4836_v41  ;;  %v4950_v29 = vld [vmem:[#allocation2 + $0xf8] sm:$0xff] }
 0x1d6   : > { %v2172_v39 = vmul.f32 0.044715, %v4884_v48  ;;  %v3595_v60 = vpop.eup %3594  ;;  %v1774_v8 = vmul.f32 %v4903_v54, %v4838_v9  ;;  %v1270_v1 = vmul.f32 %v4490_v14, %v4791_v4  ;;  %v1371_v61 = vmul.f32 %v4504_v7, %v4807_v11 }
 0x1d7   : > { %v1604_v26 = vadd.f32 %v1572_v21, %v1503_v62  ;;  %v2361_v55 = vadd.f32 1.0, %v3595_v60  ;;  %v2299_v5 = vmul.f32 0.7978846, %v2267_v36  ;;  %v2008_v17 = vadd.f32 %v1976_v27, %v1907_v35  ;;  %v4961_v27 = vld [vmem:[#allocation2 + $0xf9] sm:$0xff] }
 0x1d8   : > { %v2204_v23 = vmul.f32 %v2172_v39, %v4884_v48  ;;  %v1403_v19 = vadd.f32 %v1371_v61, %v1270_v1  ;;  %v1472_v0 = vmul.f32 %v4538_v45, %v4809_v52  ;;  %v1573_v4 = vmul.f32 %v4878_v2, %v4850_v53 }
 0x1d9   : > { %v1705_v18 = vadd.f32 %v1673_v63, %v1604_v26  ;;  %v2393_v11 = vmul.f32 %v2361_v55, %v4843_v6  ;;  %3598 = vtanh.f32 %v2299_v5  ;;  %v4924_v3 = vadd.f32 %v2077_v15, %v2008_v17  ;;  %v4963_v15 = vld [vmem:[#allocation2 + $0xfa] sm:$0xff] }
 0x1da   : > { %v2236_v16 = vmul.f32 %v2204_v23, %v4884_v48  ;;  %v2139_v10 = vmul.f32 0.5, %v4846_v24  ;;  %v1876_v52 = vmul.f32 %v4930_v20, %v4912_v30  ;;  %v1504_v50 = vadd.f32 %v1472_v0, %v1403_v19 }
 0x1db   : > { %v1806_v34 = vadd.f32 %v1774_v8, %v1705_v18  ;;  %3340 = vmatmul.mubr.f32.gmra.mrb[6].mxu1 %v2393_v11  ;;  %v2173_v13 = vmul.f32 0.044715, %v4924_v3  ;;  %v1977_v24 = vmul.f32 %v4939_v37, %v4914_v31  ;;  %v2078_v38 = vmul.f32 %v4946_v44, %v4916_v25 }
 0x1dc   : > { %v2268_v6 = vadd.f32 %v2236_v16, %v4884_v48  ;;  %v1605_v33 = vadd.f32 %v1573_v4, %v1504_v50  ;;  %v1674_v58 = vmul.f32 %v4896_v51, %v4869_v22  ;;  %v1775_v59 = vmul.f32 %v4903_v54, %v4871_v47 }
 0x1dd   : > { %v3597_v12 = vpop.eup %3596  ;;  %v1908_v28 = vadd.f32 %v1876_v52, %v1806_v34  ;;  %v2205_v57 = vmul.f32 %v2173_v13, %v4924_v3  ;;  %v1271_v21 = vmul.f32 %v4490_v14, %v4832_v42  ;;  %v1877_v56 = vmul.f32 %v4930_v20, %v4950_v29  ;;  %v4986_v34 = vld [vmem:[#allocation2 + $0x108] sm:$0xff] }
 0x1de   : > { %v2362_v43 = vadd.f32 1.0, %v3597_v12  ;;  %v2300_v49 = vmul.f32 0.7978846, %v2268_v6  ;;  %v1706_v46 = vadd.f32 %v1674_v58, %v1605_v33  ;;  %v1372_v62 = vmul.f32 %v4504_v7, %v4836_v41  ;;  %v4988_v52 = vld [vmem:[#allocation2 + $0x109] sm:$0xff] }
 0x1df   : > { %v2009_v40 = vadd.f32 %v1977_v24, %v1908_v28  ;;  %v2237_v39 = vmul.f32 %v2205_v57, %v4924_v3  ;;  %v1473_v35 = vmul.f32 %v4538_v45, %v4838_v9  ;;  %v1574_v26 = vmul.f32 %v4878_v2, %v4912_v30 }
 0x1e0   : > { %v2394_v36 = vmul.f32 %v2362_v43, %v2138_v32  ;;  %3600 = vtanh.f32 %v2300_v49  ;;  %v1807_v63 = vadd.f32 %v1775_v59, %v1706_v46  ;;  %v1404_v60 = vadd.f32 %v1372_v62, %v1271_v21  ;;  %v5003_v43 = vld [vmem:[#allocation2 + $0x110] sm:$0xff] }
 0x1e1   : > { %v2110_v42 = vadd.f32 %v2078_v38, %v2009_v40  ;;  %v2140_v8 = vmul.f32 0.5, %v4884_v48  ;;  %v2269_v1 = vadd.f32 %v2237_v39, %v4924_v3  ;;  %v1978_v41 = vmul.f32 %v4939_v37, %v4961_v27  ;;  %v5012_v40 = vld [vmem:[%s5767_s4] ss:$0 sm:$0xff] }
 0x1e2   : > { %3342 = vmatprep.mubr.f32.mxu1 %v2394_v36  ;;  %v2079_v32 = vmul.f32 %v4946_v44, %v4963_v15  ;;  %v1909_v55 = vadd.f32 %v1877_v56, %v1807_v63  ;;  %v1505_v9 = vadd.f32 %v1473_v35, %v1404_v60  ;;  %v1675_v5 = vmul.f32 %v4896_v51, %v4914_v31  ;;  %v5020_v60 = vld [vmem:[#allocation2 + $0x111] sm:$0xff] }
 0x1e3   : > { %v2174_v61 = vmul.f32 0.044715, %v2110_v42  ;;  %v3599_v23 = vpop.eup %3598  ;;  %v2301_v17 = vmul.f32 0.7978846, %v2269_v1  ;;  %v1776_v18 = vmul.f32 %v4903_v54, %v4916_v25  ;;  %v1272_v48 = vmul.f32 %v4490_v14, %v4850_v53 }
 0x1e4   : > { %v1373_v19 = vmul.f32 %v4504_v7, %v4869_v22  ;;  %v2363_v0 = vadd.f32 1.0, %v3599_v23  ;;  %v2010_v11 = vadd.f32 %v1978_v41, %v1909_v55  ;;  %v1606_v16 = vadd.f32 %v1574_v26, %v1505_v9  ;;  %v4994_v22 = vld [vmem:[#allocation2 + $0x10a] sm:$0xff]  ;;  %v5025_v26 = vld [vmem:[%s5767_s4 + $0x1] ss:$0 sm:$0xff] }
 0x1e5   : > { %v2206_v4 = vmul.f32 %v2174_v61, %v2110_v42  ;;  %3602 = vtanh.f32 %v2301_v17  ;;  %v1474_v6 = vmul.f32 %v4538_v45, %v4871_v47  ;;  %v1575_v13 = vmul.f32 %v4878_v2, %v4950_v29  ;;  %v5029_v61 = vld [vmem:[#allocation2 + $0x112] sm:$0xff] }
 0x1e6   : > { %v1405_v50 = vadd.f32 %v1373_v19, %v1272_v48  ;;  %v2395_v14 = vmul.f32 %v2363_v0, %v2139_v10  ;;  %v2111_v24 = vadd.f32 %v2079_v32, %v2010_v11  ;;  %v1707_v7 = vadd.f32 %v1675_v5, %v1606_v16 }
 0x1e7   : > { %v2238_v53 = vmul.f32 %v2206_v4, %v2110_v42  ;;  %v2141_v38 = vmul.f32 0.5, %v4924_v3  ;;  %v1878_v12 = vmul.f32 %v4930_v20, %v4986_v34  ;;  %v1979_v28 = vmul.f32 %v4939_v37, %v4988_v52 }
 0x1e8   : > { %v1506_v33 = vadd.f32 %v1474_v6, %v1405_v50  ;;  %3343 = vmatmul.mubr.f32.gmra.mrb[8].mxu1 %v2395_v14  ;;  %v5001_v47 = vmul.f32 0.5, %v2110_v42  ;;  %v2175_v59 = vmul.f32 0.044715, %v2111_v24  ;;  %v1808_v10 = vadd.f32 %v1776_v18, %v1707_v7  ;;  %v5051_v7 = vld [vmem:[#allocation2 + $0x122] sm:$0xff] }
 0x1e9   : > { %v2270_v58 = vadd.f32 %v2238_v53, %v2110_v42  ;;  %v2080_v57 = vmul.f32 %v4946_v44, %v4994_v22  ;;  %v1676_v21 = vmul.f32 %v4896_v51, %v4961_v27  ;;  %v1273_v46 = vmul.f32 %v5012_v40, %v4912_v30  ;;  %v5047_v53 = vld [vmem:[#allocation2 + $0x120] sm:$0xff] }
 0x1ea   : > { %v3601_v49 = vpop.eup %3600  ;;  %v1607_v3 = vadd.f32 %v1575_v13, %v1506_v33  ;;  %v2207_v36 = vmul.f32 %v2175_v59, %v2111_v24  ;;  %v1910_v39 = vadd.f32 %v1878_v12, %v1808_v10  ;;  %v1777_v42 = vmul.f32 %v4903_v54, %v4963_v15  ;;  %v5058_v33 = vld [vmem:[%s5767_s4 + $0x2] ss:$0 sm:$0xff] }
 0x1eb   : > { %v2364_v56 = vadd.f32 1.0, %v3601_v49  ;;  %v2302_v62 = vmul.f32 0.7978846, %v2270_v58  ;;  %v1879_v63 = vmul.f32 %v4930_v20, %v5003_v43  ;;  %v1374_v30 = vmul.f32 %v5025_v26, %v4914_v31 }
 0x1ec   : > { %v1708_v35 = vadd.f32 %v1676_v21, %v1607_v3  ;;  %v2239_v41 = vmul.f32 %v2207_v36, %v2111_v24  ;;  %v2011_v32 = vadd.f32 %v1979_v28, %v1910_v39  ;;  %v1475_v5 = vmul.f32 %v4538_v45, %v4916_v25 }
 0x1ed   : > { %v2396_v1 = vmul.f32 %v2364_v56, %v2140_v8  ;;  %3604 = vtanh.f32 %v2302_v62  ;;  %v1406_v9 = vadd.f32 %v1374_v30, %v1273_v46  ;;  %v1576_v23 = vmul.f32 %v4878_v2, %v4986_v34 }
 0x1ee   : > { %v1809_v55 = vadd.f32 %v1777_v42, %v1708_v35  ;;  %v5035_v17 = vmul.f32 0.5, %v2111_v24  ;;  %v2271_v18 = vadd.f32 %v2239_v41, %v2111_v24  ;;  %v2112_v48 = vadd.f32 %v2080_v57, %v2011_v32  ;;  %v5049_v24 = vld [vmem:[#allocation2 + $0x121] sm:$0xff] }
 0x1ef   : > { %3345 = vmatprep.mubr.f32.mxu1 %v2396_v1  ;;  %v1980_v31 = vmul.f32 %v4939_v37, %v5020_v60  ;;  %v3603_v8 = vpop.eup %3602  ;;  %v2081_v0 = vmul.f32 %v4946_v44, %v5029_v61  ;;  %v1507_v4 = vadd.f32 %v1475_v5, %v1406_v9  ;;  %v1274_v45 = vmul.f32 %v5012_v40, %v4950_v29  ;;  %v5084_v5 = vld [vmem:[#allocation2 + $0x129] sm:$0xff] }
 0x1f0   : > { %v1911_v19 = vadd.f32 %v1879_v63, %v1809_v55  ;;  %v2365_v25 = vadd.f32 1.0, %v3603_v8  ;;  %v2303_v11 = vmul.f32 0.7978846, %v2271_v18  ;;  %v2176_v16 = vmul.f32 0.044715, %v2112_v48  ;;  %v5082_v55 = vld [vmem:[#allocation2 + $0x128] sm:$0xff] }
 0x1f1   : > { %v1677_v50 = vmul.f32 %v4896_v51, %v4988_v52  ;;  %v1608_v13 = vadd.f32 %v1576_v23, %v1507_v4  ;;  %v1778_v14 = vmul.f32 %v4903_v54, %v4994_v22  ;;  %v1375_v29 = vmul.f32 %v5025_v26, %v4961_v27 }
 0x1f2   : > { %v2012_v6 = vadd.f32 %v1980_v31, %v1911_v19  ;;  %v2397_v12 = vmul.f32 %v2365_v25, %v2141_v38  ;;  %3606 = vtanh.f32 %v2303_v11  ;;  %v2208_v28 = vmul.f32 %v2176_v16, %v2112_v48 }
 0x1f3   : > { %v1476_v58 = vmul.f32 %v5058_v33, %v4963_v15  ;;  %v1709_v10 = vadd.f32 %v1677_v50, %v1608_v13  ;;  %v1407_v49 = vadd.f32 %v1375_v29, %v1274_v45  ;;  %v1577_v57 = vmul.f32 %v4878_v2, %v5003_v43  ;;  %v5099_v50 = vld [vmem:[#allocation2 + $0x138] sm:$0xff] }
 0x1f4   : > { %v5062_v59 = vadd.f32 %v2081_v0, %v2012_v6  ;;  %3346 = vmatmul.mubr.f32.gmra.mrb[10].mxu1 %v2397_v12  ;;  %v2240_v27 = vmul.f32 %v2208_v28, %v2112_v48  ;;  %v1880_v38 = vmul.f32 %v4930_v20, %v5047_v53  ;;  %v1981_v3 = vmul.f32 %v4939_v37, %v5049_v24  ;;  %v5092_v0 = vld [vmem:[#allocation2 + $0x12a] sm:$0xff] }
 0x1f5   : > { %v2082_v21 = vmul.f32 %v4946_v44, %v5051_v7  ;;  %v1810_v46 = vadd.f32 %v1778_v14, %v1709_v10  ;;  %v1508_v56 = vadd.f32 %v1476_v58, %v1407_v49  ;;  %v1678_v62 = vmul.f32 %v4896_v51, %v5020_v60 }
 0x1f6   : > { %v2177_v15 = vmul.f32 0.044715, %v5062_v59  ;;  %v2272_v39 = vadd.f32 %v2240_v27, %v2112_v48  ;;  %v1779_v35 = vmul.f32 %v4903_v54, %v5029_v61  ;;  %v1275_v42 = vmul.f32 %v5012_v40, %v4986_v34 }
 0x1f7   : > { %v3605_v36 = vpop.eup %3604  ;;  %v1376_v63 = vmul.f32 %v5025_v26, %v4988_v52  ;;  %v1912_v41 = vadd.f32 %v1880_v38, %v1810_v46  ;;  %v1609_v32 = vadd.f32 %v1577_v57, %v1508_v56  ;;  %v1477_v18 = vmul.f32 %v5058_v33, %v4994_v22  ;;  %v5111_v38 = vld [vmem:[#allocation2 + $0x139] sm:$0xff] }
 0x1f8   : > { %v2366_v30 = vadd.f32 1.0, %v3605_v36  ;;  %v2209_v1 = vmul.f32 %v2177_v15, %v5062_v59  ;;  %v2304_v9 = vmul.f32 0.7978846, %v2272_v39  ;;  %v1578_v34 = vmul.f32 %v4878_v2, %v5047_v53 }
 0x1f9   : > { %v1408_v23 = vadd.f32 %v1376_v63, %v1275_v42  ;;  %v2013_v8 = vadd.f32 %v1981_v3, %v1912_v41  ;;  %v1710_v19 = vadd.f32 %v1678_v62, %v1609_v32  ;;  %v2144_v4 = vmul.f32 0.5, %v2112_v48  ;;  %v5113_v3 = vld [vmem:[#allocation2 + $0x13a] sm:$0xff] }
 0x1fa   : > { %v2398_v31 = vmul.f32 %v2366_v30, %v5001_v47  ;;  %v2241_v52 = vmul.f32 %v2209_v1, %v5062_v59  ;;  %3608 = vtanh.f32 %v2304_v9  ;;  %v1881_v45 = vmul.f32 %v4930_v20, %v5082_v55 }
 0x1fb   : > { %v1509_v25 = vadd.f32 %v1477_v18, %v1408_v23  ;;  %v2114_v11 = vadd.f32 %v2082_v21, %v2013_v8  ;;  %v1811_v16 = vadd.f32 %v1779_v35, %v1710_v19  ;;  %v1982_v47 = vmul.f32 %v4939_v37, %v5084_v5 }
 0x1fc   : > { %3348 = vmatprep.mubr.f32.mxu1 %v2398_v31  ;;  %v2273_v22 = vadd.f32 %v2241_v52, %v5062_v59  ;;  %v3607_v6 = vpop.eup %3606  ;;  %v2083_v13 = vmul.f32 %v4946_v44, %v5092_v0  ;;  %v1679_v14 = vmul.f32 %v4896_v51, %v5049_v24  ;;  %v1276_v29 = vmul.f32 %v5012_v40, %v5003_v43  ;;  %v5135_v52 = vld [vmem:[#allocation2 + $0x140] sm:$0xff] }
 0x1fd   : > { %v1610_v48 = vadd.f32 %v1578_v34, %v1509_v25  ;;  %v2367_v12 = vadd.f32 1.0, %v3607_v6  ;;  %v2178_v58 = vmul.f32 0.044715, %v2114_v11  ;;  %v1780_v10 = vmul.f32 %v4903_v54, %v5051_v7  ;;  %v5139_v25 = vld [vmem:[#allocation2 + $0x141] sm:$0xff] }
 0x1fe   : > { %v2305_v28 = vmul.f32 0.7978846, %v2273_v22  ;;  %v1913_v49 = vadd.f32 %v1881_v45, %v1811_v16  ;;  %v1882_v27 = vmul.f32 %v4930_v20, %v5099_v50  ;;  %v1377_v21 = vmul.f32 %v5025_v26, %v5020_v60  ;;  %v5147_v6 = vld [vmem:[#allocation2 + $0x142] sm:$0xff] }
 0x1ff   : > { %v1711_v57 = vadd.f32 %v1679_v14, %v1610_v48  ;;  %v2399_v43 = vmul.f32 %v2367_v12, %v5035_v17  ;;  %v2210_v15 = vmul.f32 %v2178_v58, %v2114_v11  ;;  %v1478_v46 = vmul.f32 %v5058_v33, %v5029_v61  ;;  %v5154_v58 = vld [vmem:[#allocation2 + $0x150] sm:$0xff] }
 0x200   : > { %3610 = vtanh.f32 %v2305_v28  ;;  %v2014_v56 = vadd.f32 %v1982_v47, %v1913_v49  ;;  %v1409_v36 = vadd.f32 %v1377_v21, %v1276_v29  ;;  %v1579_v39 = vmul.f32 %v4878_v2, %v5082_v55 }
 0x201   : > { %v1812_v62 = vadd.f32 %v1780_v10, %v1711_v57  ;;  %3349 = vmatmul.mubr.f32.gmra.mrb[12].mxu1 %v2399_v43  ;;  %v2145_v35 = vmul.f32 0.5, %v5062_v59  ;;  %v2242_v42 = vmul.f32 %v2210_v15, %v2114_v11  ;;  %v1983_v60 = vmul.f32 %v4939_v37, %v5111_v38 }
 0x202   : > { %v2084_v17 = vmul.f32 %v4946_v44, %v5113_v3  ;;  %v5127_v63 = vmul.f32 0.5, %v2114_v11  ;;  %v2115_v30 = vadd.f32 %v2083_v13, %v2014_v56  ;;  %v1510_v1 = vadd.f32 %v1478_v46, %v1409_v36 }
 0x203   : > { %v1914_v61 = vadd.f32 %v1882_v27, %v1812_v62  ;;  %v2274_v41 = vadd.f32 %v2242_v42, %v2114_v11  ;;  %v1680_v32 = vmul.f32 %v4896_v51, %v5084_v5  ;;  %v1277_v9 = vmul.f32 %v5012_v40, %v5047_v53 }
 0x204   : > { %v1378_v59 = vmul.f32 %v5025_v26, %v5049_v24  ;;  %v3609_v23 = vpop.eup %3608  ;;  %v2179_v18 = vmul.f32 0.044715, %v2115_v30  ;;  %v1611_v31 = vadd.f32 %v1579_v39, %v1510_v1  ;;  %v1479_v8 = vmul.f32 %v5058_v33, %v5051_v7  ;;  %v5170_v1 = vld [vmem:[#allocation2 + $0x151] sm:$0xff] }
 0x205   : > { %v2015_v34 = vadd.f32 %v1983_v60, %v1914_v61  ;;  %v2368_v19 = vadd.f32 1.0, %v3609_v23  ;;  %v2306_v45 = vmul.f32 0.7978846, %v2274_v41  ;;  %v1580_v53 = vmul.f32 %v4878_v2, %v5099_v50  ;;  %v5172_v41 = vld [vmem:[#allocation2 + $0x152] sm:$0xff] }
 0x206   : > { %v1410_v22 = vadd.f32 %v1378_v59, %v1277_v9  ;;  %v2211_v11 = vmul.f32 %v2179_v18, %v2115_v30  ;;  %v1712_v24 = vadd.f32 %v1680_v32, %v1611_v31  ;;  %v1781_v47 = vmul.f32 %v4903_v54, %v5092_v0 }
 0x207   : > { %v5143_v16 = vadd.f32 %v2084_v17, %v2015_v34  ;;  %v2400_v13 = vmul.f32 %v2368_v19, %v2144_v4  ;;  %3612 = vtanh.f32 %v2306_v45  ;;  %v1883_v7 = vmul.f32 %v4930_v20, %v5135_v52 }
 0x208   : > { %v1511_v48 = vadd.f32 %v1479_v8, %v1410_v22  ;;  %v2243_v14 = vmul.f32 %v2211_v11, %v2115_v30  ;;  %v1813_v12 = vadd.f32 %v1781_v47, %v1712_v24  ;;  %v1984_v28 = vmul.f32 %v4939_v37, %v5139_v25  ;;  %v5187_v24 = vld [vmem:[#allocation2 + $0x158] sm:$0xff] }
 0x209   : > { %v2180_v29 = vmul.f32 0.044715, %v5143_v16  ;;  %3351 = vmatprep.mubr.f32.mxu1 %v2400_v13  ;;  %v2085_v49 = vmul.f32 %v4946_v44, %v5147_v6  ;;  %v1681_v57 = vmul.f32 %v4896_v51, %v5111_v38  ;;  %v1782_v27 = vmul.f32 %v4903_v54, %v5113_v3 }
 0x20a   : > { %v3611_v10 = vpop.eup %3610  ;;  %v1612_v4 = vadd.f32 %v1580_v53, %v1511_v48  ;;  %v2275_v43 = vadd.f32 %v2243_v14, %v2115_v30  ;;  %v1915_v46 = vadd.f32 %v1883_v7, %v1813_v12  ;;  %v1884_v62 = vmul.f32 %v4930_v20, %v5154_v58  ;;  %v5193_v14 = vld [vmem:[#allocation2 + $0x159] sm:$0xff] }
 0x20b   : > { %v2369_v21 = vadd.f32 1.0, %v3611_v10  ;;  %v2212_v15 = vmul.f32 %v2180_v29, %v5143_v16  ;;  %v1278_v36 = vmul.f32 %v5012_v40, %v5082_v55  ;;  %v1379_v39 = vmul.f32 %v5025_v26, %v5084_v5  ;;  %v5199_v10 = vld [vmem:[#allocation2 + $0x15a] sm:$0xff] }
 0x20c   : > { %v1713_v56 = vadd.f32 %v1681_v57, %v1612_v4  ;;  %v2307_v60 = vmul.f32 0.7978846, %v2275_v43  ;;  %v2016_v61 = vadd.f32 %v1984_v28, %v1915_v46  ;;  %v1480_v59 = vmul.f32 %v5058_v33, %v5092_v0  ;;  %v5210_v46 = vld [vmem:[#allocation2 + $0x168] sm:$0xff] }
 0x20d   : > { %v2401_v42 = vmul.f32 %v2369_v21, %v2145_v35  ;;  %v2244_v17 = vmul.f32 %v2212_v15, %v5143_v16  ;;  %v1411_v9 = vadd.f32 %v1379_v39, %v1278_v36  ;;  %v1581_v55 = vmul.f32 %v4878_v2, %v5135_v52 }
 0x20e   : > { %v1814_v32 = vadd.f32 %v1782_v27, %v1713_v56  ;;  %v2147_v23 = vmul.f32 0.5, %v2115_v30  ;;  %3614 = vtanh.f32 %v2307_v60  ;;  %v2117_v35 = vadd.f32 %v2085_v49, %v2016_v61 }
 0x20f   : > { %3352 = vmatmul.mubr.f32.gmra.mrb[14].mxu1 %v2401_v42  ;;  %v2276_v5 = vadd.f32 %v2244_v17, %v5143_v16  ;;  %v1985_v34 = vmul.f32 %v4939_v37, %v5170_v1  ;;  %v2086_v31 = vmul.f32 %v4946_v44, %v5172_v41  ;;  %v1512_v8 = vadd.f32 %v1480_v59, %v1411_v9 }
 0x210   : > { %v1916_v18 = vadd.f32 %v1884_v62, %v1814_v32  ;;  %v2181_v45 = vmul.f32 0.044715, %v2117_v35  ;;  %v1682_v0 = vmul.f32 %v4896_v51, %v5139_v25  ;;  %v1783_v30 = vmul.f32 %v4903_v54, %v5147_v6 }
 0x211   : > { %v2308_v19 = vmul.f32 0.7978846, %v2276_v5  ;;  %v3613_v22 = vpop.eup %3612  ;;  %v1613_v11 = vadd.f32 %v1581_v55, %v1512_v8  ;;  %v1279_v47 = vmul.f32 %v5012_v40, %v5099_v50  ;;  %v1380_v13 = vmul.f32 %v5025_v26, %v5111_v38 }
 0x212   : > { %v2017_v53 = vadd.f32 %v1985_v34, %v1916_v18  ;;  %v2370_v7 = vadd.f32 1.0, %v3613_v22  ;;  %v2213_v48 = vmul.f32 %v2181_v45, %v2117_v35  ;;  %v1481_v29 = vmul.f32 %v5058_v33, %v5113_v3  ;;  %v5228_v34 = vld [vmem:[#allocation2 + $0x169] sm:$0xff] }
 0x213   : > { %3616 = vtanh.f32 %v2308_v19  ;;  %v1714_v28 = vadd.f32 %v1682_v0, %v1613_v11  ;;  %v1412_v49 = vadd.f32 %v1380_v13, %v1279_v47  ;;  %v1582_v50 = vmul.f32 %v4878_v2, %v5154_v58 }
 0x214   : > { %v5197_v12 = vadd.f32 %v2086_v31, %v2017_v53  ;;  %v2402_v4 = vmul.f32 %v2370_v7, %v5127_v63  ;;  %v2148_v38 = vmul.f32 0.5, %v5143_v16  ;;  %v2245_v57 = vmul.f32 %v2213_v48, %v2117_v35  ;;  %v5230_v31 = vld [vmem:[#allocation2 + $0x16a] sm:$0xff] }
 0x215   : > { %v1885_v27 = vmul.f32 %v4930_v20, %v5187_v24  ;;  %v1815_v3 = vadd.f32 %v1783_v30, %v1714_v28  ;;  %v1986_v43 = vmul.f32 %v4939_v37, %v5193_v14  ;;  %v1513_v15 = vadd.f32 %v1481_v29, %v1412_v49  ;;  %v5248_v49 = vld [vmem:[#allocation2 + $0x170] sm:$0xff] }
 0x216   : > { %v2182_v21 = vmul.f32 0.044715, %v5197_v12  ;;  %3354 = vmatprep.mubr.f32.mxu1 %v2402_v4  ;;  %v5212_v56 = vmul.f32 0.5, %v2117_v35  ;;  %v2277_v62 = vadd.f32 %v2245_v57, %v2117_v35  ;;  %v2087_v63 = vmul.f32 %v4946_v44, %v5199_v10 }
 0x217   : > { %v1683_v16 = vmul.f32 %v4896_v51, %v5170_v1  ;;  %v1917_v39 = vadd.f32 %v1885_v27, %v1815_v3  ;;  %v1614_v42 = vadd.f32 %v1582_v50, %v1513_v15  ;;  %v1280_v60 = vmul.f32 %v5012_v40, %v5135_v52  ;;  %v5250_v50 = vld [vmem:[#allocation2 + $0x171] sm:$0xff] }
 0x218   : > { %v2214_v36 = vmul.f32 %v2182_v21, %v5197_v12  ;;  %v3615_v17 = vpop.eup %3614  ;;  %v2309_v61 = vmul.f32 0.7978846, %v2277_v62  ;;  %v1784_v32 = vmul.f32 %v4903_v54, %v5172_v41  ;;  %v1886_v9 = vmul.f32 %v4930_v20, %v5210_v46  ;;  %v5257_v3 = vld [vmem:[#allocation2 + $0x172] sm:$0xff] }
 0x219   : > { %v1381_v59 = vmul.f32 %v5025_v26, %v5139_v25  ;;  %v2371_v55 = vadd.f32 1.0, %v3615_v17  ;;  %v2018_v35 = vadd.f32 %v1986_v43, %v1917_v39  ;;  %v1715_v18 = vadd.f32 %v1683_v16, %v1614_v42 }
 0x21a   : > { %v2246_v5 = vmul.f32 %v2214_v36, %v5197_v12  ;;  %3618 = vtanh.f32 %v2309_v61  ;;  %v1482_v8 = vmul.f32 %v5058_v33, %v5147_v6  ;;  %v1583_v19 = vmul.f32 %v4878_v2, %v5187_v24 }
 0x21b   : > { %v1413_v52 = vadd.f32 %v1381_v59, %v1280_v60  ;;  %v2403_v45 = vmul.f32 %v2371_v55, %v2147_v23  ;;  %v5237_v0 = vadd.f32 %v2087_v63, %v2018_v35  ;;  %v1816_v30 = vadd.f32 %v1784_v32, %v1715_v18  ;;  %v1851_v18 = vld [vmem:[#allocation2 + $0x180] sm:$0xff] }
 0x21c   : > { %v2278_v25 = vadd.f32 %v2246_v5, %v5197_v12  ;;  %v1987_v53 = vmul.f32 %v4939_v37, %v5228_v34  ;;  %v2088_v11 = vmul.f32 %v4946_v44, %v5230_v31  ;;  %v1684_v6 = vmul.f32 %v4896_v51, %v5193_v14 }
 0x21d   : > { %v3617_v22 = vpop.eup %3616  ;;  %v1514_v47 = vadd.f32 %v1482_v8, %v1413_v52  ;;  %3355 = vmatmul.mubr.f32.gmra.mrb[16].mxu1 %v2403_v45  ;;  %v2183_v23 = vmul.f32 0.044715, %v5237_v0  ;;  %v1785_v48 = vmul.f32 %v4903_v54, %v5199_v10  ;;  %v1918_v29 = vadd.f32 %v1886_v9, %v1816_v30 }
 0x21e   : > { %v2372_v13 = vadd.f32 1.0, %v3617_v22  ;;  %v2310_v7 = vmul.f32 0.7978846, %v2278_v25  ;;  %v1281_v4 = vmul.f32 %v5012_v40, %v5154_v58  ;;  %v1382_v57 = vmul.f32 %v5025_v26, %v5170_v1  ;;  %v2053_v22 = vld [vmem:[#allocation2 + $0x182] sm:$0xff] }
 0x21f   : > { %v1615_v28 = vadd.f32 %v1583_v19, %v1514_v47  ;;  %v2215_v21 = vmul.f32 %v2183_v23, %v5237_v0  ;;  %v1483_v43 = vmul.f32 %v5058_v33, %v5172_v41  ;;  %v2019_v15 = vadd.f32 %v1987_v53, %v1918_v29  ;;  %v1952_v19 = vld [vmem:[#allocation2 + $0x181] sm:$0xff] }
 0x220   : > { %v2404_v27 = vmul.f32 %v2372_v13, %v2148_v38  ;;  %3620 = vtanh.f32 %v2310_v7  ;;  %v1414_v63 = vadd.f32 %v1382_v57, %v1281_v4  ;;  %v1584_v16 = vmul.f32 %v4878_v2, %v5210_v46  ;;  %v1852_v13 = vld [vmem:[#allocation2 + $0x188] sm:$0xff] }
 0x221   : > { %v1716_v62 = vadd.f32 %v1684_v6, %v1615_v28  ;;  %v2150_v58 = vmul.f32 0.5, %v5197_v12  ;;  %v2247_v1 = vmul.f32 %v2215_v21, %v5237_v0  ;;  %v1887_v38 = vmul.f32 %v4930_v20, %v5248_v49 }
 0x222   : > { %3357 = vmatprep.mubr.f32.mxu1 %v2404_v27  ;;  %v1988_v36 = vmul.f32 %v4939_v37, %v5250_v50  ;;  %v5269_v39 = vadd.f32 %v2088_v11, %v2019_v15  ;;  %v2089_v42 = vmul.f32 %v4946_v44, %v5257_v3  ;;  %v1515_v60 = vadd.f32 %v1483_v43, %v1414_v63 }
 0x223   : > { %v1817_v41 = vadd.f32 %v1785_v48, %v1716_v62  ;;  %v2279_v17 = vadd.f32 %v2247_v1, %v5237_v0  ;;  %v1685_v12 = vmul.f32 %v4896_v51, %v5228_v34  ;;  %v1282_v61 = vmul.f32 %v5012_v40, %v5187_v24 }
 0x224   : > { %v1383_v32 = vmul.f32 %v5025_v26, %v5193_v14  ;;  %v3619_v9 = vpop.eup %3618  ;;  %v2184_v59 = vmul.f32 0.044715, %v5269_v39  ;;  %v1616_v5 = vadd.f32 %v1584_v16, %v1515_v60  ;;  %v1786_v35 = vmul.f32 %v4903_v54, %v5230_v31 }
 0x225   : > { %v1919_v55 = vadd.f32 %v1887_v38, %v1817_v41  ;;  %v2373_v52 = vadd.f32 1.0, %v3619_v9  ;;  %v2311_v8 = vmul.f32 0.7978846, %v2279_v17  ;;  %v1484_v25 = vmul.f32 %v5058_v33, %v5199_v10 }
 0x226   : > { %v1415_v45 = vadd.f32 %v1383_v32, %v1282_v61  ;;  %v2216_v24 = vmul.f32 %v2184_v59, %v5269_v39  ;;  %v1717_v14 = vadd.f32 %v1685_v12, %v1616_v5  ;;  %v1585_v53 = vmul.f32 %v4878_v2, %v5248_v49  ;;  %v2054_v61 = vld [vmem:[#allocation2 + $0x18a] sm:$0xff] }
 0x227   : > { %v2020_v30 = vadd.f32 %v1988_v36, %v1919_v55  ;;  %v2405_v11 = vmul.f32 %v2373_v52, %v5212_v56  ;;  %3622 = vtanh.f32 %v2311_v8  ;;  %v1888_v47 = vmul.f32 %v4930_v20, %v1851_v18 }
 0x228   : > { %v1516_v6 = vadd.f32 %v1484_v25, %v1415_v45  ;;  %v2248_v7 = vmul.f32 %v2216_v24, %v5269_v39  ;;  %v1818_v10 = vadd.f32 %v1786_v35, %v1717_v14  ;;  %v1989_v48 = vmul.f32 %v4939_v37, %v1952_v19 }
 0x229   : > { %v5291_v23 = vadd.f32 %v2089_v42, %v2020_v30  ;;  %3358 = vmatmul.mubr.f32.gmra.mrb[18].mxu1 %v2405_v11  ;;  %v2090_v28 = vmul.f32 %v4946_v44, %v2053_v22  ;;  %v1686_v56 = vmul.f32 %v4896_v51, %v5250_v50  ;;  %v1787_v57 = vmul.f32 %v4903_v54, %v5257_v3  ;;  %v1953_v42 = vld [vmem:[#allocation2 + $0x189] sm:$0xff] }
 0x22a   : > { %v3621_v29 = vpop.eup %3620  ;;  %v1617_v4 = vadd.f32 %v1585_v53, %v1516_v6  ;;  %v2280_v21 = vadd.f32 %v2248_v7, %v5269_v39  ;;  %v1889_v15 = vmul.f32 %v4930_v20, %v1852_v13  ;;  %v1920_v62 = vadd.f32 %v1888_v47, %v1818_v10  ;;  %v5322_v53 = vld [vmem:[#allocation2] sm:$0xff] }
 0x22b   : > { %v2374_v27 = vadd.f32 1.0, %v3621_v29  ;;  %v2185_v43 = vmul.f32 0.044715, %v5291_v23  ;;  %v1283_v16 = vmul.f32 %v5012_v40, %v5210_v46  ;;  %v1384_v1 = vmul.f32 %v5025_v26, %v5228_v34  ;;  %v1954_v47 = vld [vmem:[#allocation2 + $0x199] sm:$0xff]  ;;  %3380 = vmatprep.mubr.msk.f32.mxu0 %vm3788_vm1, %v5322_v53 }
 0x22c   : > { %v1718_v63 = vadd.f32 %v1686_v56, %v1617_v4  ;;  %v2312_v36 = vmul.f32 0.7978846, %v2280_v21  ;;  %v1485_v60 = vmul.f32 %v5058_v33, %v5230_v31  ;;  %v2021_v17 = vadd.f32 %v1989_v48, %v1920_v62 }
 0x22d   : > { %v2406_v38 = vmul.f32 %v2374_v27, %v2150_v58  ;;  %v2217_v41 = vmul.f32 %v2185_v43, %v5291_v23  ;;  %v1416_v32 = vadd.f32 %v1384_v1, %v1283_v16  ;;  %v1586_v9 = vmul.f32 %v4878_v2, %v1851_v18  ;;  %v1955_v16 = vld [vmem:[#allocation2 + $0x1a1] sm:$0xff] }
 0x22e   : > { %v1819_v12 = vadd.f32 %v1787_v57, %v1718_v63  ;;  %v2151_v46 = vmul.f32 0.5, %v5237_v0  ;;  %3624 = vtanh.f32 %v2312_v36  ;;  %v5312_v58 = vadd.f32 %v2090_v28, %v2021_v17  ;;  %v2056_v17 = vld [vmem:[#allocation2 + $0x1a2] sm:$0xff] }
 0x22f   : > { %3360 = vmatprep.mubr.f32.mxu1 %v2406_v38  ;;  %v2249_v34 = vmul.f32 %v2217_v41, %v5291_v23  ;;  %v1990_v55 = vmul.f32 %v4939_v37, %v1953_v42  ;;  %v1517_v5 = vadd.f32 %v1485_v60, %v1416_v32  ;;  %v2091_v35 = vmul.f32 %v4946_v44, %v2054_v61 }
 0x230   : > { %v1921_v59 = vadd.f32 %v1889_v15, %v1819_v12  ;;  %v1687_v52 = vmul.f32 %v4896_v51, %v1952_v19  ;;  %v1284_v18 = vmul.f32 %v5012_v40, %v5248_v49  ;;  %v2186_v0 = vmul.f32 0.044715, %v5312_v58 }
 0x231   : > { %v2281_v31 = vadd.f32 %v2249_v34, %v5291_v23  ;;  %v3623_v8 = vpop.eup %3622  ;;  %v1618_v25 = vadd.f32 %v1586_v9, %v1517_v5  ;;  %v1788_v24 = vmul.f32 %v4903_v54, %v2053_v22  ;;  %v1890_v11 = vmul.f32 %v5322_v53, %v4930_v20  ;;  %v2055_v22 = vld [vmem:[#allocation2 + $0x19a] sm:$0xff] }
 0x232   : > { %v2022_v45 = vadd.f32 %v1990_v55, %v1921_v59  ;;  %v2375_v30 = vadd.f32 1.0, %v3623_v8  ;;  %v1385_v19 = vmul.f32 %v5025_v26, %v5250_v50  ;;  %v2218_v40 = vmul.f32 %v2186_v0, %v5312_v58 }
 0x233   : > { %v2313_v14 = vmul.f32 0.7978846, %v2281_v31  ;;  %v1719_v6 = vadd.f32 %v1687_v52, %v1618_v25  ;;  %v1486_v7 = vmul.f32 %v5058_v33, %v5257_v3  ;;  %v1587_v29 = vmul.f32 %v4878_v2, %v1852_v13 }
 0x234   : > { %v2123_v49 = vadd.f32 %v2091_v35, %v2022_v45  ;;  %v2407_v10 = vmul.f32 %v2375_v30, %v2151_v46  ;;  %v1417_v48 = vadd.f32 %v1385_v19, %v1284_v18  ;;  %v2250_v28 = vmul.f32 %v2218_v40, %v5312_v58 }
 0x235   : > { %3626 = vtanh.f32 %v2313_v14  ;;  %v1820_v4 = vadd.f32 %v1788_v24, %v1719_v6  ;;  %v1991_v56 = vmul.f32 %v4939_v37, %v1954_v47  ;;  %v2092_v33 = vmul.f32 %v4946_v44, %v2055_v22 }
 0x236   : > { %v2187_v20 = vmul.f32 0.044715, %v2123_v49  ;;  %3361 = vmatmul.mubr.f32.gmra.mrb[20].mxu1 %v2407_v10  ;;  %v1518_v26 = vadd.f32 %v1486_v7, %v1417_v48  ;;  %v2282_v50 = vadd.f32 %v2250_v28, %v5312_v58  ;;  %v2152_v21 = vmul.f32 0.5, %v5269_v39 }
 0x237   : > { %v1922_v27 = vadd.f32 %v1890_v11, %v1820_v4  ;;  %v1688_v2 = vmul.f32 %v4896_v51, %v1953_v42  ;;  %v1789_v38 = vmul.f32 %v4903_v54, %v2054_v61  ;;  %v1992_v32 = vmul.f32 %v4939_v37, %v1955_v16  ;;  %v2734_v16 = vld [vmem:[%s5770_s7 + $0x8] sm:$0xff] }
 0x238   : > { %v2219_v57 = vmul.f32 %v2187_v20, %v2123_v49  ;;  %v3625_v3 = vpop.eup %3624  ;;  %v1619_v43 = vadd.f32 %v1587_v29, %v1518_v26  ;;  %v2314_v15 = vmul.f32 0.7978846, %v2282_v50  ;;  %v2093_v46 = vmul.f32 %v4946_v44, %v2056_v17 }
 0x239   : > { %v2376_v13 = vadd.f32 1.0, %v3625_v3  ;;  %v2023_v63 = vadd.f32 %v1991_v56, %v1922_v27  ;;  %v2153_v34 = vmul.f32 0.5, %v5291_v23  ;;  %v2154_v8 = vmul.f32 0.5, %v5312_v58 }
 0x23a   : > { %v2251_v62 = vmul.f32 %v2219_v57, %v2123_v49  ;;  %v1720_v1 = vadd.f32 %v1688_v2, %v1619_v43  ;;  %3628 = vtanh.f32 %v2314_v15  ;;  %v2155_v24 = vmul.f32 0.5, %v2123_v49 }
 0x23b   : > { %v2408_v36 = vmul.f32 %v2376_v13, %v2152_v21  ;;  %v2124_v60 = vadd.f32 %v2092_v33, %v2023_v63  ;;  %v5346_v21 = vld [vmem:[%s5769_s6] ss:$0 sm:$0xff] }
 0x23c   : > { %v2283_v41 = vadd.f32 %v2251_v62, %v2123_v49  ;;  %v1821_v12 = vadd.f32 %v1789_v38, %v1720_v1  ;;  %v2733_v63 = vld [vmem:[%s5770_s7] sm:$0xff] }
 0x23d   : > { %3363 = vmatprep.mubr.f32.mxu1 %v2408_v36  ;;  %v2188_v9 = vmul.f32 0.044715, %v2124_v60  ;;  %v2156_v40 = vmul.f32 0.5, %v2124_v60  ;;  %v3431_v36 = vpack.c.bf16 %v2734_v16, %v2733_v63 }
 0x23e   : > { %v2315_v39 = vmul.f32 0.7978846, %v2283_v41  ;;  %v1923_v42 = vadd.f32 %v1890_v11, %v1821_v12  ;;  %v3787_v41 = vmov 0.0|0.0   ;;  %v2735_v12 = vld [vmem:[%s5770_s7 + $0x10] sm:$0xff] }
 0x23f   : > { %v3627_v51 = vpop.eup %3626  ;;  %v2220_v54 = vmul.f32 %v2188_v9, %v2124_v60  ;;  %3430 = vmatprep.subr.bf16.mxu0 %v3787_v41 }
 0x240   : > { %v2377_v59 = vadd.f32 1.0, %v3627_v51  ;;  %3630 = vtanh.f32 %v2315_v39  ;;  %v2024_v61 = vadd.f32 %v1992_v32, %v1923_v42  ;;  %3432 = vmatpush3.bf16.msra.mxu0 %v3431_v36  ;;  %v2736_v32 = vld [vmem:[%s5770_s7 + $0x18] sm:$0xff] }
 0x241   : > { %v2252_v5 = vmul.f32 %v2220_v54, %v2124_v60  ;;  %3433 = vmatprep.subr.bf16.mxu0 %v3787_v41  ;;  %v3434_v9 = vpack.c.bf16 %v2736_v32, %v2735_v12 }
 0x242   : > { %v2409_v55 = vmul.f32 %v2377_v59, %v2153_v34  ;;  %v2125_v31 = vadd.f32 %v2093_v46, %v2024_v61 }
 0x243   : > { %v2284_v35 = vadd.f32 %v2252_v5, %v2124_v60 }
 0x244   : > { %3364 = vmatmul.mubr.f32.gmra.mrb[22].mxu1 %v2409_v55  ;;  %v2189_v52 = vmul.f32 0.044715, %v2125_v31  ;;  %v3629_v37 = vpop.eup %3628  ;;  %v2157_v10 = vmul.f32 0.5, %v2125_v31  ;;  %3435 = vmatpush3.bf16.msra.mxu0 %v3434_v9 }
 0x245   : > { %v2316_v18 = vmul.f32 0.7978846, %v2284_v35  ;;  %v2378_v0 = vadd.f32 1.0, %v3629_v37  ;;  %3436 = vmatprep.subr.bf16.mxu0 %v3787_v41 }
 0x246   : > { %v2221_v45 = vmul.f32 %v2189_v52, %v2125_v31 }
 0x247   : > { %3632 = vtanh.f32 %v2316_v18  ;;  %v2410_v44 = vmul.f32 %v2378_v0, %v2154_v8 }
 0x248   : > { %v2253_v25 = vmul.f32 %v2221_v45, %v2125_v31 }
 0x249   : > { %3366 = vmatprep.mubr.f32.mxu1 %v2410_v44 }
 0x24a   : > { %v3631_v23 = vpop.eup %3630  ;;  %v2285_v14 = vadd.f32 %v2253_v25, %v2125_v31 }
 0x24b   : > { %v2379_v30 = vadd.f32 1.0, %v3631_v23 }
 0x24c   : > { %v2317_v47 = vmul.f32 0.7978846, %v2285_v14 }
 0x24d   : > { %v2411_v11 = vmul.f32 %v2379_v30, %v2155_v24 }
 0x24e   : > { %3634 = vtanh.f32 %v2317_v47 }
 0x24f   : > { %3367 = vmatmul.mubr.f32.gmra.mrb[24].mxu1 %v2411_v11 }
 0x251   : > { %v3633_v19 = vpop.eup %3632 }
 0x252   : > { %v2380_v6 = vadd.f32 1.0, %v3633_v19 }
 0x254   : > { %v2412_v7 = vmul.f32 %v2380_v6, %v2156_v40 }
 0x256   : > { %3369 = vmatprep.mubr.f32.mxu1 %v2412_v7 }
 0x258   : > { %v3635_v58 = vpop.eup %3634 }
 0x259   : > { %v2381_v22 = vadd.f32 1.0, %v3635_v58 }
 0x25b   : > { %v2413_v48 = vmul.f32 %v2381_v22, %v2157_v10 }
 0x25d   : > { %3370 = vmatmul.mubr.f32.gmra.mrb[26].mxu1 %v2413_v48 }
 0x26b   : > { %v3326_v29 = vpop.f32.mrb[32].mxu0 }
 0x26c   : > { %v2503_v28 = vpop.f32.mrb[33].mxu0  ;;  %v5349_v2 = vadd.f32 %v3326_v29, %v5346_v21 }
 0x26d   : > { %v5352_v13 = vadd.f32 %v5346_v21, %v2503_v28 }
 0x26e   : > { %v2663_v1 = vsel %vm441_vm0, %v5349_v2, 0.0 }
 0x26f   : > { %v2662_v38 = vsel %vm441_vm0, %v5352_v13, 0.0 }
 0x270   : > { %v2664_v17 = vadd.f32 %v2663_v1, %v2662_v38 }
 0x27d   : > { %v3329_v20 = vpop.f32.mrb[34].mxu0 }
 0x27e   : > { %v2513_v49 = vpop.f32.mrb[35].mxu0  ;;  %v5376_v39 = vadd.f32 %v3329_v20, %v5346_v21 }
 0x27f   : > { %v5355_v62 = vadd.f32 %v5346_v21, %v2513_v49 }
 0x280   : > { %v2667_v34 = vsel %vm441_vm0, %v5376_v39, 0.0 }
 0x281   : > { %v2665_v60 = vsel %vm441_vm0, %v5355_v62, 0.0 }
 0x282   : > { %v2666_v51 = vadd.f32 %v2665_v60, %v2664_v17 }
 0x284   : > { %v2668_v54 = vadd.f32 %v2667_v34, %v2666_v51 }
 0x288   : > { %v3332_v4 = vpop.f32.mrb[0].mxu1 }
 0x289   : > { %v2523_v56 = vpop.f32.mrb[1].mxu1  ;;  %v5388_v55 = vadd.f32 %v3332_v4, %v5346_v21 }
 0x28a   : > { %v5379_v42 = vadd.f32 %v5346_v21, %v2523_v56 }
 0x28b   : > { %v2671_v35 = vsel %vm441_vm0, %v5388_v55, 0.0 }
 0x28c   : > { %v2669_v61 = vsel %vm441_vm0, %v5379_v42, 0.0 }
 0x28d   : > { %v2670_v5 = vadd.f32 %v2669_v61, %v2668_v54 }
 0x28f   : > { %v2672_v52 = vadd.f32 %v2671_v35, %v2670_v5 }
 0x293   : > { %v3335_v26 = vpop.f32.mrb[2].mxu1 }
 0x294   : > { %v2533_v50 = vpop.f32.mrb[3].mxu1  ;;  %v5398_v18 = vadd.f32 %v3335_v26, %v5346_v21 }
 0x295   : > { %v5391_v31 = vadd.f32 %v5346_v21, %v2533_v50 }
 0x296   : > { %v2675_v25 = vsel %vm441_vm0, %v5398_v18, 0.0 }
 0x297   : > { %v2673_v37 = vsel %vm441_vm0, %v5391_v31, 0.0 }
 0x298   : > { %v2674_v0 = vadd.f32 %v2673_v37, %v2672_v52 }
 0x29a   : > { %v2676_v23 = vadd.f32 %v2675_v25, %v2674_v0 }
 0x2a1   : > { %v3338_v57 = vpop.f32.mrb[4].mxu1 }
 0x2a2   : > { %v2543_v27 = vpop.f32.mrb[5].mxu1  ;;  %v5408_v30 = vadd.f32 %v3338_v57, %v5346_v21 }
 0x2a3   : > { %v5401_v44 = vadd.f32 %v5346_v21, %v2543_v27 }
 0x2a4   : > { %v2679_v47 = vsel %vm441_vm0, %v5408_v30, 0.0 }
 0x2a5   : > { %v2677_v24 = vsel %vm441_vm0, %v5401_v44, 0.0 }
 0x2a6   : > { %v2678_v14 = vadd.f32 %v2677_v24, %v2676_v23 }
 0x2a8   : > { %v2680_v19 = vadd.f32 %v2679_v47, %v2678_v14 }
 0x2ae   : > { %v3341_v33 = vpop.f32.mrb[6].mxu1 }
 0x2af   : > { %v2553_v3 = vpop.f32.mrb[7].mxu1  ;;  %v5418_v58 = vadd.f32 %v3341_v33, %v5346_v21 }
 0x2b0   : > { %v5411_v11 = vadd.f32 %v5346_v21, %v2553_v3 }
 0x2b1   : > { %v2683_v48 = vsel %vm441_vm0, %v5418_v58, 0.0 }
 0x2b2   : > { %v2681_v6 = vsel %vm441_vm0, %v5411_v11, 0.0 }
 0x2b3   : > { %v2682_v10 = vadd.f32 %v2681_v6, %v2680_v19 }
 0x2b5   : > { %v2684_v29 = vadd.f32 %v2683_v48, %v2682_v10 }
 0x2bb   : > { %v3344_v43 = vpop.f32.mrb[8].mxu1 }
 0x2bc   : > { %v2563_v15 = vpop.f32.mrb[9].mxu1  ;;  %v5428_v20 = vadd.f32 %v3344_v43, %v5346_v21 }
 0x2bd   : > { %v5421_v22 = vadd.f32 %v5346_v21, %v2563_v15 }
 0x2be   : > { %v2687_v56 = vsel %vm441_vm0, %v5428_v20, 0.0 }
 0x2bf   : > { %v2685_v28 = vsel %vm441_vm0, %v5421_v22, 0.0 }
 0x2c0   : > { %v2686_v49 = vadd.f32 %v2685_v28, %v2684_v29 }
 0x2c2   : > { %v2688_v50 = vadd.f32 %v2687_v56, %v2686_v49 }
 0x2c7   : > { %v3347_v46 = vpop.f32.mrb[10].mxu1 }
 0x2c8   : > { %v2573_v59 = vpop.f32.mrb[11].mxu1  ;;  %v5438_v33 = vadd.f32 %v3347_v46, %v5346_v21 }
 0x2c9   : > { %v5431_v4 = vadd.f32 %v5346_v21, %v2573_v59 }
 0x2ca   : > { %v2691_v15 = vsel %vm441_vm0, %v5438_v33, 0.0 }
 0x2cb   : > { %v2689_v27 = vsel %vm441_vm0, %v5431_v4, 0.0 }
 0x2cc   : > { %v2690_v3 = vadd.f32 %v2689_v27, %v2688_v50 }
 0x2ce   : > { %v2692_v63 = vadd.f32 %v2691_v15, %v2690_v3 }
 0x2d4   : > { %v3350_v8 = vpop.f32.mrb[12].mxu1 }
 0x2d5   : > { %v2583_v45 = vpop.f32.mrb[13].mxu1  ;;  %v5448_v1 = vadd.f32 %v3350_v8, %v5346_v21 }
 0x2d6   : > { %v5441_v43 = vadd.f32 %v5346_v21, %v2583_v45 }
 0x2d7   : > { %v2695_v17 = vsel %vm441_vm0, %v5448_v1, 0.0 }
 0x2d8   : > { %v2693_v16 = vsel %vm441_vm0, %v5441_v43, 0.0 }
 0x2d9   : > { %v2694_v36 = vadd.f32 %v2693_v16, %v2692_v63 }
 0x2db   : > { %v2696_v12 = vadd.f32 %v2695_v17, %v2694_v36 }
 0x2e2   : > { %v3353_v40 = vpop.f32.mrb[14].mxu1 }
 0x2e3   : > { %v2593_v7 = vpop.f32.mrb[15].mxu1  ;;  %v5458_v9 = vadd.f32 %v3353_v40, %v5346_v21 }
 0x2e4   : > { %v5451_v60 = vadd.f32 %v5346_v21, %v2593_v7 }
 0x2e5   : > { %v2699_v34 = vsel %vm441_vm0, %v5458_v9, 0.0 }
 0x2e6   : > { %v2697_v32 = vsel %vm441_vm0, %v5451_v60, 0.0 }
 0x2e7   : > { %v2698_v51 = vadd.f32 %v2697_v32, %v2696_v12 }
 0x2e9   : > { %v2700_v59 = vadd.f32 %v2699_v34, %v2698_v51 }
 0x2f0   : > { %v3356_v26 = vpop.f32.mrb[16].mxu1 }
 0x2f1   : > { %v2603_v57 = vpop.f32.mrb[17].mxu1  ;;  %v5468_v35 = vadd.f32 %v3356_v26, %v5346_v21 }
 0x2f2   : > { %v5461_v46 = vadd.f32 %v5346_v21, %v2603_v57 }
 0x2f3   : > { %v2703_v8 = vsel %vm441_vm0, %v5468_v35, 0.0 }
 0x2f4   : > { %v2701_v61 = vsel %vm441_vm0, %v5461_v46, 0.0 }
 0x2f5   : > { %v2702_v52 = vadd.f32 %v2701_v61, %v2700_v59 }
 0x2f7   : > { %v2704_v0 = vadd.f32 %v2703_v8, %v2702_v52 }
 0x2fc   : > { %v3359_v38 = vpop.f32.mrb[18].mxu1 }
 0x2fd   : > { %v2613_v41 = vpop.f32.mrb[19].mxu1  ;;  %v5478_v25 = vadd.f32 %v3359_v38, %v5346_v21 }
 0x2fe   : > { %v5471_v37 = vadd.f32 %v5346_v21, %v2613_v41 }
 0x2ff   : > { %v2707_v19 = vsel %vm441_vm0, %v5478_v25, 0.0 }
 0x300   : > { %v2705_v45 = vsel %vm441_vm0, %v5471_v37, 0.0 }
 0x301   : > { %v2706_v23 = vadd.f32 %v2705_v45, %v2704_v0 }
 0x303   : > { %v2708_v40 = vadd.f32 %v2707_v19, %v2706_v23 }
 0x309   : > { %v3362_v54 = vpop.f32.mrb[20].mxu1 }
 0x30a   : > { %v2623_v5 = vpop.f32.mrb[21].mxu1  ;;  %v5488_v7 = vadd.f32 %v3362_v54, %v5346_v21 }
 0x30b   : > { %v5481_v24 = vadd.f32 %v5346_v21, %v2623_v5 }
 0x30c   : > { %v2711_v29 = vsel %vm441_vm0, %v5488_v7, 0.0 }
 0x30d   : > { %v2709_v6 = vsel %vm441_vm0, %v5481_v24, 0.0 }
 0x30e   : > { %v2710_v10 = vadd.f32 %v2709_v6, %v2708_v40  ;;  %v2737_v40 = vld [vmem:[%s5771_s8] sm:$0x1] }
 0x310   : > { %v2712_v28 = vadd.f32 %v2711_v29, %v2710_v10 }
 0x317   : > { %v3365_v14 = vpop.f32.mrb[22].mxu1 }
 0x318   : > { %v2633_v47 = vpop.f32.mrb[23].mxu1  ;;  %v5498_v50 = vadd.f32 %v3365_v14, %v5346_v21 }
 0x319   : > { %v5491_v48 = vadd.f32 %v5346_v21, %v2633_v47  ;;  %v2813_v47 = vld [vmem:[%s5772_s9 + $0x8] sm:$0xff] }
 0x31a   : > { %v2715_v3 = vsel %vm441_vm0, %v5498_v50, 0.0 }
 0x31b   : > { %v2713_v56 = vsel %vm441_vm0, %v5491_v48, 0.0 }
 0x31c   : > { %v2714_v57 = vadd.f32 %v2713_v56, %v2712_v28 }
 0x31e   : > { %v2716_v15 = vadd.f32 %v2715_v3, %v2714_v57 }
 0x322   : > { %v3368_v49 = vpop.f32.mrb[24].mxu1 }
 0x323   : > { %v2643_v26 = vpop.f32.mrb[25].mxu1  ;;  %v5508_v16 = vadd.f32 %v3368_v49, %v5346_v21 }
 0x324   : > { %v5501_v27 = vadd.f32 %v5346_v21, %v2643_v26 }
 0x325   : > { %v2719_v36 = vsel %vm441_vm0, %v5508_v16, 0.0 }
 0x326   : > { %v2717_v63 = vsel %vm441_vm0, %v5501_v27, 0.0 }
 0x327   : > { %v2718_v38 = vadd.f32 %v2717_v63, %v2716_v15 }
 0x329   : > { %v2720_v12 = vadd.f32 %v2719_v36, %v2718_v38  ;;  %v2895_v38 = vlaneseq }
 0x32b   : > { %v2896_v36 = vshrl.u32 %v2895_v38, 7 }
 0x330   : > { %v3371_v41 = vpop.f32.mrb[26].mxu1 }
 0x331   : > { %v2653_v17 = vpop.f32.mrb[27].mxu1  ;;  %v5513_v32 = vadd.f32 %v3371_v41, %v5346_v21  ;;  %v2897_v41 = vsub.s32 0, %v2896_v36  ;;  %v3667_v36 = vld [vmem:[%s3962_s27 + $0x70] sm:$0xff] }
 0x332   : > { %v5516_v51 = vadd.f32 %v5346_v21, %v2653_v17  ;;  %v2812_v21 = vld [vmem:[%s5772_s9] sm:$0xff] }
 0x333   : > { %v2723_v54 = vsel %vm441_vm0, %v5513_v32, 0.0  ;;  %v3437_v19 = vpack.c.bf16 %v2813_v47, %v2812_v21  ;;  %v3658_v21 = vld [vmem:[%s3962_s27 + $0x28] sm:$0xff] }
 0x334   : > { %v2721_v34 = vsel %vm441_vm0, %v5516_v51, 0.0 }
 0x335   : > { %v2722_v59 = vadd.f32 %v2721_v34, %v2720_v12 }
 0x337   : > { %v2724_v61 = vadd.f32 %v2723_v54, %v2722_v59 }
 0x339   : > { %v2725_v5 = vrot.slane %v2724_v61, 4 }
 0x33b   : > { %v2726_v52 = vadd.f32 %v2725_v5, %v2724_v61 }
 0x33d   : > { %v2727_v8 = vrot.slane %v2726_v52, 2 }
 0x33f   : > { %v2728_v0 = vadd.f32 %v2727_v8, %v2726_v52 }
 0x341   : > { %v2729_v45 = vrot.slane %v2728_v0, 1 }
 0x343   : > { %v2730_v23 = vadd.f32 %v2729_v45, %v2728_v0 }
 0x345   : > { %v2732_v14 = vmul.f32 0.00390625, %v2730_v23 }
 0x347   : > { %3381 = vmatmul.mubr.msk.f32.vlgmr.msra.gmra.mrb[36].mxu0 %vm441_vm0, %v2732_v14  ;;  %v3657_v14 = vld [vmem:[%s3962_s27 + $0x20] sm:$0xff] }
 0x348   : > { %3387 = vmatprep.mubr.msk.f32.mxu0 %vm3788_vm1, %v5322_v53  ;;  %3438 = vmatpush3.bf16.msra.mxu0 %v3437_v19  ;;  %v2814_v53 = vld [vmem:[%s5773_s10] sm:$0x1] }
 0x349   : > { %v3659_v19 = vld [vmem:[%s3962_s27 + $0x30] sm:$0xff] }
 0x41a   : > { %v2807_v6 = vpop.f32.mrb[36].mxu0 }
 0x41b   : > { %v2808_v10 = vadd.f32 %v2807_v6, %v2737_v40  ;;  %v3382_v29 = vpop.f32.mrb[37].mxu0  ;;  %v3660_v40 = vld [vmem:[%s3962_s27 + $0x38] sm:$0xff] }
 0x41d   : > { %v2811_v28 = vmax.f32 %v2808_v10, 0.0  ;;  %v3661_v10 = vld [vmem:[%s3962_s27 + $0x40] sm:$0xff] }
 0x41f   : > { %3388 = vmatmul.mubr.msk.f32.vlgmr.msra.gmra.mrb[38].mxu0 %vm2815_vm2, %v2811_v28  ;;  %v3662_v28 = vld [vmem:[%s3962_s27 + $0x48] sm:$0xff] }
 0x4f2   : > { %v2885_v49 = vpop.f32.mrb[38].mxu0 }
 0x4f3   : > { %v2886_v56 = vadd.f32 %v2885_v49, %v2814_v53  ;;  %v3389_v26 = vpop.f32.mrb[39].mxu0  ;;  %v3663_v49 = vld [vmem:[%s3962_s27 + $0x50] sm:$0xff] }
 0x4f4   : > { %v3664_v26 = vld [vmem:[%s3962_s27 + $0x58] sm:$0xff] }
 0x4f5   : > { %v2889_v57 = vsub.f32 0.0, %v2886_v56 }
 0x4f7   : > { %v2890_v3 = vmul.f32 1.442695, %v2889_v57 }
 0x4f9   : > { %3636 = vpow2.f32 %v2890_v3  ;;  %v3665_v3 = vld [vmem:[%s3962_s27 + $0x60] sm:$0xff] }
 0x503   : > { %v3637_v15 = vpop.eup %3636 }
 0x504   : > { %v2892_v63 = vadd.f32 1.0, %v3637_v15 }
 0x506   : > { %3638 = vrcp.f32 %v2892_v63  ;;  %v3666_v63 = vld [vmem:[%s3962_s27 + $0x68] sm:$0xff] }
 0x510   : > { %v3639_v17 = vpop.eup %3638 }
 0x511   : > { %v2898_v12 = vrot.slane %v3639_v17, %v2897_v41  ;;  %v3668_v17 = vld [vmem:[%s3962_s27 + $0x78] sm:$0xff] }
 0x513   : > { %v2899_v34 = vmul.f32 %v2898_v12, %v5352_v13  ;;  %v2900_v59 = vmul.f32 %v2898_v12, %v5349_v2  ;;  %v2901_v54 = vmul.f32 %v2898_v12, %v5355_v62  ;;  %v2902_v61 = vmul.f32 %v2898_v12, %v5376_v39 }
 0x514   : > { %v2903_v5 = vmul.f32 %v2898_v12, %v5379_v42  ;;  %v2904_v52 = vmul.f32 %v2898_v12, %v5388_v55  ;;  %v2905_v8 = vmul.f32 %v2898_v12, %v5391_v31  ;;  %v2906_v0 = vmul.f32 %v2898_v12, %v5398_v18 }
 0x515   : > { %v2907_v45 = vmul.f32 %v2898_v12, %v5401_v44  ;;  %v2908_v23 = vmul.f32 %v2898_v12, %v5408_v30  ;;  %v2909_v13 = vmul.f32 %v2898_v12, %v5411_v11  ;;  %v2910_v2 = vmul.f32 %v2898_v12, %v5418_v58 }
 0x516   : > { %v2911_v62 = vmul.f32 %v2898_v12, %v5421_v22  ;;  %v2912_v39 = vmul.f32 %v2898_v12, %v5428_v20  ;;  %v2913_v42 = vmul.f32 %v2898_v12, %v5431_v4  ;;  %v2914_v55 = vmul.f32 %v2898_v12, %v5438_v33 }
 0x517   : > { %v2915_v31 = vmul.f32 %v2898_v12, %v5441_v43  ;;  %v2916_v18 = vmul.f32 %v2898_v12, %v5448_v1  ;;  %v2917_v44 = vmul.f32 %v2898_v12, %v5451_v60  ;;  %v5557_v30 = vmul.f32 %v2898_v12, %v5458_v9 }
 0x518   : > { %v5560_v11 = vmul.f32 %v2898_v12, %v5461_v46  ;;  %v5563_v58 = vmul.f32 %v2898_v12, %v5468_v35  ;;  %v5566_v22 = vmul.f32 %v2898_v12, %v5471_v37  ;;  %v5569_v20 = vmul.f32 %v2898_v12, %v5478_v25  ;;  %v3653_v37 = vld [vmem:[%s3962_s27] sm:$0xff] }
 0x519   : > { %v5572_v4 = vmul.f32 %v2898_v12, %v5481_v24  ;;  %v5575_v33 = vmul.f32 %v2898_v12, %v5488_v7  ;;  %v5578_v43 = vmul.f32 %v2898_v12, %v5491_v48  ;;  %v5581_v1 = vmul.f32 %v2898_v12, %v5498_v50  ;;  %v3654_v24 = vld [vmem:[%s3962_s27 + $0x8] sm:$0xff]  ;;  %v3655_v48 = vld [vmem:[%s3962_s27 + $0x10] sm:$0xff] }
 0x51a   : > { %v5584_v60 = vmul.f32 %v2898_v12, %v5501_v27  ;;  %v5587_v9 = vmul.f32 %v2898_v12, %v5508_v16  ;;  %v5590_v46 = vmul.f32 %v2898_v12, %v5516_v51  ;;  %v5593_v35 = vmul.f32 %v2898_v12, %v5513_v32  ;;  %v3656_v27 = vld [vmem:[%s3962_s27 + $0x18] sm:$0xff] }
 0x51b   : > { %v2931_v25 = vadd.f32 %v3653_v37, %v2899_v34  ;;  %v2932_v7 = vadd.f32 %v3654_v24, %v2900_v59  ;;  %v2933_v50 = vadd.f32 %v3655_v48, %v2901_v54  ;;  %v2934_v16 = vadd.f32 %v3656_v27, %v2902_v61  ;;  %v3669_v34 = vld [vmem:[%s3962_s27 + $0x80] sm:$0xff]  ;;  %v3670_v54 = vld [vmem:[%s3962_s27 + $0x88] sm:$0xff]  ;;  %v3683_v37 = vld [vmem:[%s3962_s27 + $0xf0] sm:$0xff] }
 0x51c   : > { %v2935_v51 = vadd.f32 %v3657_v14, %v2903_v5  ;;  %v2936_v47 = vadd.f32 %v3658_v21, %v2904_v52  ;;  %v2937_v32 = vadd.f32 %v3659_v19, %v2905_v8  ;;  %v2938_v6 = vadd.f32 %v3660_v40, %v2906_v0  ;;  %v3671_v5 = vld [vmem:[%s3962_s27 + $0x90] sm:$0xff]  ;;  %v3672_v8 = vld [vmem:[%s3962_s27 + $0x98] sm:$0xff] }
 0x51d   : > { %v2939_v29 = vadd.f32 %v3661_v10, %v2907_v45  ;;  %v2940_v53 = vadd.f32 %v3662_v28, %v2908_v23  ;;  %v2941_v56 = vadd.f32 %v3663_v49, %v2909_v13  ;;  %v2942_v57 = vadd.f32 %v3664_v26, %v2910_v2  ;;  %2963 = vst.msk [vmem:[%s5609_s15] sm:$0xff] %vm441_vm0, %v2931_v25  ;;  %v3673_v45 = vld [vmem:[%s3962_s27 + $0xa0] sm:$0xff]  ;;  %v3674_v13 = vld [vmem:[%s3962_s27 + $0xa8] sm:$0xff]  ;;  %v3684_v24 = vld [vmem:[%s3962_s27 + $0xf8] sm:$0xff] }
 0x51e   : > { %2964 = vst.msk [vmem:[%s5609_s15 + $0x8] sm:$0xff] %vm441_vm0, %v2932_v7  ;;  %2965 = vst.msk [vmem:[%s5609_s15 + $0x10] sm:$0xff] %vm441_vm0, %v2933_v50  ;;  %v2943_v15 = vadd.f32 %v3665_v3, %v2911_v62  ;;  %v2944_v38 = vadd.f32 %v3666_v63, %v2912_v39  ;;  %v2945_v41 = vadd.f32 %v3667_v36, %v2913_v42  ;;  %v3675_v62 = vld [vmem:[%s3962_s27 + $0xb0] sm:$0xff]  ;;  %v3676_v42 = vld [vmem:[%s3962_s27 + $0xb8] sm:$0xff] }
 0x51f   : > { %2966 = vst.msk [vmem:[%s5609_s15 + $0x18] sm:$0xff] %vm441_vm0, %v2934_v16  ;;  %v2946_v12 = vadd.f32 %v3668_v17, %v2914_v55  ;;  %2967 = vst.msk [vmem:[%s5609_s15 + $0x20] sm:$0xff] %vm441_vm0, %v2935_v51  ;;  %v2947_v59 = vadd.f32 %v3669_v34, %v2915_v31  ;;  %v2948_v61 = vadd.f32 %v3670_v54, %v2916_v18  ;;  %v3677_v31 = vld [vmem:[%s3962_s27 + $0xc0] sm:$0xff] }
 0x520   : > { %2968 = vst.msk [vmem:[%s5609_s15 + $0x28] sm:$0xff] %vm441_vm0, %v2936_v47  ;;  %2969 = vst.msk [vmem:[%s5609_s15 + $0x30] sm:$0xff] %vm441_vm0, %v2937_v32  ;;  %v2949_v52 = vadd.f32 %v3671_v5, %v2917_v44  ;;  %v2950_v0 = vadd.f32 %v3672_v8, %v5557_v30  ;;  %v2951_v23 = vadd.f32 %v3673_v45, %v5560_v11  ;;  %v3678_v44 = vld [vmem:[%s3962_s27 + $0xc8] sm:$0xff]  ;;  %v3679_v11 = vld [vmem:[%s3962_s27 + $0xd0] sm:$0xff] }
 0x521   : > { %2970 = vst.msk [vmem:[%s5609_s15 + $0x38] sm:$0xff] %vm441_vm0, %v2938_v6  ;;  %2971 = vst.msk [vmem:[%s5609_s15 + $0x40] sm:$0xff] %vm441_vm0, %v2939_v29  ;;  %v2952_v2 = vadd.f32 %v3674_v13, %v5563_v58  ;;  %v2953_v39 = vadd.f32 %v3675_v62, %v5566_v22  ;;  %v2954_v55 = vadd.f32 %v3676_v42, %v5569_v20  ;;  %v3680_v22 = vld [vmem:[%s3962_s27 + $0xd8] sm:$0xff] }
 0x522   : > { %2972 = vst.msk [vmem:[%s5609_s15 + $0x48] sm:$0xff] %vm441_vm0, %v2940_v53  ;;  %2973 = vst.msk [vmem:[%s5609_s15 + $0x50] sm:$0xff] %vm441_vm0, %v2941_v56  ;;  %v2955_v18 = vadd.f32 %v3677_v31, %v5572_v4  ;;  %v2956_v30 = vadd.f32 %v3678_v44, %v5575_v33  ;;  %v2957_v58 = vadd.f32 %v3679_v11, %v5578_v43  ;;  %v3681_v4 = vld [vmem:[%s3962_s27 + $0xe0] sm:$0xff]  ;;  %v3682_v43 = vld [vmem:[%s3962_s27 + $0xe8] sm:$0xff]  ;;  %s3715_s27 = scalar_lea.vmem %s5687_s28, 4096 }
 0x523   : > { %2974 = vst.msk [vmem:[%s5609_s15 + $0x58] sm:$0xff] %vm441_vm0, %v2942_v57  ;;  %2975 = vst.msk [vmem:[%s5609_s15 + $0x60] sm:$0xff] %vm441_vm0, %v2943_v15  ;;  %v2958_v20 = vadd.f32 %v3680_v22, %v5581_v1  ;;  %v2959_v33 = vadd.f32 %v3681_v4, %v5584_v60  ;;  %v2960_v1 = vadd.f32 %v3682_v43, %v5587_v9  ;;  %p3716_p6 = scmp.ne.s32.totalorder %s5687_s28, %s3715_s27  ;;  %p3723_p10 = scmp.lt.s32.totalorder %s3721_s25, %s3715_s27 }
 0x524   : > { %2976 = vst.msk [vmem:[%s5609_s15 + $0x68] sm:$0xff] %vm441_vm0, %v2944_v38  ;;  %2977 = vst.msk [vmem:[%s5609_s15 + $0x70] sm:$0xff] %vm441_vm0, %v2945_v41  ;;  %v2961_v25 = vadd.f32 %v3683_v37, %v5590_v46  ;;  %v2962_v7 = vadd.f32 %v3684_v24, %v5593_v35 }
 0x525   : > { %2978 = vst.msk [vmem:[%s5609_s15 + $0x78] sm:$0xff] %vm441_vm0, %v2946_v12  ;;  %2979 = vst.msk [vmem:[%s5609_s15 + $0x80] sm:$0xff] %vm441_vm0, %v2947_v59  ;;  %p3717_p12 = pnand %p3716_p6, %p5784_p11  ;;  %p3724_p0 = por %p3723_p10, %p3722_p8 }
 0x526   : > { %2980 = vst.msk [vmem:[%s5609_s15 + $0x88] sm:$0xff] %vm441_vm0, %v2948_v61  ;;  %2981 = vst.msk [vmem:[%s5609_s15 + $0x90] sm:$0xff] %vm441_vm0, %v2949_v52 }
 0x527   : > { %2982 = vst.msk [vmem:[%s5609_s15 + $0x98] sm:$0xff] %vm441_vm0, %v2950_v0  ;;  %2983 = vst.msk [vmem:[%s5609_s15 + $0xa0] sm:$0xff] %vm441_vm0, %v2951_v23  ;;  %p3718_p13 = pneg %p3717_p12 }
 0x528   : > { %2984 = vst.msk [vmem:[%s5609_s15 + $0xa8] sm:$0xff] %vm441_vm0, %v2952_v2  ;;  %2985 = vst.msk [vmem:[%s5609_s15 + $0xb0] sm:$0xff] %vm441_vm0, %v2953_v39 }
 0x529   : > { %2986 = vst.msk [vmem:[%s5609_s15 + $0xb8] sm:$0xff] %vm441_vm0, %v2954_v55  ;;  %2987 = vst.msk [vmem:[%s5609_s15 + $0xc0] sm:$0xff] %vm441_vm0, %v2955_v18  ;;  %p3725_p2 = pnand %p3724_p0, %p3718_p13 }
 0x52a   : > { %2988 = vst.msk [vmem:[%s5609_s15 + $0xc8] sm:$0xff] %vm441_vm0, %v2956_v30  ;;  %2989 = vst.msk [vmem:[%s5609_s15 + $0xd0] sm:$0xff] %vm441_vm0, %v2957_v58 }
 0x52b   : > { %2990 = vst.msk [vmem:[%s5609_s15 + $0xd8] sm:$0xff] %vm441_vm0, %v2958_v20  ;;  %2991 = vst.msk [vmem:[%s5609_s15 + $0xe0] sm:$0xff] %vm441_vm0, %v2959_v33 }
 0x52c   : > { %2992 = vst.msk [vmem:[%s5609_s15 + $0xe8] sm:$0xff] %vm441_vm0, %v2960_v1  ;;  %2993 = vst.msk [vmem:[%s5609_s15 + $0xf0] sm:$0xff] %vm441_vm0, %v2961_v25 }
 0x52d   : > { %2994 = vst.msk [vmem:[%s5609_s15 + $0xf8] sm:$0xff] %vm441_vm0, %v2962_v7 }
 0x52e   : > { %3728 = shalt.err (!%p3725_p2)
}
 0x52f   : > { %s3729_s16 = scalar_lea.hbm %s5683_s19, 4096  ;;  %s3733_s14 = scalar_lea.hbm %s5774_s11, 8192 }
 0x530   : > { %p3730_p4 = scmp.ne.s32.totalorder %s5683_s19, %s3729_s16  ;;  %p3734_p9 = scmp.lt.u32.totalorder %s5683_s19, %s5774_s11 }
 0x531   : > { %p3735_p1 = scmp.lt.u32.totalorder %s3733_s14, %s3729_s16  ;;  %p3737_p6 = scmp.lt.u32.totalorder %s3729_s16, %s5683_s19 }
 0x532   : > { %p3731_p5 = pnand %p3730_p4, %p5784_p11 }
 0x533   : > { %p3736_p3 = por %p3735_p1, %p3734_p9 }
 0x534   : > { %p3732_p7 = pneg %p3731_p5 }
 0x535   : > { %p3738_p12 = por %p3737_p6, %p3736_p3 }
 0x537   : > { %p3739_p13 = pnand %p3738_p12, %p3732_p7 }
 0x539   : > { %3742 = shalt.err (!%p3739_p13)
}
 0x53a   : > { %s3790_s27 = smov 128   ;;  %s3791_s24 = smov 8  }
 0x53b   : > { %3457 = dma.vmem_to_hbm [thread:$0]  (%p5784_p11), %s5687_s28, 4096, %s5683_s19, %s2996_s21, %s3790_s27, %s3790_s27, %s3791_s24  }
 0x53c PF: > { %s3024_s25 = sand.u32 1, %s3769_s17   ;;  %p5785_p8 = scmp.ne.s32.totalorder %s5782_s30, 0 }
 0x53d   : > { %p5786_p10 = scmp.ge.s32.totalorder %s3781_s20, 2  ;;  %s3025_s16 = scalar_lea.sflag [#allocation5], %s3024_s25 }
 0x53f   : > { %p3464_p0 = pnand %p5786_p10, %p5785_p8 }
 0x541   : > { %3764 = dma.done.wait (!%p3464_p0), %s3025_s16, 4096  }
 0x542   : > { %3766 = vsyncadd (!%p3464_p0), %s3025_s16, 4294963200  ;;  %s5787_s15 = sld [smem:[#allocation9_spill]]  ;;  %s5788_s19 = sld [smem:[#allocation10_spill]] }
 0x543   : > { %p24_p2 = scmp.ge.s32.totalorder %s3877_s23, 4   ;;  %s5789_s17 = smov %s3773_s18 }
 0x544   : > { %s5791_s20 = smov %s3877_s23 }
 0x545   :  { %26 = sbr.rel (!%p24_p2) target bundleno = 5 (0x5), region = 111 }
 0x548   : > { %s5790_s18 = smov %s5787_s15 }
 0x54c   :  { %3030 = vsyncpa [#allocation4], 1 }
 0x54d   :  { %3032 = vsyncpa [#allocation4 + $0x1], 1 }
 0x54e   :  { %3033 = vsyncpa [#allocation5], 1 }
 0x54f   :  { %3035 = vsyncpa [#allocation5 + $0x1], 1 }

</bundles_post_ra>
